<compile_context>
chip_gen: v7x
topology: tpu7x:2x2x1
jax: 0.10.0
libtpu: 0.0.40
codegen_flags: <defaults>
</compile_context>

<pallas_src>
import functools

import jax
import jax.numpy as jnp
from jax import lax
from jax.experimental import pallas as pl
from jax.experimental.pallas import tpu as pltpu


# ----------------------------- fused Pallas kernel -----------------------------

def _stgcn_fused_kernel(x_ref, w1_ref, b1_ref, wa_ref, ba_ref, cheb_ref,
                        wgc_ref, bgc_ref, w2_ref, b2_ref, gam_ref, bet_ref,
                        prow_ref, pgrp_ref, wh_ref, bh_ref, o_ref, *, inv_cnt):
    """Fused STConvBlock + output head for one batch-packed block.

    Wide layout: activations are (Bblk*n_vertex, time*channels) matrices, rows
    batch-major / vertex-minor, columns time-major / channel-minor.  Big dots
    use bf16 operands + f32 accumulation (one MXU pass each).
    """
    f32, bf16 = jnp.float32, jnp.bfloat16

    def glu_gate(v):
        # sigmoid via EUP exp + approximate EUP reciprocal (frees VALU slots).
        return pl.reciprocal(1.0 + jnp.exp(-v), approx=True)

    x = x_ref[...]                                           # (M, T*Cin) f32

    # ---- temporal GLU conv 1: one banded bf16 matmul (pad-residual folded) ----
    half1 = b1_ref.shape[1] // 2                             # To1 * C1
    acc1 = jnp.dot(x.astype(bf16), w1_ref[...],
                   preferred_element_type=f32) + b1_ref[...]
    h1 = acc1[:, :half1] * glu_gate(acc1[:, half1:])         # (M, To1*C1)

    # ---- GraphConvLayer align (1x1 conv == time-block-diagonal matmul) ----
    g = jnp.dot(h1.astype(bf16), wa_ref[...],
                preferred_element_type=f32) + ba_ref[...]    # (M, To1*C2)

    # ---- Chebyshev graph conv: precomputed batch-block-diagonal T_k(gso),
    #      per-k accumulation (no lane concat; contraction dim <= 128) ----
    gb = g.astype(bf16)
    ks = wgc_ref.shape[0]
    acc_gc = jnp.dot(gb, wgc_ref[0], preferred_element_type=f32)      # T_0 = I
    for k in range(1, ks):
        tk = jnp.dot(cheb_ref[k - 1], gb, preferred_element_type=f32)
        acc_gc = acc_gc + jnp.dot(tk.astype(bf16), wgc_ref[k],
                                  preferred_element_type=f32)
    gc = jnp.maximum(acc_gc + bgc_ref[...] + g, 0.0)         # bias + residual + ReLU

    # ---- temporal GLU conv 2 (banded matmul, pad-residual folded) ----
    half2 = b2_ref.shape[1] // 2                             # Ko * C3
    acc2 = jnp.dot(gc.astype(bf16), w2_ref[...],
                   preferred_element_type=f32) + b2_ref[...]
    h2 = acc2[:, :half2] * glu_gate(acc2[:, half2:])         # (M, Ko*C3)

    # ---- LayerNorm over [n_vertex, C3] per (batch, time): both moments in one
    #      fused stats pipeline (per-batch row-sum then per-time group-sum as
    #      block-diagonal matmuls).  Kept f32/HIGHEST: the E[x^2]-E[x]^2
    #      cancellation is the numerically sensitive spot. ----
    stats = jnp.concatenate([h2, h2 * h2], axis=1)           # (M, 2*Ko*C3)
    rowsum = jnp.dot(prow_ref[...], stats, preferred_element_type=f32,
                     precision=lax.Precision.HIGHEST)
    moments = jnp.dot(rowsum, pgrp_ref[...], preferred_element_type=f32,
                      precision=lax.Precision.HIGHEST) * inv_cnt
    mean_w = moments[:, :half2]
    var_w = jnp.maximum(moments[:, half2:] - mean_w * mean_w, 0.0)
    hln = (h2 - mean_w) * lax.rsqrt(var_w + 1e-5) * gam_ref[...] + bet_ref[...]

    # ---- output head: channels -> 1 per (t, n); columns padded to 128 lanes so
    #      the HBM store is an unmasked, lane-dense vst (wrapper slices [:Ko]) ----
    y = jnp.dot(hln.astype(bf16), wh_ref[...],
                preferred_element_type=f32) + bh_ref[...]
    o_ref[...] = y.astype(o_ref.dtype)


# ----------------------------- glue: structured-weight builders -----------------------------

def _build_temporal_glu_weight(w, b, t_out, residual_cin):
    """Banded weight for causal conv (Kt,1) + GLU in the wide layout.

    w: (Kt, Cin, 2*C)  (w[k, i, o] == torch_conv_weight[o, i, k, 0]);  b: (1, 2*C)
    Returns W_big (T_in*Cin, 2*t_out*C) and b_big (1, 2*t_out*C).  Columns are
    [P block | Q block], each time-major / channel-minor; the zero-channel-pad
    residual (aligned input sliced at [Kt-1:]) is folded into the P block.
    """
    kt, cin, two_c = w.shape
    c = two_c // 2
    t_in = t_out + kt - 1
    wp = jnp.zeros((t_in * cin, t_out * c), dtype=jnp.float32)
    wq = jnp.zeros((t_in * cin, t_out * c), dtype=jnp.float32)
    for t in range(t_out):
        for k in range(kt):
            r = (t + k) * cin
            wp = wp.at[r:r + cin, t * c:(t + 1) * c].set(w[k, :, :c])
            wq = wq.at[r:r + cin, t * c:(t + 1) * c].set(w[k, :, c:])
        r = (t + kt - 1) * cin
        wp = wp.at[r:r + residual_cin, t * c:t * c + residual_cin].add(
            jnp.eye(residual_cin, dtype=jnp.float32))
    w_big = jnp.concatenate([wp, wq], axis=1)
    b_big = jnp.concatenate([jnp.tile(b[0, :c], t_out), jnp.tile(b[0, c:], t_out)])
    return w_big, b_big[None, :]


def _cheb_basis(gso, ks):
    """Chebyshev polynomial matrices T_k(gso), k = 0..Ks-1 (list)."""
    n = gso.shape[0]
    mats = [jnp.eye(n, dtype=gso.dtype)]
    if ks > 1:
        mats.append(gso)
    for _ in range(2, ks):
        mats.append(2.0 * jnp.dot(gso, mats[-1], precision=lax.Precision.HIGHEST)
                    - mats[-2])
    return mats


# ----------------------------- model forward -----------------------------

def stgcn_cheb_forward(x_nchw, params, Kt=3, bblk_max=8, out_pad=128):
    """Forward pass of STGCNChebGraphConv (one STConvBlock, inference mode)."""
    B, Cin, T, N = x_nchw.shape
    C2 = params['w_align'].shape[1]
    C3 = params['w_tc2'].shape[-1] // 2
    Ks = params['w_gc'].shape[0]
    To1 = T - (Kt - 1)
    Ko = To1 - (Kt - 1)
    f32, bf16 = jnp.float32, jnp.bfloat16

    # Batch packing: M = bblk*N rows per grid step fills the MXU rows; keep at
    # least 2 grid blocks (bblk <= ceil(B/2)) so v7x's two TensorCores get work.
    bblk = max(1, min(bblk_max, pl.cdiv(B, 2)))
    n_blocks = pl.cdiv(B, bblk)
    b_pad = n_blocks * bblk
    M = bblk * N

    # --- structured, wide-layout operands (constant-folded under jit) ---
    w1_big, b1_big = _build_temporal_glu_weight(params['w_tc1'], params['b_tc1'], To1, Cin)
    w2_big, b2_big = _build_temporal_glu_weight(params['w_tc2'], params['b_tc2'], Ko, C2)
    wa_big = jnp.kron(jnp.eye(To1, dtype=f32), params['w_align'])
    ba_big = jnp.tile(params['b_align'][0], To1)[None, :]
    cheb = _cheb_basis(params['gso'], Ks)
    eye_b = jnp.eye(bblk, dtype=f32)
    if Ks > 1:
        cheb_big = jnp.stack([jnp.kron(eye_b, cheb[k]) for k in range(1, Ks)])
    else:
        cheb_big = jnp.zeros((1, M, M), dtype=f32)            # unused placeholder
    wgc_big = jnp.stack([jnp.kron(jnp.eye(To1, dtype=f32), params['w_gc'][k])
                         for k in range(Ks)])
    bgc_big = jnp.tile(params['b_gc'][0], To1)[None, :]
    gam_big = jnp.tile(jnp.tile(params['ln_gamma'], (1, Ko)), (bblk, 1))
    bet_big = jnp.tile(jnp.tile(params['ln_beta'], (1, Ko)), (bblk, 1))
    prow = jnp.kron(eye_b, jnp.ones((N, N), dtype=f32))       # per-batch row sums
    pgrp = jnp.kron(jnp.eye(2 * Ko, dtype=f32),
                    jnp.ones((C3, C3), dtype=f32))            # per-time group sums
    # TODO(synk): My_OutputBlock definition not provided in the reference source;
    # implemented as a per-(time, vertex) linear head mapping channels -> 1.
    wh_big = jnp.kron(jnp.eye(Ko, dtype=f32), params['w_out'])      # (Ko*C3, Ko)
    wh_pad = jnp.zeros((Ko * C3, out_pad), dtype=f32).at[:, :Ko].set(wh_big)
    bh_pad = jnp.zeros((1, out_pad), dtype=f32).at[:, :Ko].set(params['b_out'][0, 0])

    consts = (w1_big.astype(bf16), b1_big,
              wa_big.astype(bf16), ba_big,
              cheb_big.astype(bf16),
              wgc_big.astype(bf16), bgc_big,
              w2_big.astype(bf16), b2_big,
              gam_big, bet_big,
              prow, pgrp,
              wh_pad.astype(bf16), bh_pad)

    # lane-dense wide input: rows batch-major / vertex-minor, cols time-major /
    # channel-minor; batch zero-padded up to a multiple of bblk.
    x_wide = jnp.transpose(x_nchw, (0, 3, 2, 1)).reshape(B, N, T * Cin)
    x_wide = jnp.pad(x_wide, ((0, b_pad - B), (0, 0), (0, 0)))
    x_wide = x_wide.reshape(b_pad * N, T * Cin).astype(f32)

    def _const_spec(a):
        return pl.BlockSpec(a.shape, lambda i, _nd=a.ndim: (0,) * _nd)

    kernel = functools.partial(_stgcn_fused_kernel, inv_cnt=1.0 / float(N * C3))

    out = pl.pallas_call(
        kernel,
        out_shape=jax.ShapeDtypeStruct((b_pad * N, out_pad), f32),
        grid=(n_blocks,),
        in_specs=[pl.BlockSpec((M, T * Cin), lambda i: (i, 0))]
                 + [_const_spec(a) for a in consts],
        out_specs=pl.BlockSpec((M, out_pad), lambda i: (i, 0)),
        compiler_params=pltpu.CompilerParams(
            dimension_semantics=("parallel",)),
        # NOTE: all operands are KB-scale at this config on every TPU gen.  At
        # realistic STGCN sizes (n_vertex ~ 200+, C ~ 64) re-derive the VMEM
        # budget (v7x has only 64 MiB) and set vmem_limit_bytes / keep a time
        # grid axis instead of kron-ing the full time extent into the weights.
    )(x_wide, *consts)

    # back to PyTorch NCHW convention: (B, 1, Ko, n_vertex)
    y = out.reshape(b_pad, N, out_pad)[:B, :, :Ko]            # (B, N, Ko)
    return jnp.transpose(y, (0, 2, 1))[:, None, :, :]


# ----------------------------- pure-JAX reference (for correctness check) -----------------------------

def _reference_forward(x_nchw, params, Kt=3):
    x = jnp.transpose(x_nchw, (0, 2, 3, 1))                # (B, T, N, Cin)

    def temporal_glu(h, w, b):
        kt, cin, two_c = w.shape
        c = two_c // 2
        to = h.shape[1] - kt + 1
        acc = sum(jnp.einsum('btnc,co->btno', h[:, k:k + to], w[k])
                  for k in range(kt)) + b[0]
        x_in = jnp.pad(h[:, kt - 1:], ((0, 0), (0, 0), (0, 0), (0, c - cin)))
        return (acc[..., :c] + x_in) * jax.nn.sigmoid(acc[..., c:])

    h1 = temporal_glu(x, params['w_tc1'], params['b_tc1'])
    g = jnp.einsum('btnc,co->btno', h1, params['w_align']) + params['b_align'][0]
    gso, wg = params['gso'], params['w_gc']
    Ks = wg.shape[0]
    terms = [g]
    if Ks > 1:
        terms.append(jnp.einsum('ij,btjc->btic', gso, g))
    for _ in range(2, Ks):
        terms.append(2.0 * jnp.einsum('ij,btjc->btic', gso, terms[-1]) - terms[-2])
    gc = sum(jnp.einsum('btnc,co->btno', terms[k], wg[k])
             for k in range(Ks)) + params['b_gc'][0]
    gc = jnp.maximum(gc + g, 0.0)
    h2 = temporal_glu(gc, params['w_tc2'], params['b_tc2'])
    mean = jnp.mean(h2, axis=(2, 3), keepdims=True)
    var = jnp.mean((h2 - mean) ** 2, axis=(2, 3), keepdims=True)
    hln = (h2 - mean) * lax.rsqrt(var + 1e-5) * params['ln_gamma'] + params['ln_beta']
    y = jnp.einsum('btnc,co->btno', hln, params['w_out']) + params['b_out'][0]
    return jnp.transpose(y, (0, 3, 1, 2))                  # (B, 1, Ko, N)


# ----------------------------- main -----------------------------

if __name__ == "__main__":
    # Config consistent with the module:
    #   blocks = [[4], [16, 8, 16], [32], [1]]  -> len(blocks)-3 = 1 STConvBlock
    #   Kt = Ks = 3, n_his = 8, n_vertex = 16, act_func = 'glu',
    #   graph_conv_type = 'cheb_graph_conv', enable_bias = True
    #   Ko = n_his - 1*2*(Kt-1) = 4 > 1 -> output block applied.
    # B = 16 so batch packing gives 2 grid blocks of 8 (M = 128 MXU rows each).
    B, C_in, n_his, n_vertex = 16, 4, 8, 16
    Kt, Ks = 3, 3
    ch = [16, 8, 16]

    key = jax.random.PRNGKey(0)
    ks = jax.random.split(key, 12)

    def init(k, shape, scale=0.1):
        return scale * jax.random.normal(k, shape, dtype=jnp.float32)

    # Deterministic graph shift operator (row-sum normalized symmetric matrix).
    a = jax.random.normal(ks[0], (n_vertex, n_vertex), dtype=jnp.float32)
    a = 0.5 * (a + a.T)
    gso = a / (jnp.max(jnp.sum(jnp.abs(a), axis=1)) + 1e-6)

    params = {
        'gso':      gso,
        # TemporalConvLayer 1: CausalConv2d(4 -> 2*16, kernel (Kt,1))
        'w_tc1':    init(ks[1], (Kt, C_in, 2 * ch[0])),
        'b_tc1':    init(ks[2], (1, 2 * ch[0])),
        # GraphConvLayer align: Conv2d(16 -> 8, 1x1)
        'w_align':  init(ks[3], (ch[0], ch[1])),
        'b_align':  init(ks[4], (1, ch[1])),
        # ChebGraphConv(8, 8, Ks)
        'w_gc':     init(ks[5], (Ks, ch[1], ch[1])),
        'b_gc':     init(ks[6], (1, ch[1])),
        # TemporalConvLayer 2: CausalConv2d(8 -> 2*16, kernel (Kt,1))
        'w_tc2':    init(ks[7], (Kt, ch[1], 2 * ch[2])),
        'b_tc2':    init(ks[8], (1, 2 * ch[2])),
        # LayerNorm([n_vertex, ch[2]]) affine (PyTorch default init: ones / zeros)
        'ln_gamma': jnp.ones((n_vertex, ch[2]), dtype=jnp.float32),
        'ln_beta':  jnp.zeros((n_vertex, ch[2]), dtype=jnp.float32),
        # Output head (see TODO in stgcn_cheb_forward)
        'w_out':    init(ks[9], (ch[2], 1)),
        'b_out':    init(ks[10], (1, 1)),
    }

    # PyTorch NCHW input: (batch, channels, n_his, n_vertex)
    x = jax.random.normal(ks[11], (B, C_in, n_his, n_vertex), dtype=jnp.float32)

    fwd = jax.jit(lambda xx: stgcn_cheb_forward(xx, params, Kt=Kt))
    out = jax.block_until_ready(fwd(x))

    Ko = n_his - 1 * 2 * (Kt - 1)
    assert out.shape == (B, 1, Ko, n_vertex), out.shape
    assert bool(jnp.all(jnp.isfinite(out)))

    # correctness check against a pure-JAX (f32, highest-precision) reference;
    # tolerance loosened per review for the bf16-operand MXU path.
    with jax.default_matmul_precision("highest"):
        ref = jax.block_until_ready(
            jax.jit(lambda xx: _reference_forward(xx, params, Kt=Kt))(x))
    max_err = float(jnp.max(jnp.abs(out - ref)))
    assert jnp.allclose(out, ref, rtol=4e-2, atol=4e-2), max_err

    print("KERNEL_OK")
</pallas_src>

<mosaic_0001>
module attributes {stable_mosaic.version = 11 : i64} {
  func.func @_stgcn_fused_kernel(%arg0: i32, %arg1: memref<128x32xf32, #tpu.memory_space<vmem>>, %arg2: memref<32x192xbf16, #tpu.memory_space<vmem>>, %arg3: memref<1x192xf32, #tpu.memory_space<vmem>>, %arg4: memref<96x48xbf16, #tpu.memory_space<vmem>>, %arg5: memref<1x48xf32, #tpu.memory_space<vmem>>, %arg6: memref<2x128x128xbf16, #tpu.memory_space<vmem>>, %arg7: memref<3x48x48xbf16, #tpu.memory_space<vmem>>, %arg8: memref<1x48xf32, #tpu.memory_space<vmem>>, %arg9: memref<48x128xbf16, #tpu.memory_space<vmem>>, %arg10: memref<1x128xf32, #tpu.memory_space<vmem>>, %arg11: memref<128x64xf32, #tpu.memory_space<vmem>>, %arg12: memref<128x64xf32, #tpu.memory_space<vmem>>, %arg13: memref<128x128xf32, #tpu.memory_space<vmem>>, %arg14: memref<128x128xf32, #tpu.memory_space<vmem>>, %arg15: memref<64x128xbf16, #tpu.memory_space<vmem>>, %arg16: memref<1x128xf32, #tpu.memory_space<vmem>>, %arg17: memref<128x128xf32, #tpu.memory_space<vmem>>) attributes {dimension_semantics = [#tpu.dimension_semantics<parallel>], iteration_bounds = array<i64: 2>, scalar_prefetch = 0 : i64, scratch_operands = 0 : i64, tpu.core_type = #tpu.core_type<tc>, window_params = [{transform_indices = @transform_0, window_bounds = array<i64: 128, 32>}, {pipeline_mode = #tpu.pipeline_mode<synchronous>, transform_indices = @transform_1, window_bounds = array<i64: 32, 192>}, {pipeline_mode = #tpu.pipeline_mode<synchronous>, transform_indices = @transform_2, window_bounds = array<i64: 1, 192>}, {pipeline_mode = #tpu.pipeline_mode<synchronous>, transform_indices = @transform_3, window_bounds = array<i64: 96, 48>}, {pipeline_mode = #tpu.pipeline_mode<synchronous>, transform_indices = @transform_4, window_bounds = array<i64: 1, 48>}, {pipeline_mode = #tpu.pipeline_mode<synchronous>, transform_indices = @transform_5, window_bounds = array<i64: 2, 128, 128>}, {pipeline_mode = #tpu.pipeline_mode<synchronous>, transform_indices = @transform_6, window_bounds = array<i64: 3, 48, 48>}, {pipeline_mode = #tpu.pipeline_mode<synchronous>, transform_indices = @transform_7, window_bounds = array<i64: 1, 48>}, {pipeline_mode = #tpu.pipeline_mode<synchronous>, transform_indices = @transform_8, window_bounds = array<i64: 48, 128>}, {pipeline_mode = #tpu.pipeline_mode<synchronous>, transform_indices = @transform_9, window_bounds = array<i64: 1, 128>}, {pipeline_mode = #tpu.pipeline_mode<synchronous>, transform_indices = @transform_10, window_bounds = array<i64: 128, 64>}, {pipeline_mode = #tpu.pipeline_mode<synchronous>, transform_indices = @transform_11, window_bounds = array<i64: 128, 64>}, {pipeline_mode = #tpu.pipeline_mode<synchronous>, transform_indices = @transform_12, window_bounds = array<i64: 128, 128>}, {pipeline_mode = #tpu.pipeline_mode<synchronous>, transform_indices = @transform_13, window_bounds = array<i64: 128, 128>}, {pipeline_mode = #tpu.pipeline_mode<synchronous>, transform_indices = @transform_14, window_bounds = array<i64: 64, 128>}, {pipeline_mode = #tpu.pipeline_mode<synchronous>, transform_indices = @transform_15, window_bounds = array<i64: 1, 128>}, {transform_indices = @transform_16, window_bounds = array<i64: 128, 128>}]} {
    %c0 = arith.constant 0 : index
    %c0_0 = arith.constant 0 : index
    %0 = vector.load %arg1[%c0, %c0_0] : memref<128x32xf32, #tpu.memory_space<vmem>>, vector<128x32xf32>
    %1 = arith.truncf %0 : vector<128x32xf32> to vector<128x32xbf16>
    %c0_1 = arith.constant 0 : index
    %c0_2 = arith.constant 0 : index
    %2 = vector.load %arg2[%c0_1, %c0_2] : memref<32x192xbf16, #tpu.memory_space<vmem>>, vector<32x192xbf16>
    %cst = arith.constant dense<0.000000e+00> : vector<128x192xf32>
    %3 = tpu.matmul %1, %2, %cst {dimension_numbers = #tpu.dot_dimension_numbers<[1], [0], [0], [1], [0, 0, 1, 1], [], []>} : vector<128x32xbf16>, vector<32x192xbf16>, vector<128x192xf32> -> vector<128x192xf32>
    %c0_3 = arith.constant 0 : index
    %c0_4 = arith.constant 0 : index
    %4 = vector.load %arg3[%c0_3, %c0_4] : memref<1x192xf32, #tpu.memory_space<vmem>>, vector<1x192xf32>
    %5 = vector.broadcast %4 : vector<1x192xf32> to vector<128x192xf32>
    %6 = arith.addf %3, %5 : vector<128x192xf32>
    %7 = vector.extract_strided_slice %6 {offsets = [0, 0], sizes = [128, 96], strides = [1, 1]} : vector<128x192xf32> to vector<128x96xf32>
    %8 = vector.extract_strided_slice %6 {offsets = [0, 96], sizes = [128, 96], strides = [1, 1]} : vector<128x192xf32> to vector<128x96xf32>
    %cst_5 = arith.constant 0.000000e+00 : f32
    %9 = vector.broadcast %cst_5 : f32 to vector<128x96xf32>
    %10 = arith.subf %9, %8 : vector<128x96xf32>
    %11 = math.exp %10 : vector<128x96xf32>
    %cst_6 = arith.constant 1.000000e+00 : f32
    %12 = vector.broadcast %cst_6 : f32 to vector<128x96xf32>
    %13 = arith.addf %12, %11 : vector<128x96xf32>
    %14 = tpu.reciprocal %13 {approx = true} : vector<128x96xf32> -> vector<128x96xf32>
    %15 = arith.mulf %7, %14 : vector<128x96xf32>
    %16 = arith.truncf %15 : vector<128x96xf32> to vector<128x96xbf16>
    %c0_7 = arith.constant 0 : index
    %c0_8 = arith.constant 0 : index
    %17 = vector.load %arg4[%c0_7, %c0_8] : memref<96x48xbf16, #tpu.memory_space<vmem>>, vector<96x48xbf16>
    %cst_9 = arith.constant dense<0.000000e+00> : vector<128x48xf32>
    %18 = tpu.matmul %16, %17, %cst_9 {dimension_numbers = #tpu.dot_dimension_numbers<[1], [0], [0], [1], [0, 0, 1, 1], [], []>} : vector<128x96xbf16>, vector<96x48xbf16>, vector<128x48xf32> -> vector<128x48xf32>
    %c0_10 = arith.constant 0 : index
    %c0_11 = arith.constant 0 : index
    %19 = vector.load %arg5[%c0_10, %c0_11] : memref<1x48xf32, #tpu.memory_space<vmem>>, vector<1x48xf32>
    %20 = vector.broadcast %19 : vector<1x48xf32> to vector<128x48xf32>
    %21 = arith.addf %18, %20 : vector<128x48xf32>
    %22 = arith.truncf %21 : vector<128x48xf32> to vector<128x48xbf16>
    %c0_12 = arith.constant 0 : index
    %c0_13 = arith.constant 0 : index
    %c0_14 = arith.constant 0 : index
    %23 = vector.load %arg7[%c0_12, %c0_13, %c0_14] : memref<3x48x48xbf16, #tpu.memory_space<vmem>>, vector<1x48x48xbf16>
    %24 = vector.shape_cast %23 : vector<1x48x48xbf16> to vector<48x48xbf16>
    %cst_15 = arith.constant dense<0.000000e+00> : vector<128x48xf32>
    %25 = tpu.matmul %22, %24, %cst_15 {dimension_numbers = #tpu.dot_dimension_numbers<[1], [0], [0], [1], [0, 0, 1, 1], [], []>} : vector<128x48xbf16>, vector<48x48xbf16>, vector<128x48xf32> -> vector<128x48xf32>
    %c0_16 = arith.constant 0 : index
    %c0_17 = arith.constant 0 : index
    %c0_18 = arith.constant 0 : index
    %26 = vector.load %arg6[%c0_16, %c0_17, %c0_18] : memref<2x128x128xbf16, #tpu.memory_space<vmem>>, vector<1x128x128xbf16>
    %27 = vector.shape_cast %26 : vector<1x128x128xbf16> to vector<128x128xbf16>
    %cst_19 = arith.constant dense<0.000000e+00> : vector<128x48xf32>
    %28 = tpu.matmul %27, %22, %cst_19 {dimension_numbers = #tpu.dot_dimension_numbers<[1], [0], [0], [1], [0, 0, 1, 1], [], []>} : vector<128x128xbf16>, vector<128x48xbf16>, vector<128x48xf32> -> vector<128x48xf32>
    %29 = arith.truncf %28 : vector<128x48xf32> to vector<128x48xbf16>
    %c1 = arith.constant 1 : index
    %c0_20 = arith.constant 0 : index
    %c0_21 = arith.constant 0 : index
    %30 = vector.load %arg7[%c1, %c0_20, %c0_21] : memref<3x48x48xbf16, #tpu.memory_space<vmem>>, vector<1x48x48xbf16>
    %31 = vector.shape_cast %30 : vector<1x48x48xbf16> to vector<48x48xbf16>
    %cst_22 = arith.constant dense<0.000000e+00> : vector<128x48xf32>
    %32 = tpu.matmul %29, %31, %cst_22 {dimension_numbers = #tpu.dot_dimension_numbers<[1], [0], [0], [1], [0, 0, 1, 1], [], []>} : vector<128x48xbf16>, vector<48x48xbf16>, vector<128x48xf32> -> vector<128x48xf32>
    %33 = arith.addf %25, %32 : vector<128x48xf32>
    %c1_23 = arith.constant 1 : index
    %c0_24 = arith.constant 0 : index
    %c0_25 = arith.constant 0 : index
    %34 = vector.load %arg6[%c1_23, %c0_24, %c0_25] : memref<2x128x128xbf16, #tpu.memory_space<vmem>>, vector<1x128x128xbf16>
    %35 = vector.shape_cast %34 : vector<1x128x128xbf16> to vector<128x128xbf16>
    %cst_26 = arith.constant dense<0.000000e+00> : vector<128x48xf32>
    %36 = tpu.matmul %35, %22, %cst_26 {dimension_numbers = #tpu.dot_dimension_numbers<[1], [0], [0], [1], [0, 0, 1, 1], [], []>} : vector<128x128xbf16>, vector<128x48xbf16>, vector<128x48xf32> -> vector<128x48xf32>
    %37 = arith.truncf %36 : vector<128x48xf32> to vector<128x48xbf16>
    %c2 = arith.constant 2 : index
    %c0_27 = arith.constant 0 : index
    %c0_28 = arith.constant 0 : index
    %38 = vector.load %arg7[%c2, %c0_27, %c0_28] : memref<3x48x48xbf16, #tpu.memory_space<vmem>>, vector<1x48x48xbf16>
    %39 = vector.shape_cast %38 : vector<1x48x48xbf16> to vector<48x48xbf16>
    %cst_29 = arith.constant dense<0.000000e+00> : vector<128x48xf32>
    %40 = tpu.matmul %37, %39, %cst_29 {dimension_numbers = #tpu.dot_dimension_numbers<[1], [0], [0], [1], [0, 0, 1, 1], [], []>} : vector<128x48xbf16>, vector<48x48xbf16>, vector<128x48xf32> -> vector<128x48xf32>
    %41 = arith.addf %33, %40 : vector<128x48xf32>
    %c0_30 = arith.constant 0 : index
    %c0_31 = arith.constant 0 : index
    %42 = vector.load %arg8[%c0_30, %c0_31] : memref<1x48xf32, #tpu.memory_space<vmem>>, vector<1x48xf32>
    %43 = vector.broadcast %42 : vector<1x48xf32> to vector<128x48xf32>
    %44 = arith.addf %41, %43 : vector<128x48xf32>
    %45 = arith.addf %44, %21 : vector<128x48xf32>
    %cst_32 = arith.constant 0.000000e+00 : f32
    %46 = vector.broadcast %cst_32 : f32 to vector<128x48xf32>
    %47 = arith.maximumf %45, %46 : vector<128x48xf32>
    %48 = arith.truncf %47 : vector<128x48xf32> to vector<128x48xbf16>
    %c0_33 = arith.constant 0 : index
    %c0_34 = arith.constant 0 : index
    %49 = vector.load %arg9[%c0_33, %c0_34] : memref<48x128xbf16, #tpu.memory_space<vmem>>, vector<48x128xbf16>
    %cst_35 = arith.constant dense<0.000000e+00> : vector<128x128xf32>
    %50 = tpu.matmul %48, %49, %cst_35 {dimension_numbers = #tpu.dot_dimension_numbers<[1], [0], [0], [1], [0, 0, 1, 1], [], []>} : vector<128x48xbf16>, vector<48x128xbf16>, vector<128x128xf32> -> vector<128x128xf32>
    %c0_36 = arith.constant 0 : index
    %c0_37 = arith.constant 0 : index
    %51 = vector.load %arg10[%c0_36, %c0_37] : memref<1x128xf32, #tpu.memory_space<vmem>>, vector<1x128xf32>
    %52 = vector.broadcast %51 : vector<1x128xf32> to vector<128x128xf32>
    %53 = arith.addf %50, %52 : vector<128x128xf32>
    %54 = vector.extract_strided_slice %53 {offsets = [0, 0], sizes = [128, 64], strides = [1, 1]} : vector<128x128xf32> to vector<128x64xf32>
    %55 = vector.extract_strided_slice %53 {offsets = [0, 64], sizes = [128, 64], strides = [1, 1]} : vector<128x128xf32> to vector<128x64xf32>
    %cst_38 = arith.constant 0.000000e+00 : f32
    %56 = vector.broadcast %cst_38 : f32 to vector<128x64xf32>
    %57 = arith.subf %56, %55 : vector<128x64xf32>
    %58 = math.exp %57 : vector<128x64xf32>
    %cst_39 = arith.constant 1.000000e+00 : f32
    %59 = vector.broadcast %cst_39 : f32 to vector<128x64xf32>
    %60 = arith.addf %59, %58 : vector<128x64xf32>
    %61 = tpu.reciprocal %60 {approx = true} : vector<128x64xf32> -> vector<128x64xf32>
    %62 = arith.mulf %54, %61 : vector<128x64xf32>
    %63 = arith.mulf %62, %62 : vector<128x64xf32>
    %64 = tpu.concatenate %62, %63 in 1 : vector<128x64xf32>, vector<128x64xf32> -> vector<128x128xf32>
    %c0_40 = arith.constant 0 : index
    %c0_41 = arith.constant 0 : index
    %65 = vector.load %arg13[%c0_40, %c0_41] : memref<128x128xf32, #tpu.memory_space<vmem>>, vector<128x128xf32>
    %cst_42 = arith.constant dense<0.000000e+00> : vector<128x128xf32>
    %66 = tpu.matmul %65, %64, %cst_42 {dimension_numbers = #tpu.dot_dimension_numbers<[1], [0], [0], [1], [0, 0, 1, 1], [], []>, precision = #tpu.contract_precision<fp32>} : vector<128x128xf32>, vector<128x128xf32>, vector<128x128xf32> -> vector<128x128xf32>
    %c0_43 = arith.constant 0 : index
    %c0_44 = arith.constant 0 : index
    %67 = vector.load %arg14[%c0_43, %c0_44] : memref<128x128xf32, #tpu.memory_space<vmem>>, vector<128x128xf32>
    %cst_45 = arith.constant dense<0.000000e+00> : vector<128x128xf32>
    %68 = tpu.matmul %66, %67, %cst_45 {dimension_numbers = #tpu.dot_dimension_numbers<[1], [0], [0], [1], [0, 0, 1, 1], [], []>, precision = #tpu.contract_precision<fp32>} : vector<128x128xf32>, vector<128x128xf32>, vector<128x128xf32> -> vector<128x128xf32>
    %cst_46 = arith.constant 3.906250e-03 : f32
    %69 = vector.broadcast %cst_46 : f32 to vector<128x128xf32>
    %70 = arith.mulf %68, %69 : vector<128x128xf32>
    %71 = vector.extract_strided_slice %70 {offsets = [0, 0], sizes = [128, 64], strides = [1, 1]} : vector<128x128xf32> to vector<128x64xf32>
    %72 = vector.extract_strided_slice %70 {offsets = [0, 64], sizes = [128, 64], strides = [1, 1]} : vector<128x128xf32> to vector<128x64xf32>
    %73 = arith.mulf %71, %71 : vector<128x64xf32>
    %74 = arith.subf %72, %73 : vector<128x64xf32>
    %cst_47 = arith.constant 0.000000e+00 : f32
    %75 = vector.broadcast %cst_47 : f32 to vector<128x64xf32>
    %76 = arith.maximumf %74, %75 : vector<128x64xf32>
    %77 = arith.subf %62, %71 : vector<128x64xf32>
    %cst_48 = arith.constant 9.99999974E-6 : f32
    %78 = vector.broadcast %cst_48 : f32 to vector<128x64xf32>
    %79 = arith.addf %76, %78 : vector<128x64xf32>
    %80 = math.rsqrt %79 : vector<128x64xf32>
    %81 = arith.mulf %77, %80 : vector<128x64xf32>
    %c0_49 = arith.constant 0 : index
    %c0_50 = arith.constant 0 : index
    %82 = vector.load %arg11[%c0_49, %c0_50] : memref<128x64xf32, #tpu.memory_space<vmem>>, vector<128x64xf32>
    %83 = arith.mulf %81, %82 : vector<128x64xf32>
    %c0_51 = arith.constant 0 : index
    %c0_52 = arith.constant 0 : index
    %84 = vector.load %arg12[%c0_51, %c0_52] : memref<128x64xf32, #tpu.memory_space<vmem>>, vector<128x64xf32>
    %85 = arith.addf %83, %84 : vector<128x64xf32>
    %86 = arith.truncf %85 : vector<128x64xf32> to vector<128x64xbf16>
    %c0_53 = arith.constant 0 : index
    %c0_54 = arith.constant 0 : index
    %87 = vector.load %arg15[%c0_53, %c0_54] : memref<64x128xbf16, #tpu.memory_space<vmem>>, vector<64x128xbf16>
    %cst_55 = arith.constant dense<0.000000e+00> : vector<128x128xf32>
    %88 = tpu.matmul %86, %87, %cst_55 {dimension_numbers = #tpu.dot_dimension_numbers<[1], [0], [0], [1], [0, 0, 1, 1], [], []>} : vector<128x64xbf16>, vector<64x128xbf16>, vector<128x128xf32> -> vector<128x128xf32>
    %c0_56 = arith.constant 0 : index
    %c0_57 = arith.constant 0 : index
    %89 = vector.load %arg16[%c0_56, %c0_57] : memref<1x128xf32, #tpu.memory_space<vmem>>, vector<1x128xf32>
    %90 = vector.broadcast %89 : vector<1x128xf32> to vector<128x128xf32>
    %91 = arith.addf %88, %90 : vector<128x128xf32>
    %c0_58 = arith.constant 0 : index
    %c0_59 = arith.constant 0 : index
    %92 = vector.load %arg17[%c0_58, %c0_59] : memref<128x128xf32, #tpu.memory_space<vmem>>, vector<128x128xf32>
    tpu.vector_store %arg17[%c0_58, %c0_59], %91 {strides = array<i32>} : memref<128x128xf32, #tpu.memory_space<vmem>>, vector<128x128xf32>,
    return
  }
  func.func @transform_0(%arg0: i32) -> (i32, i32) {
    %c0_i32 = arith.constant 0 : i32
    %c0_i32_0 = arith.constant 0 : i32
    return %arg0, %c0_i32 : i32, i32
  }
  func.func @transform_1(%arg0: i32) -> (i32, i32) {
    %c0_i32 = arith.constant 0 : i32
    %c0_i32_0 = arith.constant 0 : i32
    %c0_i32_1 = arith.constant 0 : i32
    return %c0_i32, %c0_i32_0 : i32, i32
  }
  func.func @transform_2(%arg0: i32) -> (i32, i32) {
    %c0_i32 = arith.constant 0 : i32
    %c0_i32_0 = arith.constant 0 : i32
    %c0_i32_1 = arith.constant 0 : i32
    return %c0_i32, %c0_i32_0 : i32, i32
  }
  func.func @transform_3(%arg0: i32) -> (i32, i32) {
    %c0_i32 = arith.constant 0 : i32
    %c0_i32_0 = arith.constant 0 : i32
    %c0_i32_1 = arith.constant 0 : i32
    return %c0_i32, %c0_i32_0 : i32, i32
  }
  func.func @transform_4(%arg0: i32) -> (i32, i32) {
    %c0_i32 = arith.constant 0 : i32
    %c0_i32_0 = arith.constant 0 : i32
    %c0_i32_1 = arith.constant 0 : i32
    return %c0_i32, %c0_i32_0 : i32, i32
  }
  func.func @transform_5(%arg0: i32) -> (i32, i32, i32) {
    %c0_i32 = arith.constant 0 : i32
    %c0_i32_0 = arith.constant 0 : i32
    %c0_i32_1 = arith.constant 0 : i32
    %c0_i32_2 = arith.constant 0 : i32
    return %c0_i32, %c0_i32_0, %c0_i32_1 : i32, i32, i32
  }
  func.func @transform_6(%arg0: i32) -> (i32, i32, i32) {
    %c0_i32 = arith.constant 0 : i32
    %c0_i32_0 = arith.constant 0 : i32
    %c0_i32_1 = arith.constant 0 : i32
    %c0_i32_2 = arith.constant 0 : i32
    return %c0_i32, %c0_i32_0, %c0_i32_1 : i32, i32, i32
  }
  func.func @transform_7(%arg0: i32) -> (i32, i32) {
    %c0_i32 = arith.constant 0 : i32
    %c0_i32_0 = arith.constant 0 : i32
    %c0_i32_1 = arith.constant 0 : i32
    return %c0_i32, %c0_i32_0 : i32, i32
  }
  func.func @transform_8(%arg0: i32) -> (i32, i32) {
    %c0_i32 = arith.constant 0 : i32
    %c0_i32_0 = arith.constant 0 : i32
    %c0_i32_1 = arith.constant 0 : i32
    return %c0_i32, %c0_i32_0 : i32, i32
  }
  func.func @transform_9(%arg0: i32) -> (i32, i32) {
    %c0_i32 = arith.constant 0 : i32
    %c0_i32_0 = arith.constant 0 : i32
    %c0_i32_1 = arith.constant 0 : i32
    return %c0_i32, %c0_i32_0 : i32, i32
  }
  func.func @transform_10(%arg0: i32) -> (i32, i32) {
    %c0_i32 = arith.constant 0 : i32
    %c0_i32_0 = arith.constant 0 : i32
    %c0_i32_1 = arith.constant 0 : i32
    return %c0_i32, %c0_i32_0 : i32, i32
  }
  func.func @transform_11(%arg0: i32) -> (i32, i32) {
    %c0_i32 = arith.constant 0 : i32
    %c0_i32_0 = arith.constant 0 : i32
    %c0_i32_1 = arith.constant 0 : i32
    return %c0_i32, %c0_i32_0 : i32, i32
  }
  func.func @transform_12(%arg0: i32) -> (i32, i32) {
    %c0_i32 = arith.constant 0 : i32
    %c0_i32_0 = arith.constant 0 : i32
    %c0_i32_1 = arith.constant 0 : i32
    return %c0_i32, %c0_i32_0 : i32, i32
  }
  func.func @transform_13(%arg0: i32) -> (i32, i32) {
    %c0_i32 = arith.constant 0 : i32
    %c0_i32_0 = arith.constant 0 : i32
    %c0_i32_1 = arith.constant 0 : i32
    return %c0_i32, %c0_i32_0 : i32, i32
  }
  func.func @transform_14(%arg0: i32) -> (i32, i32) {
    %c0_i32 = arith.constant 0 : i32
    %c0_i32_0 = arith.constant 0 : i32
    %c0_i32_1 = arith.constant 0 : i32
    return %c0_i32, %c0_i32_0 : i32, i32
  }
  func.func @transform_15(%arg0: i32) -> (i32, i32) {
    %c0_i32 = arith.constant 0 : i32
    %c0_i32_0 = arith.constant 0 : i32
    %c0_i32_1 = arith.constant 0 : i32
    return %c0_i32, %c0_i32_0 : i32, i32
  }
  func.func @transform_16(%arg0: i32) -> (i32, i32) {
    %c0_i32 = arith.constant 0 : i32
    %c0_i32_0 = arith.constant 0 : i32
    return %arg0, %c0_i32 : i32, i32
  }
}

</mosaic_0001>

<bundles_post_ra>
// kernel: tile.38
= control target key start
LH: loop header
LB: loop body
LE: loop exit
PB: predicated region body
PF: predicated region fallthrough
CT: control target
= control target key end

     0   :  { %s22_s0 = inlined_call_operand.vmem [shape: f32[16], index: 0, kind: input, shape index: {}]   ;;  %s23_s1 = inlined_call_operand.vmem [shape: f32[4,16], index: 1, kind: output, shape index: {}]  }
   0x1   :  { %v4_v0 = vld [vmem:[%s22_s0] ss:$0 sm:$0xff] }
   0x2   :  { %5 = vst [vmem:[%s23_s1] sm:$0xf] %v4_v0 }

// kernel: tile.39
= control target key start
LH: loop header
LB: loop body
LE: loop exit
PB: predicated region body
PF: predicated region fallthrough
CT: control target
= control target key end

     0   :  { %vm7_vm0 = vcmask 130048   ;;  %s37_s8 = smov 16   ;;  %s38_s9 = smov 32   ;;  %vm13_vm1 = vcmask 523648   ;;  %vm19_vm2 = vcmask 392448   ;;  %vm25_vm3 = vcmask 261248   ;;  %s55_s0 = inlined_call_operand.vmem [shape: f32[4,16], index: 0, kind: input, shape index: {}]   ;;  %s56_s1 = inlined_call_operand.vmem [shape: f32[64], index: 1, kind: output, shape index: {}]  }
   0x1   :  { %v4_v0 = vld [vmem:[%s55_s0] sm:$0xf]  ;;  %s36_s0 = smov 48  }
   0x2   :  { %5 = vst [vmem:[#allocation1] sm:$0xf] %v4_v0 }
   0x9   :  { %v10_v1 = vld [vmem:[#allocation1 + $0x3] sm:$0x1]   ;;  %v22_v2 = vld [vmem:[#allocation1 + $0x1] sm:$0x1]   ;;  %v6_v3 = vld [vmem:[#allocation1] sm:$0x1]  }
   0xa   :  { %11 = vrot.lane.b32.xlu0 %v10_v1, %s36_s0  ;;  %23 = vrot.lane.b32.xlu1 %v22_v2, %s37_s8  ;;  %v16_v4 = vld [vmem:[#allocation1 + $0x2] sm:$0x1]   ;;  %8 = vst.msk [vmem:[#allocation0] sm:$0x1] %vm7_vm0, %v6_v3  }
   0xe   :  { %17 = vrot.lane.b32.xlu0 %v16_v4, %s38_s9 }
  0x7c   :  { %v12_v5 = vpop.permute.xlu0 %11   ;;  %v24_v6 = vpop.permute.xlu1 %23  }
  0x7d   :  { %14 = vst.msk [vmem:[#allocation0] sm:$0x1] %vm13_vm1, %v12_v5  }
  0x80   :  { %v18_v7 = vpop.permute.xlu0 %17  }
  0x81   :  { %20 = vst.msk [vmem:[#allocation0] sm:$0x1] %vm19_vm2, %v18_v7  }
  0x82   :  { %26 = vst.msk [vmem:[#allocation0] sm:$0x1] %vm25_vm3, %v24_v6  }
  0x89   :  { %v30_v8 = vld [vmem:[#allocation0] sm:$0x1] }
  0x8a   :  { %32 = vst [vmem:[%s56_s1] sm:$0x1] %v30_v8 }

// kernel: tile.30
= control target key start
LH: loop header
LB: loop body
LE: loop exit
PB: predicated region body
PF: predicated region fallthrough
CT: control target
= control target key end

     0   :  { %s22_s0 = inlined_call_operand.vmem [shape: f32[16], index: 0, kind: input, shape index: {}]   ;;  %s23_s1 = inlined_call_operand.vmem [shape: f32[6,16], index: 1, kind: output, shape index: {}]  }
   0x1   :  { %v4_v0 = vld [vmem:[%s22_s0] ss:$0 sm:$0xff] }
   0x2   :  { %5 = vst [vmem:[%s23_s1] sm:$0xff] %v4_v0 }

// kernel: tile.31
= control target key start
LH: loop header
LB: loop body
LE: loop exit
PB: predicated region body
PF: predicated region fallthrough
CT: control target
= control target key end

     0   :  { %s51_s10 = smov 80   ;;  %s52_s11 = smov 48   ;;  %vm3_vm0 = vcmask 130048   ;;  %vm9_vm1 = vcmask 786048   ;;  %vm15_vm2 = vcmask 654848   ;;  %vm21_vm3 = vcmask 523648   ;;  %s87_s0 = inlined_call_operand.vmem [shape: f32[6,16], index: 0, kind: input, shape index: {}]   ;;  %s88_s1 = inlined_call_operand.vmem [shape: f32[96], index: 1, kind: output, shape index: {}]  }
   0x1   :  { %v41_v0 = vld [vmem:[%s87_s0 + $0x5] sm:$0x1]   ;;  %v43_v1 = vld [vmem:[%s87_s0 + $0x3] sm:$0x1]   ;;  %v42_v2 = vld [vmem:[%s87_s0 + $0x4] sm:$0x1]  }
   0x2   :  { %7 = vrot.lane.b32.xlu0 %v41_v0, %s51_s10  ;;  %19 = vrot.lane.b32.xlu1 %v43_v1, %s52_s11  ;;  %v44_v3 = vld [vmem:[%s87_s0 + $0x2] sm:$0x1]   ;;  %v2_v4 = vld [vmem:[%s87_s0] sm:$0x1]   ;;  %s53_s18 = smov 64   ;;  %s54_s19 = smov 32  }
   0x3   :  { %4 = vst.msk [vmem:[#allocation0] sm:$0x1] %vm3_vm0, %v2_v4   ;;  %v45_v5 = vld [vmem:[%s87_s0 + $0x1] sm:$0x1]   ;;  %s55_s0 = smov 16   ;;  %vm27_vm4 = vcmask 392448  }
   0x4   :  { %vm33_vm5 = vcmask 261248  }
   0x6   :  { %13 = vrot.lane.b32.xlu0 %v42_v2, %s53_s18  ;;  %25 = vrot.lane.b32.xlu1 %v44_v3, %s54_s19 }
   0xa   :  { %31 = vrot.lane.b32.xlu0 %v45_v5, %s55_s0 }
  0x74   :  { %v8_v6 = vpop.permute.xlu0 %7   ;;  %v20_v7 = vpop.permute.xlu1 %19  }
  0x75   :  { %10 = vst.msk [vmem:[#allocation0] sm:$0x1] %vm9_vm1, %v8_v6  }
  0x78   :  { %v14_v8 = vpop.permute.xlu0 %13   ;;  %v26_v9 = vpop.permute.xlu1 %25  }
  0x79   :  { %16 = vst.msk [vmem:[#allocation0] sm:$0x1] %vm15_vm2, %v14_v8  }
  0x7a   :  { %22 = vst.msk [vmem:[#allocation0] sm:$0x1] %vm21_vm3, %v20_v7  }
  0x7b   :  { %28 = vst.msk [vmem:[#allocation0] sm:$0x1] %vm27_vm4, %v26_v9  }
  0x7c   :  { %v32_v10 = vpop.permute.xlu0 %31  }
  0x7d   :  { %34 = vst.msk [vmem:[#allocation0] sm:$0x1] %vm33_vm5, %v32_v10  }
  0x84   :  { %v38_v11 = vld [vmem:[#allocation0] sm:$0x1] }
  0x85   :  { %40 = vst [vmem:[%s88_s1] sm:$0x1] %v38_v11 }

// kernel: tile.46
= control target key start
LH: loop header
LB: loop body
LE: loop exit
PB: predicated region body
PF: predicated region fallthrough
CT: control target
= control target key end

     0   :  { %s22_s0 = inlined_call_operand.vmem [shape: f32[8], index: 0, kind: input, shape index: {}]   ;;  %s23_s1 = inlined_call_operand.vmem [shape: f32[6,8], index: 1, kind: output, shape index: {}]  }
   0x1   :  { %v4_v0 = vld [vmem:[%s22_s0] ss:$0 sm:$0xff] }
   0x2   :  { %5 = vst [vmem:[%s23_s1] sm:$0xff] %v4_v0 }

// kernel: tile.47
= control target key start
LH: loop header
LB: loop body
LE: loop exit
PB: predicated region body
PF: predicated region fallthrough
CT: control target
= control target key end

     0   :  { %s51_s10 = smov 40   ;;  %s52_s11 = smov 24   ;;  %vm3_vm0 = vcmask 64512   ;;  %vm9_vm1 = vcmask 392512   ;;  %vm15_vm2 = vcmask 326912   ;;  %vm21_vm3 = vcmask 261312   ;;  %s87_s0 = inlined_call_operand.vmem [shape: f32[6,8], index: 0, kind: input, shape index: {}]   ;;  %s88_s1 = inlined_call_operand.vmem [shape: f32[1,48], index: 1, kind: output, shape index: {}]  }
   0x1   :  { %v41_v0 = vld [vmem:[%s87_s0 + $0x5] sm:$0x1]   ;;  %v43_v1 = vld [vmem:[%s87_s0 + $0x3] sm:$0x1]   ;;  %v42_v2 = vld [vmem:[%s87_s0 + $0x4] sm:$0x1]  }
   0x2   :  { %7 = vrot.lane.b32.xlu0 %v41_v0, %s51_s10  ;;  %19 = vrot.lane.b32.xlu1 %v43_v1, %s52_s11  ;;  %v44_v3 = vld [vmem:[%s87_s0 + $0x2] sm:$0x1]   ;;  %v2_v4 = vld [vmem:[%s87_s0] sm:$0x1]   ;;  %s53_s18 = smov 32   ;;  %s54_s19 = smov 16  }
   0x3   :  { %4 = vst.msk [vmem:[#allocation0] sm:$0x1] %vm3_vm0, %v2_v4   ;;  %v45_v5 = vld [vmem:[%s87_s0 + $0x1] sm:$0x1]   ;;  %s55_s0 = smov 8   ;;  %vm27_vm4 = vcmask 195712  }
   0x4   :  { %vm33_vm5 = vcmask 130112  }
   0x6   :  { %13 = vrot.lane.b32.xlu0 %v42_v2, %s53_s18  ;;  %25 = vrot.lane.b32.xlu1 %v44_v3, %s54_s19 }
   0xa   :  { %31 = vrot.lane.b32.xlu0 %v45_v5, %s55_s0 }
  0x74   :  { %v8_v6 = vpop.permute.xlu0 %7   ;;  %v20_v7 = vpop.permute.xlu1 %19  }
  0x75   :  { %10 = vst.msk [vmem:[#allocation0] sm:$0x1] %vm9_vm1, %v8_v6  }
  0x78   :  { %v14_v8 = vpop.permute.xlu0 %13   ;;  %v26_v9 = vpop.permute.xlu1 %25  }
  0x79   :  { %16 = vst.msk [vmem:[#allocation0] sm:$0x1] %vm15_vm2, %v14_v8  }
  0x7a   :  { %22 = vst.msk [vmem:[#allocation0] sm:$0x1] %vm21_vm3, %v20_v7  }
  0x7b   :  { %28 = vst.msk [vmem:[#allocation0] sm:$0x1] %vm27_vm4, %v26_v9  }
  0x7c   :  { %v32_v10 = vpop.permute.xlu0 %31  }
  0x7d   :  { %34 = vst.msk [vmem:[#allocation0] sm:$0x1] %vm33_vm5, %v32_v10  }
  0x84   :  { %v38_v11 = vld [vmem:[#allocation0] sm:$0x1] }
  0x85   :  { %40 = vst [vmem:[%s88_s1] sm:$0x1] %v38_v11 }

// kernel: tile.26
= control target key start
LH: loop header
LB: loop body
LE: loop exit
PB: predicated region body
PF: predicated region fallthrough
CT: control target
= control target key end

     0   :  { %s110_s0 = inlined_call_operand.<no memory space> [shape: f32[], index: 0, kind: input, shape index: {}]   ;;  %s111_s1 = inlined_call_operand.vmem [shape: f32[128,64], index: 1, kind: output, shape index: {}]  }
   0x1   :  { %v2_v0 = vstv %s110_s0 }
   0x2   :  { %3 = vst [vmem:[%s111_s1] sm:$0xff] %v2_v0  ;;  %34 = vst [vmem:[%s111_s1 + $0x8] sm:$0xff] %v2_v0 }
   0x3   :  { %35 = vst [vmem:[%s111_s1 + $0x10] sm:$0xff] %v2_v0  ;;  %36 = vst [vmem:[%s111_s1 + $0x18] sm:$0xff] %v2_v0 }
   0x4   :  { %37 = vst [vmem:[%s111_s1 + $0x20] sm:$0xff] %v2_v0  ;;  %38 = vst [vmem:[%s111_s1 + $0x28] sm:$0xff] %v2_v0 }
   0x5   :  { %39 = vst [vmem:[%s111_s1 + $0x30] sm:$0xff] %v2_v0  ;;  %40 = vst [vmem:[%s111_s1 + $0x38] sm:$0xff] %v2_v0 }
   0x6   :  { %41 = vst [vmem:[%s111_s1 + $0x40] sm:$0xff] %v2_v0  ;;  %42 = vst [vmem:[%s111_s1 + $0x48] sm:$0xff] %v2_v0 }
   0x7   :  { %43 = vst [vmem:[%s111_s1 + $0x50] sm:$0xff] %v2_v0  ;;  %44 = vst [vmem:[%s111_s1 + $0x58] sm:$0xff] %v2_v0 }
   0x8   :  { %45 = vst [vmem:[%s111_s1 + $0x60] sm:$0xff] %v2_v0  ;;  %46 = vst [vmem:[%s111_s1 + $0x68] sm:$0xff] %v2_v0 }
   0x9   :  { %47 = vst [vmem:[%s111_s1 + $0x70] sm:$0xff] %v2_v0  ;;  %48 = vst [vmem:[%s111_s1 + $0x78] sm:$0xff] %v2_v0 }

// kernel: _lambda_.1
= control target key start
LH: loop header
LB: loop body
LE: loop exit
PB: predicated region body
PF: predicated region fallthrough
CT: control target
= control target key end

     0   :  { %s8112_s21 = smov 0   ;;  %s10252_s0 = inlined_call_operand.vmem [shape: f32[256,32], index: 0, kind: input, shape index: {}]   ;;  %s10253_s1 = inlined_call_operand.vmem [shape: bf16[32,192], index: 1, kind: input, shape index: {}]   ;;  %s10254_s2 = inlined_call_operand.vmem [shape: f32[1,192], index: 2, kind: input, shape index: {}]   ;;  %s10255_s3 = inlined_call_operand.vmem [shape: bf16[96,48], index: 3, kind: input, shape index: {}]   ;;  %s10256_s4 = inlined_call_operand.vmem [shape: f32[1,48], index: 4, kind: input, shape index: {}]   ;;  %s10257_s5 = inlined_call_operand.vmem [shape: bf16[2,128,128], index: 5, kind: input, shape index: {}]   ;;  %s10258_s6 = inlined_call_operand.vmem [shape: bf16[3,48,48], index: 6, kind: input, shape index: {}]   ;;  %s10259_s7 = inlined_call_operand.vmem [shape: f32[1,48], index: 7, kind: input, shape index: {}]   ;;  %s10260_s8 = inlined_call_operand.vmem [shape: bf16[48,128], index: 8, kind: input, shape index: {}]   ;;  %s10261_s9 = inlined_call_operand.vmem [shape: f32[1,128], index: 9, kind: input, shape index: {}]   ;;  %s10262_s10 = inlined_call_operand.vmem [shape: f32[128,64], index: 10, kind: input, shape index: {}]   ;;  %s10263_s11 = inlined_call_operand.vmem [shape: f32[128,64], index: 11, kind: input, shape index: {}]   ;;  %s10264_s12 = inlined_call_operand.vmem [shape: f32[128,128], index: 12, kind: input, shape index: {}, may-alias: {12,13}]   ;;  %s10265_s13 = inlined_call_operand.vmem [shape: f32[128,128], index: 13, kind: input, shape index: {}, may-alias: {12,13}]   ;;  %s10266_s14 = inlined_call_operand.vmem [shape: bf16[64,128], index: 14, kind: input, shape index: {}]   ;;  %s10267_s15 = inlined_call_operand.vmem [shape: f32[1,128], index: 15, kind: input, shape index: {}]   ;;  %s10268_s16 = inlined_call_operand.vmem [shape: f32[256,128], index: 16, kind: output, shape index: {}]  }
   0x1   :  { %10378 = sst [smem:[#allocation38_spill]] %s10252_s0 }
   0x2 LB: > { %s5650_s22 = sadd.s32 4294967295, %s8022_s21   ;;  %p5654_p0 = scmp.ge.s32.totalorder %s8022_s21, 1  ;;  %s8022_s21 = sphi %s8112_s21, %s26_s21  }
   0x3   : > { %p463_p1 = scmp.lt.s32.totalorder %s8022_s21, 3 }
   0x5   : > { %p464_p2 = pnand %p5654_p0, %p463_p1 }
   0x7   : > { %467 = sbr.rel (%p464_p2) target bundleno = 2963 (0xb93), region = 84 }
   0xe   : > { %v7748_v0 = vld [vmem:[%s10253_s1 + $0x4] ss:$8 sps:$4 sm:$0xff]   ;;  %s5655_s25 = sshll.u32 %s5650_s22, 4  ;;  %v7750_v1 = vld [vmem:[%s10253_s1] ss:$8 sps:$4 sm:$0xff]   ;;  %v8024_v2 = vmov 0   ;;  %v556_v31 = vlaneseq }
   0xf   : > { %643 = vmatprep.mubr.bf16.mxu0 %v8024_v2  ;;  %p514_p3 = scmp.lt.s32.totalorder %s5655_s25, 31  ;;  %611 = vmatprep.subr.bf16.mxu0 %v7748_v0  ;;  %v7751_v3 = vld [vmem:[%s10253_s1 + $0x14] ss:$8 sps:$4 sm:$0xff]   ;;  %v7753_v4 = vld [vmem:[%s10253_s1 + $0x10] ss:$8 sps:$4 sm:$0xff]   ;;  %s10379_s20 = sld [smem:[#allocation38_spill]] }
  0x10   : > { %612 = vmatpush1.bf16.msra.mxu0 %v7750_v1  ;;  %vm586_vm0 = vcmask 261120   ;;  %v7754_v29 = vld [vmem:[%s10255_s3] sm:$0xff]   ;;  %v7755_v30 = vld [vmem:[%s10255_s3 + $0x8] sm:$0xff]   ;;  %v557_v32 = vshrl.u32 %v556_v31, 7  ;;  %s8025_s23 = smov 32   ;;  %vm1091_vm1 = vcmask 785408  }
  0x11   : > { %s10561_s25 = smov (!%p514_p3, %s5655_s25), 31  ;;  %613 = vmatprep.subr.bf16.mxu0 %v7751_v3  ;;  %6277 = vmatprep.subr.bf16.mxu1 %v7754_v29  ;;  %v554_v34 = vld [vmem:[%s10254_s2] sm:$0x3]  ;;  %vm1421_vm2 = vcmask 392192   ;;  %s8026_s29 = smov 64   ;;  %vm2469_vm3 = vcmask 523264  }
  0x12   : > { %s5656_s17 = sshll.u32 %s10561_s25, 3  ;;  %6278 = vmatpush3.bf16.msra.mxu1 %v7754_v29  ;;  %v558_v33 = vsub.s32 0, %v557_v32  ;;  %v562_v35 = vsub.s32 1, %v557_v32 }
  0x13   : > { %6279 = vmatprep.subr.bf16.mxu1 %v7755_v30  ;;  %s10231_s18 = scalar_lea.vmem %s10268_s16, %s5656_s17 }
  0x14   : > { %614 = vmatpush1.bf16.msra.mxu0 %v7753_v4  ;;  %v8175_v36 = vrot.slane %v554_v34, %v558_v33  ;;  %v8177_v37 = vrot.slane %v554_v34, %v562_v35  ;;  %v7757_v35 = vld [vmem:[%s10255_s3 + $0x18] sm:$0xff]  }
  0x15   : > { %s8140_s22 = scalar_lea.vmem %s10379_s20, %s5656_s17 }
  0x16   : > { %v526_v5 = vld [vmem:[%s8140_s22] sm:$0xff]  ;;  %v527_v6 = vld [vmem:[%s8140_s22 + $0x8] sm:$0xff]  ;;  %v528_v8 = vld [vmem:[%s8140_s22 + $0x10] sm:$0xff]  ;;  %6280 = vmatpush3.bf16.msra.mxu1 %v7755_v30 }
  0x17   : > { %v542_v7 = vpack.c.bf16 %v527_v6, %v526_v5  ;;  %v529_v9 = vld [vmem:[%s8140_s22 + $0x18] sm:$0xff]  ;;  %v530_v11 = vld [vmem:[%s8140_s22 + $0x20] sm:$0xff]  ;;  %v531_v12 = vld [vmem:[%s8140_s22 + $0x28] sm:$0xff] }
  0x18   : > { %v543_v10 = vpack.c.bf16 %v529_v9, %v528_v8  ;;  %v544_v13 = vpack.c.bf16 %v531_v12, %v530_v11  ;;  %v532_v14 = vld [vmem:[%s8140_s22 + $0x30] sm:$0xff]  ;;  %v533_v15 = vld [vmem:[%s8140_s22 + $0x38] sm:$0xff]  ;;  %v534_v17 = vld [vmem:[%s8140_s22 + $0x40] sm:$0xff] }
  0x19   : > { %5663 = vmatmul.mubr.msk.bf16.vlgmr.msra.gmra.mrb[0].mxu0 %vm586_vm0, %v542_v7  ;;  %v545_v16 = vpack.c.bf16 %v533_v15, %v532_v14  ;;  %v535_v18 = vld [vmem:[%s8140_s22 + $0x48] sm:$0xff]  ;;  %v536_v20 = vld [vmem:[%s8140_s22 + $0x50] sm:$0xff]  ;;  %v537_v21 = vld [vmem:[%s8140_s22 + $0x58] sm:$0xff] }
  0x1a   : > { %653 = vmatprep.mubr.bf16.mxu0 %v8024_v2  ;;  %v546_v19 = vpack.c.bf16 %v535_v18, %v534_v17  ;;  %v547_v22 = vpack.c.bf16 %v537_v21, %v536_v20  ;;  %v538_v23 = vld [vmem:[%s8140_s22 + $0x60] sm:$0xff]  ;;  %v539_v24 = vld [vmem:[%s8140_s22 + $0x68] sm:$0xff]  ;;  %v540_v26 = vld [vmem:[%s8140_s22 + $0x70] sm:$0xff] }
  0x1b   : > { %v548_v25 = vpack.c.bf16 %v539_v24, %v538_v23  ;;  %v541_v27 = vld [vmem:[%s8140_s22 + $0x78] sm:$0xff] }
  0x1c   : > { %v549_v28 = vpack.c.bf16 %v541_v27, %v540_v26 }
  0x21   : > { %5664 = vmatmul.mubr.msk.bf16.gmra.mrb[4].mxu0 %vm586_vm0, %v543_v10 }
  0x22   : > { %663 = vmatprep.mubr.bf16.mxu0 %v8024_v2 }
  0x29   : > { %5665 = vmatmul.mubr.msk.bf16.gmra.mrb[8].mxu0 %vm586_vm0, %v544_v13 }
  0x2a   : > { %673 = vmatprep.mubr.bf16.mxu0 %v8024_v2 }
  0x31   : > { %5666 = vmatmul.mubr.msk.bf16.gmra.mrb[12].mxu0 %vm586_vm0, %v545_v16 }
  0x32   : > { %683 = vmatprep.mubr.bf16.mxu0 %v8024_v2 }
  0x39   : > { %5667 = vmatmul.mubr.msk.bf16.gmra.mrb[16].mxu0 %vm586_vm0, %v546_v19  ;;  %v7756_v19 = vld [vmem:[%s10255_s3 + $0x10] sm:$0xff]  }
  0x3a   : > { %693 = vmatprep.mubr.bf16.mxu0 %v8024_v2  ;;  %6281 = vmatprep.subr.bf16.mxu1 %v7756_v19 }
  0x3b   : > { %6282 = vmatpush3.bf16.msra.mxu1 %v7756_v19 }
  0x3c   : > { %6283 = vmatprep.subr.bf16.mxu1 %v7757_v35 }
  0x3f   : > { %6284 = vmatpush3.bf16.msra.mxu1 %v7757_v35 }
  0x41   : > { %5668 = vmatmul.mubr.msk.bf16.gmra.mrb[20].mxu0 %vm586_vm0, %v547_v22 }
  0x42   : > { %703 = vmatprep.mubr.bf16.mxu0 %v8024_v2 }
  0x49   : > { %5669 = vmatmul.mubr.msk.bf16.gmra.mrb[24].mxu0 %vm586_vm0, %v548_v25 }
  0x4a   : > { %713 = vmatprep.mubr.bf16.mxu0 %v8024_v2 }
  0x51   : > { %5670 = vmatmul.mubr.msk.bf16.gmra.mrb[28].mxu0 %vm586_vm0, %v549_v28 }
  0xec   : > { %v645_v38 = vpop.f32.mrb[0].mxu0 }
  0xed   : > { %v8180_v39 = vadd.f32 %v645_v38, %v8175_v36  ;;  %v647_v40 = vpop.f32.mrb[1].mxu0 }
  0xee   : > { %v648_v41 = vadd.f32 %v647_v40, %v8177_v37  ;;  %v649_v42 = vpop.f32.mrb[2].mxu0 }
  0xef   : > { %v724_v43 = vsub.f32 0.0, %v8180_v39  ;;  %v8185_v44 = vadd.f32 %v649_v42, %v8175_v36  ;;  %v651_v45 = vpop.f32.mrb[3].mxu0 }
  0xf0   : > { %v725_v46 = vsub.f32 0.0, %v648_v41  ;;  %v652_v47 = vadd.f32 %v651_v45, %v8177_v37 }
  0xf1   : > { %v756_v48 = vmul.f32 1.442695, %v724_v43  ;;  %v726_v49 = vsub.f32 0.0, %v8185_v44 }
  0xf2   : > { %v758_v50 = vmul.f32 1.442695, %v725_v46  ;;  %v727_v51 = vsub.f32 0.0, %v652_v47 }
  0xf3   : > { %7792 = vpow2.f32 %v756_v48  ;;  %v760_v52 = vmul.f32 1.442695, %v726_v49 }
  0xf4   : > { %7794 = vpow2.f32 %v758_v50  ;;  %v762_v53 = vmul.f32 1.442695, %v727_v51  ;;  %v655_v54 = vpop.f32.mrb[4].mxu0 }
  0xf5   : > { %7796 = vpow2.f32 %v760_v52  ;;  %v8190_v55 = vadd.f32 %v655_v54, %v8175_v36  ;;  %v657_v56 = vpop.f32.mrb[5].mxu0 }
  0xf6   : > { %7798 = vpow2.f32 %v762_v53  ;;  %v658_v57 = vadd.f32 %v657_v56, %v8177_v37  ;;  %v659_v58 = vpop.f32.mrb[6].mxu0 }
  0xf7   : > { %v728_v59 = vsub.f32 0.0, %v8190_v55  ;;  %v8195_v60 = vadd.f32 %v659_v58, %v8175_v36  ;;  %v661_v61 = vpop.f32.mrb[7].mxu0 }
  0xf8   : > { %v729_v62 = vsub.f32 0.0, %v658_v57  ;;  %v662_v63 = vadd.f32 %v661_v61, %v8177_v37  ;;  %v7758_v57 = vld [vmem:[%s10255_s3 + $0x20] sm:$0xff]  }
  0xf9   : > { %v764_v0 = vmul.f32 1.442695, %v728_v59  ;;  %v730_v1 = vsub.f32 0.0, %v8195_v60  ;;  %6285 = vmatprep.subr.bf16.mxu1 %v7758_v57 }
  0xfa   : > { %v766_v2 = vmul.f32 1.442695, %v729_v62  ;;  %v731_v3 = vsub.f32 0.0, %v662_v63  ;;  %6286 = vmatpush3.bf16.msra.mxu1 %v7758_v57 }
  0xfb   : > { %7800 = vpow2.f32 %v764_v0  ;;  %v768_v4 = vmul.f32 1.442695, %v730_v1 }
  0xfc   : > { %7802 = vpow2.f32 %v766_v2  ;;  %v770_v5 = vmul.f32 1.442695, %v731_v3  ;;  %v665_v6 = vpop.f32.mrb[8].mxu0 }
  0xfd   : > { %v7793_v7 = vpop.eup %7792  ;;  %7804 = vpow2.f32 %v768_v4  ;;  %v8200_v8 = vadd.f32 %v665_v6, %v8175_v36  ;;  %v667_v9 = vpop.f32.mrb[9].mxu0 }
  0xfe   : > { %v7795_v10 = vpop.eup %7794  ;;  %v820_v11 = vadd.f32 1.0, %v7793_v7  ;;  %7806 = vpow2.f32 %v770_v5  ;;  %v668_v12 = vadd.f32 %v667_v9, %v8177_v37  ;;  %v669_v13 = vpop.f32.mrb[10].mxu0 }
  0xff   : > { %v7797_v14 = vpop.eup %7796  ;;  %v821_v15 = vadd.f32 1.0, %v7795_v10  ;;  %v732_v16 = vsub.f32 0.0, %v8200_v8  ;;  %v8205_v17 = vadd.f32 %v669_v13, %v8175_v36  ;;  %v671_v18 = vpop.f32.mrb[11].mxu0  ;;  %v7759_v10 = vld [vmem:[%s10255_s3 + $0x28] sm:$0xff]  }
 0x100   : > { %v7799_v20 = vpop.eup %7798  ;;  %7808 = vrcp.f32 %v820_v11  ;;  %v822_v21 = vadd.f32 1.0, %v7797_v14  ;;  %v733_v22 = vsub.f32 0.0, %v668_v12  ;;  %v672_v23 = vadd.f32 %v671_v18, %v8177_v37  ;;  %6287 = vmatprep.subr.bf16.mxu1 %v7759_v10 }
 0x101   : > { %7810 = vrcp.f32 %v821_v15  ;;  %v823_v24 = vadd.f32 1.0, %v7799_v20  ;;  %v772_v25 = vmul.f32 1.442695, %v732_v16  ;;  %v734_v26 = vsub.f32 0.0, %v8205_v17  ;;  %6288 = vmatpush3.bf16.msra.mxu1 %v7759_v10 }
 0x102   : > { %7812 = vrcp.f32 %v822_v21  ;;  %v774_v27 = vmul.f32 1.442695, %v733_v22  ;;  %v735_v28 = vsub.f32 0.0, %v672_v23 }
 0x103   : > { %7814 = vrcp.f32 %v823_v24  ;;  %v776_v29 = vmul.f32 1.442695, %v734_v26 }
 0x104   : > { %7816 = vpow2.f32 %v772_v25  ;;  %v778_v30 = vmul.f32 1.442695, %v735_v28  ;;  %v675_v31 = vpop.f32.mrb[12].mxu0 }
 0x105   : > { %v7801_v32 = vpop.eup %7800  ;;  %7818 = vpow2.f32 %v774_v27  ;;  %v8213_v33 = vadd.f32 %v675_v31, %v8175_v36  ;;  %v677_v34 = vpop.f32.mrb[13].mxu0 }
 0x106   : > { %v7803_v38 = vpop.eup %7802  ;;  %v824_v40 = vadd.f32 1.0, %v7801_v32  ;;  %7820 = vpow2.f32 %v776_v29  ;;  %v678_v41 = vadd.f32 %v677_v34, %v8177_v37  ;;  %v679_v42 = vpop.f32.mrb[14].mxu0 }
 0x107   : > { %v7805_v43 = vpop.eup %7804  ;;  %v825_v45 = vadd.f32 1.0, %v7803_v38  ;;  %7822 = vpow2.f32 %v778_v30  ;;  %v736_v46 = vsub.f32 0.0, %v8213_v33  ;;  %v8221_v47 = vadd.f32 %v679_v42, %v8175_v36  ;;  %v681_v48 = vpop.f32.mrb[15].mxu0 }
 0x108   : > { %v7807_v49 = vpop.eup %7806  ;;  %7824 = vrcp.f32 %v824_v40  ;;  %v826_v50 = vadd.f32 1.0, %v7805_v43  ;;  %v737_v51 = vsub.f32 0.0, %v678_v41  ;;  %v682_v52 = vadd.f32 %v681_v48, %v8177_v37 }
 0x109   : > { %7826 = vrcp.f32 %v825_v45  ;;  %v827_v53 = vadd.f32 1.0, %v7807_v49  ;;  %v780_v54 = vmul.f32 1.442695, %v736_v46  ;;  %v738_v56 = vsub.f32 0.0, %v8221_v47 }
 0x10a   : > { %v7809_v58 = vpop.eup %7808  ;;  %7828 = vrcp.f32 %v826_v50  ;;  %v782_v59 = vmul.f32 1.442695, %v737_v51  ;;  %v739_v61 = vsub.f32 0.0, %v682_v52 }
 0x10b   : > { %v7811_v62 = vpop.eup %7810  ;;  %7830 = vrcp.f32 %v827_v53  ;;  %v784_v63 = vmul.f32 1.442695, %v738_v56  ;;  %916 = vrot.lane.b32.xlu0 %v7809_v58, %s8025_s23 }
 0x10c   : > { %v7813_v0 = vpop.eup %7812  ;;  %7832 = vpow2.f32 %v780_v54  ;;  %v786_v1 = vmul.f32 1.442695, %v739_v61  ;;  %v685_v2 = vpop.f32.mrb[16].mxu0 }
 0x10d   : > { %v7815_v3 = vpop.eup %7814  ;;  %7834 = vpow2.f32 %v782_v59  ;;  %v8230_v4 = vadd.f32 %v685_v2, %v8175_v36  ;;  %v687_v5 = vpop.f32.mrb[17].mxu0  ;;  %920 = vrot.lane.b32.xlu1 %v7813_v0, %s8025_s23 }
 0x10e   : > { %v7817_v6 = vpop.eup %7816  ;;  %7836 = vpow2.f32 %v784_v63  ;;  %v688_v7 = vadd.f32 %v687_v5, %v8177_v37  ;;  %v689_v9 = vpop.f32.mrb[18].mxu0 }
 0x10f   : > { %v7819_v11 = vpop.eup %7818  ;;  %v828_v12 = vadd.f32 1.0, %v7817_v6  ;;  %7838 = vpow2.f32 %v786_v1  ;;  %v740_v13 = vsub.f32 0.0, %v8230_v4  ;;  %v8239_v14 = vadd.f32 %v689_v9, %v8175_v36  ;;  %v691_v15 = vpop.f32.mrb[19].mxu0  ;;  %918 = vrot.lane.b32.xlu0 %v7811_v62, %s8025_s23 }
 0x110   : > { %v7821_v16 = vpop.eup %7820  ;;  %v829_v18 = vadd.f32 1.0, %v7819_v11  ;;  %v741_v19 = vsub.f32 0.0, %v688_v7  ;;  %v692_v20 = vadd.f32 %v691_v15, %v8177_v37 }
 0x111   : > { %v7823_v21 = vpop.eup %7822  ;;  %7840 = vrcp.f32 %v828_v12  ;;  %v830_v22 = vadd.f32 1.0, %v7821_v16  ;;  %v788_v23 = vmul.f32 1.442695, %v740_v13  ;;  %v742_v24 = vsub.f32 0.0, %v8239_v14  ;;  %922 = vrot.lane.b32.xlu1 %v7815_v3, %s8025_s23 }
 0x112   : > { %v7825_v25 = vpop.eup %7824  ;;  %7842 = vrcp.f32 %v829_v18  ;;  %v831_v26 = vadd.f32 1.0, %v7823_v21  ;;  %v790_v27 = vmul.f32 1.442695, %v741_v19  ;;  %v743_v28 = vsub.f32 0.0, %v692_v20 }
 0x113   : > { %v7827_v29 = vpop.eup %7826  ;;  %7844 = vrcp.f32 %v830_v22  ;;  %v792_v30 = vmul.f32 1.442695, %v742_v24  ;;  %924 = vrot.lane.b32.xlu0 %v7825_v25, %s8025_s23 }
 0x114   : > { %v7829_v31 = vpop.eup %7828  ;;  %7846 = vrcp.f32 %v831_v26  ;;  %v794_v32 = vmul.f32 1.442695, %v743_v28  ;;  %v695_v34 = vpop.f32.mrb[20].mxu0 }
 0x115   : > { %v7831_v35 = vpop.eup %7830  ;;  %7848 = vpow2.f32 %v788_v23  ;;  %v8247_v38 = vadd.f32 %v695_v34, %v8175_v36  ;;  %v697_v40 = vpop.f32.mrb[21].mxu0  ;;  %926 = vrot.lane.b32.xlu1 %v7827_v29, %s8025_s23 }
 0x116   : > { %v7833_v41 = vpop.eup %7832  ;;  %7850 = vpow2.f32 %v790_v27  ;;  %v698_v42 = vadd.f32 %v697_v40, %v8177_v37  ;;  %v699_v43 = vpop.f32.mrb[22].mxu0 }
 0x117   : > { %v7835_v45 = vpop.eup %7834  ;;  %v832_v46 = vadd.f32 1.0, %v7833_v41  ;;  %7852 = vpow2.f32 %v792_v30  ;;  %v744_v48 = vsub.f32 0.0, %v8247_v38  ;;  %v8253_v49 = vadd.f32 %v699_v43, %v8175_v36  ;;  %v701_v50 = vpop.f32.mrb[23].mxu0  ;;  %928 = vrot.lane.b32.xlu0 %v7829_v31, %s8025_s23 }
 0x118   : > { %v7837_v51 = vpop.eup %7836  ;;  %v833_v52 = vadd.f32 1.0, %v7835_v45  ;;  %7854 = vpow2.f32 %v794_v32  ;;  %v745_v53 = vsub.f32 0.0, %v698_v42  ;;  %v702_v54 = vadd.f32 %v701_v50, %v8177_v37 }
 0x119   : > { %v7839_v56 = vpop.eup %7838  ;;  %7856 = vrcp.f32 %v832_v46  ;;  %v834_v57 = vadd.f32 1.0, %v7837_v51  ;;  %v796_v58 = vmul.f32 1.442695, %v744_v48  ;;  %v746_v59 = vsub.f32 0.0, %v8253_v49  ;;  %930 = vrot.lane.b32.xlu1 %v7831_v35, %s8025_s23 }
 0x11a   : > { %7858 = vrcp.f32 %v833_v52  ;;  %v835_v61 = vadd.f32 1.0, %v7839_v56  ;;  %v798_v62 = vmul.f32 1.442695, %v745_v53  ;;  %v747_v63 = vsub.f32 0.0, %v702_v54 }
 0x11b   : > { %v7841_v0 = vpop.eup %7840  ;;  %7860 = vrcp.f32 %v834_v57  ;;  %v800_v1 = vmul.f32 1.442695, %v746_v59 }
 0x11c   : > { %v7843_v2 = vpop.eup %7842  ;;  %7862 = vrcp.f32 %v835_v61  ;;  %v802_v3 = vmul.f32 1.442695, %v747_v63  ;;  %932 = vrot.lane.b32.xlu0 %v7841_v0, %s8025_s23  ;;  %v705_v5 = vpop.f32.mrb[24].mxu0 }
 0x11d   : > { %v7845_v6 = vpop.eup %7844  ;;  %7864 = vpow2.f32 %v796_v58  ;;  %v8261_v7 = vadd.f32 %v705_v5, %v8175_v36  ;;  %v707_v9 = vpop.f32.mrb[25].mxu0  ;;  %934 = vrot.lane.b32.xlu1 %v7843_v2, %s8025_s23 }
 0x11e   : > { %v7847_v10 = vpop.eup %7846  ;;  %7866 = vpow2.f32 %v798_v62  ;;  %v708_v11 = vadd.f32 %v707_v9, %v8177_v37  ;;  %v709_v12 = vpop.f32.mrb[26].mxu0 }
 0x11f   : > { %v7849_v13 = vpop.eup %7848  ;;  %7868 = vpow2.f32 %v800_v1  ;;  %v748_v15 = vsub.f32 0.0, %v8261_v7  ;;  %v8267_v16 = vadd.f32 %v709_v12, %v8175_v36  ;;  %v711_v18 = vpop.f32.mrb[27].mxu0 }
 0x120   : > { %v7851_v19 = vpop.eup %7850  ;;  %v836_v20 = vadd.f32 1.0, %v7849_v13  ;;  %7870 = vpow2.f32 %v802_v3  ;;  %v749_v21 = vsub.f32 0.0, %v708_v11  ;;  %v712_v22 = vadd.f32 %v711_v18, %v8177_v37  ;;  %936 = vrot.lane.b32.xlu0 %v7845_v6, %s8025_s23 }
 0x121   : > { %v7853_v23 = vpop.eup %7852  ;;  %v837_v24 = vadd.f32 1.0, %v7851_v19  ;;  %v750_v25 = vsub.f32 0.0, %v8267_v16  ;;  %938 = vrot.lane.b32.xlu1 %v7847_v10, %s8025_s23  ;;  %v804_v28 = vmul.f32 1.442695, %v748_v15 }
 0x122   : > { %v7855_v26 = vpop.eup %7854  ;;  %7872 = vrcp.f32 %v836_v20  ;;  %v838_v27 = vadd.f32 1.0, %v7853_v23  ;;  %v751_v29 = vsub.f32 0.0, %v712_v22  ;;  %v806_v32 = vmul.f32 1.442695, %v749_v21 }
 0x123   : > { %v7857_v30 = vpop.eup %7856  ;;  %7874 = vrcp.f32 %v837_v24  ;;  %v839_v31 = vadd.f32 1.0, %v7855_v26  ;;  %v808_v35 = vmul.f32 1.442695, %v750_v25 }
 0x124   : > { %v7859_v34 = vpop.eup %7858  ;;  %7876 = vrcp.f32 %v838_v27  ;;  %940 = vrot.lane.b32.xlu0 %v7857_v30, %s8025_s23  ;;  %v715_v40 = vpop.f32.mrb[28].mxu0  ;;  %v810_v42 = vmul.f32 1.442695, %v751_v29 }
 0x125   : > { %v7861_v41 = vpop.eup %7860  ;;  %7878 = vrcp.f32 %v839_v31  ;;  %v8275_v43 = vadd.f32 %v715_v40, %v8175_v36  ;;  %v717_v45 = vpop.f32.mrb[29].mxu0  ;;  %942 = vrot.lane.b32.xlu1 %v7859_v34, %s8025_s23 }
 0x126   : > { %v7863_v46 = vpop.eup %7862  ;;  %7880 = vpow2.f32 %v804_v28  ;;  %v718_v48 = vadd.f32 %v717_v45, %v8177_v37  ;;  %v719_v50 = vpop.f32.mrb[30].mxu0 }
 0x127   : > { %v7865_v51 = vpop.eup %7864  ;;  %7882 = vpow2.f32 %v806_v32  ;;  %v752_v52 = vsub.f32 0.0, %v8275_v43  ;;  %v8281_v53 = vadd.f32 %v719_v50, %v8175_v36  ;;  %v721_v54 = vpop.f32.mrb[31].mxu0 }
 0x128   : > { %v7867_v56 = vpop.eup %7866  ;;  %v840_v57 = vadd.f32 1.0, %v7865_v51  ;;  %7884 = vpow2.f32 %v808_v35  ;;  %v753_v58 = vsub.f32 0.0, %v718_v48  ;;  %v722_v59 = vadd.f32 %v721_v54, %v8177_v37  ;;  %944 = vrot.lane.b32.xlu0 %v7861_v41, %s8025_s23 }
 0x129   : > { %v7869_v61 = vpop.eup %7868  ;;  %v841_v62 = vadd.f32 1.0, %v7867_v56  ;;  %7886 = vpow2.f32 %v810_v42  ;;  %v754_v63 = vsub.f32 0.0, %v8281_v53  ;;  %946 = vrot.lane.b32.xlu1 %v7863_v46, %s8025_s23  ;;  %v812_v1 = vmul.f32 1.442695, %v752_v52 }
 0x12a   : > { %v7871_v0 = vpop.eup %7870  ;;  %7888 = vrcp.f32 %v840_v57  ;;  %v842_v36 = vadd.f32 1.0, %v7869_v61  ;;  %v755_v2 = vsub.f32 0.0, %v722_v59  ;;  %v814_v5 = vmul.f32 1.442695, %v753_v58 }
 0x12b   : > { %7890 = vrcp.f32 %v841_v62  ;;  %v843_v3 = vadd.f32 1.0, %v7871_v0  ;;  %v816_v37 = vmul.f32 1.442695, %v754_v63 }
 0x12c   : > { %v7873_v6 = vpop.eup %7872  ;;  %7892 = vrcp.f32 %v842_v36  ;;  %v818_v10 = vmul.f32 1.442695, %v755_v2 }
 0x12d   : > { %v7875_v9 = vpop.eup %7874  ;;  %7894 = vrcp.f32 %v843_v3  ;;  %948 = vrot.lane.b32.xlu0 %v7873_v6, %s8025_s23 }
 0x12e   : > { %v7877_v11 = vpop.eup %7876  ;;  %7896 = vpow2.f32 %v812_v1  ;;  %950 = vrot.lane.b32.xlu1 %v7875_v9, %s8025_s23 }
 0x12f   : > { %v7879_v12 = vpop.eup %7878  ;;  %7898 = vpow2.f32 %v814_v5 }
 0x130   : > { %v7881_v13 = vpop.eup %7880  ;;  %7900 = vpow2.f32 %v816_v37 }
 0x131   : > { %v7883_v15 = vpop.eup %7882  ;;  %v844_v18 = vadd.f32 1.0, %v7881_v13  ;;  %7902 = vpow2.f32 %v818_v10  ;;  %952 = vrot.lane.b32.xlu0 %v7877_v11, %s8025_s23 }
 0x132   : > { %v7885_v19 = vpop.eup %7884  ;;  %v845_v20 = vadd.f32 1.0, %v7883_v15  ;;  %954 = vrot.lane.b32.xlu1 %v7879_v12, %s8025_s23 }
 0x133   : > { %v7887_v21 = vpop.eup %7886  ;;  %7904 = vrcp.f32 %v844_v18  ;;  %v846_v22 = vadd.f32 1.0, %v7885_v19 }
 0x134   : > { %v7889_v23 = vpop.eup %7888  ;;  %7906 = vrcp.f32 %v845_v20  ;;  %v847_v24 = vadd.f32 1.0, %v7887_v21 }
 0x135   : > { %v7891_v25 = vpop.eup %7890  ;;  %956 = vrot.lane.b32.xlu0 %v7889_v23, %s8025_s23  ;;  %7908 = vrcp.f32 %v846_v22 }
 0x136   : > { %v7893_v26 = vpop.eup %7892  ;;  %958 = vrot.lane.b32.xlu1 %v7891_v25, %s8025_s23  ;;  %7910 = vrcp.f32 %v847_v24 }
 0x137   : > { %v7895_v27 = vpop.eup %7894 }
 0x138   : > { %v7897_v28 = vpop.eup %7896 }
 0x139   : > { %v7899_v29 = vpop.eup %7898  ;;  %v848_v30 = vadd.f32 1.0, %v7897_v28  ;;  %960 = vrot.lane.b32.xlu0 %v7893_v26, %s8025_s23 }
 0x13a   : > { %v7901_v31 = vpop.eup %7900  ;;  %v849_v32 = vadd.f32 1.0, %v7899_v29  ;;  %962 = vrot.lane.b32.xlu1 %v7895_v27, %s8025_s23 }
 0x13b   : > { %v7903_v34 = vpop.eup %7902  ;;  %7912 = vrcp.f32 %v848_v30  ;;  %v850_v35 = vadd.f32 1.0, %v7901_v31 }
 0x13c   : > { %7914 = vrcp.f32 %v849_v32  ;;  %v851_v40 = vadd.f32 1.0, %v7903_v34 }
 0x13d   : > { %v7905_v41 = vpop.eup %7904  ;;  %7916 = vrcp.f32 %v850_v35 }
 0x13e   : > { %v7907_v42 = vpop.eup %7906  ;;  %964 = vrot.lane.b32.xlu0 %v7905_v41, %s8025_s23  ;;  %7918 = vrcp.f32 %v851_v40 }
 0x13f   : > { %966 = vrot.lane.b32.xlu1 %v7907_v42, %s8025_s23  ;;  %v7909_v45 = vpop.eup %7908 }
 0x140   : > { %v7911_v46 = vpop.eup %7910 }
 0x142   : > { %968 = vrot.lane.b32.xlu0 %v7909_v45, %s8025_s23 }
 0x143   : > { %970 = vrot.lane.b32.xlu1 %v7911_v46, %s8025_s23 }
 0x145   : > { %v7913_v48 = vpop.eup %7912 }
 0x146   : > { %v7915_v50 = vpop.eup %7914  ;;  %972 = vrot.lane.b32.xlu0 %v7913_v48, %s8025_s23 }
 0x147   : > { %974 = vrot.lane.b32.xlu1 %v7915_v50, %s8025_s23  ;;  %v7917_v51 = vpop.eup %7916 }
 0x148   : > { %v7919_v52 = vpop.eup %7918 }
 0x14a   : > { %976 = vrot.lane.b32.xlu0 %v7917_v51, %s8025_s23 }
 0x14b   : > { %978 = vrot.lane.b32.xlu1 %v7919_v52, %s8025_s23 }
 0x17d   : > { %v917_v54 = vpop.permute.xlu0 %916 }
 0x17f   : > { %v921_v56 = vpop.permute.xlu1 %920 }
 0x181   : > { %v919_v57 = vpop.permute.xlu0 %918 }
 0x182   : > { %v980_v58 = vsel %vm586_vm0, %v917_v54, %v919_v57 }
 0x183   : > { %v923_v59 = vpop.permute.xlu1 %922  ;;  %v1012_v62 = vmul.f32 %v980_v58, %v8180_v39 }
 0x184   : > { %v981_v61 = vsel %vm586_vm0, %v921_v56, %v923_v59 }
 0x185   : > { %v1013_v63 = vmul.f32 %v981_v61, %v8185_v44  ;;  %v925_v0 = vpop.permute.xlu0 %924 }
 0x187   : > { %v927_v36 = vpop.permute.xlu1 %926  ;;  %v1028_v1 = vpack.c.bf16 %v1013_v63, %v1012_v62 }
 0x188   : > { %v982_v3 = vsel %vm586_vm0, %v925_v0, %v927_v36 }
 0x189   : > { %6289 = vmatprep.mubr.msk.bf16.mxu1 %vm1091_vm1, %v1028_v1  ;;  %v929_v2 = vpop.permute.xlu0 %928  ;;  %v1014_v37 = vmul.f32 %v982_v3, %v8190_v55  ;;  %v7777_v3 = vld [vmem:[%s10258_s6 + $0x20] sm:$0xff]  }
 0x18b   : > { %v931_v5 = vpop.permute.xlu1 %930 }
 0x18c   : > { %v983_v6 = vsel %vm586_vm0, %v929_v2, %v931_v5  ;;  %v5671_v5 = vld [vmem:[%s10256_s4] ss:$0 sm:$0xff] }
 0x18d   : > { %v1015_v9 = vmul.f32 %v983_v6, %v8195_v60 }
 0x18e   : > { %v933_v10 = vpop.permute.xlu0 %932 }
 0x18f   : > { %v1029_v39 = vpack.c.bf16 %v1015_v9, %v1014_v37  ;;  %v935_v11 = vpop.permute.xlu1 %934 }
 0x190   : > { %v984_v44 = vsel %vm586_vm0, %v933_v10, %v935_v11 }
 0x191   : > { %6290 = vmatmul.mubr.msk.bf16.vlgmr.msra.gmra.mrb[0].mxu1 %vm1091_vm1, %v1029_v39  ;;  %v1016_v18 = vmul.f32 %v984_v44, %v8200_v8 }
 0x192   : > { %v937_v12 = vpop.permute.xlu0 %936 }
 0x193   : > { %v939_v13 = vpop.permute.xlu1 %938 }
 0x194   : > { %v985_v15 = vsel %vm586_vm0, %v937_v12, %v939_v13 }
 0x195   : > { %v1017_v19 = vmul.f32 %v985_v15, %v8205_v17 }
 0x196   : > { %v941_v20 = vpop.permute.xlu0 %940 }
 0x197   : > { %v1030_v21 = vpack.c.bf16 %v1017_v19, %v1016_v18  ;;  %v943_v55 = vpop.permute.xlu1 %942 }
 0x198   : > { %v986_v60 = vsel %vm586_vm0, %v941_v20, %v943_v55 }
 0x199   : > { %6293 = vmatprep.mubr.msk.bf16.mxu1 %vm1091_vm1, %v1030_v21  ;;  %v1018_v25 = vmul.f32 %v986_v60, %v8213_v33 }
 0x19a   : > { %v945_v22 = vpop.permute.xlu0 %944 }
 0x19b   : > { %v947_v23 = vpop.permute.xlu1 %946 }
 0x19c   : > { %v987_v24 = vsel %vm586_vm0, %v945_v22, %v947_v23 }
 0x19d   : > { %v1019_v26 = vmul.f32 %v987_v24, %v8221_v47 }
 0x19f   : > { %v1031_v27 = vpack.c.bf16 %v1019_v26, %v1018_v25  ;;  %v949_v28 = vpop.permute.xlu0 %948 }
 0x1a0   : > { %v951_v8 = vpop.permute.xlu1 %950 }
 0x1a1   : > { %6294 = vmatmul.mubr.msk.bf16.gmra.mrb[4].mxu1 %vm1091_vm1, %v1031_v27  ;;  %v988_v17 = vsel %vm586_vm0, %v949_v28, %v951_v8 }
 0x1a2   : > { %v1020_v32 = vmul.f32 %v988_v17, %v8230_v4 }
 0x1a3   : > { %v953_v29 = vpop.permute.xlu0 %952 }
 0x1a4   : > { %v955_v30 = vpop.permute.xlu1 %954 }
 0x1a5   : > { %v989_v31 = vsel %vm586_vm0, %v953_v29, %v955_v30 }
 0x1a6   : > { %v1021_v34 = vmul.f32 %v989_v31, %v8239_v14 }
 0x1a7   : > { %v957_v35 = vpop.permute.xlu0 %956 }
 0x1a8   : > { %v1032_v40 = vpack.c.bf16 %v1021_v34, %v1020_v32  ;;  %v959_v33 = vpop.permute.xlu1 %958 }
 0x1a9   : > { %v990_v47 = vsel %vm586_vm0, %v957_v35, %v959_v33 }
 0x1aa   : > { %6297 = vmatprep.mubr.msk.bf16.mxu1 %vm1091_vm1, %v1032_v40  ;;  %v1022_v46 = vmul.f32 %v990_v47, %v8247_v38 }
 0x1ab   : > { %v961_v41 = vpop.permute.xlu0 %960 }
 0x1ac   : > { %v963_v42 = vpop.permute.xlu1 %962 }
 0x1ad   : > { %v991_v45 = vsel %vm586_vm0, %v961_v41, %v963_v42 }
 0x1ae   : > { %v1023_v48 = vmul.f32 %v991_v45, %v8253_v49 }
 0x1b0   : > { %v1033_v50 = vpack.c.bf16 %v1023_v48, %v1022_v46  ;;  %v965_v51 = vpop.permute.xlu0 %964 }
 0x1b1   : > { %v967_v4 = vpop.permute.xlu1 %966 }
 0x1b2   : > { %6298 = vmatmul.mubr.msk.bf16.gmra.mrb[8].mxu1 %vm1091_vm1, %v1033_v50  ;;  %v992_v14 = vsel %vm586_vm0, %v965_v51, %v967_v4  ;;  %v7761_v50 = vld [vmem:[%s10257_s5 + $0x8] sm:$0xff]   ;;  %v7762_v51 = vld [vmem:[%s10257_s5 + $0x10] sm:$0xff]   ;;  %v7763_v4 = vld [vmem:[%s10257_s5 + $0x18] sm:$0xff]  }
 0x1b3   : > { %v1024_v57 = vmul.f32 %v992_v14, %v8261_v7  ;;  %v7760_v7 = vld [vmem:[%s10257_s5] sm:$0xff]  }
 0x1b4   : > { %v969_v52 = vpop.permute.xlu0 %968  ;;  %v7764_v14 = vld [vmem:[%s10257_s5 + $0x20] sm:$0xff]  }
 0x1b5   : > { %v971_v54 = vpop.permute.xlu1 %970 }
 0x1b6   : > { %v993_v56 = vsel %vm586_vm0, %v969_v52, %v971_v54  ;;  %v7765_v52 = vld [vmem:[%s10257_s5 + $0x28] sm:$0xff]   ;;  %v7766_v54 = vld [vmem:[%s10257_s5 + $0x30] sm:$0xff]  }
 0x1b7   : > { %v1025_v58 = vmul.f32 %v993_v56, %v8267_v16  ;;  %v7776_v16 = vld [vmem:[%s10258_s6 + $0x18] sm:$0xff]  }
 0x1b8   : > { %v973_v59 = vpop.permute.xlu0 %972  ;;  %6337 = vmatprep.subr.bf16.mxu0 %v7776_v16  ;;  %v7767_v56 = vld [vmem:[%s10257_s5 + $0x38] sm:$0xff]  }
 0x1b9   : > { %v1034_v61 = vpack.c.bf16 %v1025_v58, %v1024_v57  ;;  %v975_v38 = vpop.permute.xlu1 %974  ;;  %6338 = vmatpush3.bf16.msra.mxu0 %v7776_v16  ;;  %v7768_v57 = vld [vmem:[%s10257_s5 + $0x40] sm:$0xff]   ;;  %v7769_v58 = vld [vmem:[%s10257_s5 + $0x48] sm:$0xff]  }
 0x1ba   : > { %v994_v49 = vsel %vm586_vm0, %v973_v59, %v975_v38  ;;  %6339 = vmatprep.subr.bf16.mxu0 %v7777_v3  ;;  %v7770_v59 = vld [vmem:[%s10257_s5 + $0x50] sm:$0xff]   ;;  %v7772_v38 = vld [vmem:[%s10257_s5 + $0x60] sm:$0xff]  }
 0x1bb   : > { %6301 = vmatprep.mubr.msk.bf16.mxu1 %vm1091_vm1, %v1034_v61  ;;  %v1026_v36 = vmul.f32 %v994_v49, %v8275_v43  ;;  %v7778_v43 = vld [vmem:[%s10258_s6 + $0x28] sm:$0xff]   ;;  %v7771_v61 = vld [vmem:[%s10257_s5 + $0x58] sm:$0xff]  }
 0x1bc   : > { %v977_v62 = vpop.permute.xlu0 %976  ;;  %v7773_v49 = vld [vmem:[%s10257_s5 + $0x68] sm:$0xff]  }
 0x1bd   : > { %v979_v63 = vpop.permute.xlu1 %978  ;;  %6340 = vmatpush3.bf16.msra.mxu0 %v7777_v3 }
 0x1be   : > { %v995_v0 = vsel %vm586_vm0, %v977_v62, %v979_v63  ;;  %6341 = vmatprep.subr.bf16.mxu0 %v7778_v43  ;;  %v7774_v62 = vld [vmem:[%s10257_s5 + $0x70] sm:$0xff]   ;;  %v7775_v63 = vld [vmem:[%s10257_s5 + $0x78] sm:$0xff]  }
 0x1bf   : > { %v1027_v1 = vmul.f32 %v995_v0, %v8281_v53  ;;  %v7779_v0 = vld [vmem:[%s10258_s6] sm:$0xff]  }
 0x1c1   : > { %v1035_v2 = vpack.c.bf16 %v1027_v1, %v1026_v36  ;;  %6342 = vmatpush3.bf16.msra.mxu0 %v7778_v43  ;;  %v7785_v36 = vld [vmem:[%s10260_s8] sm:$0xff]   ;;  %v7786_v1 = vld [vmem:[%s10260_s8 + $0x8] sm:$0xff]  }
 0x1c2   : > { %6359 = vmatprep.subr.bf16.mxu0 %v7779_v0 }
 0x1c3   : > { %6302 = vmatmul.mubr.msk.bf16.gmra.mrb[12].mxu1 %vm1091_vm1, %v1035_v2 }
 0x1c4   : > { %6321 = vmatprep.mubr.bf16.mxu1 %v7760_v7 }
 0x264   : > { %v6291_v53 = vpop.f32.mrb[0].mxu1 }
 0x265   : > { %v1150_v6 = vpop.f32.mrb[1].mxu1  ;;  %v8364_v44 = vadd.f32 %v6291_v53, %v5671_v5 }
 0x266   : > { %v6292_v37 = vpop.f32.mrb[2].mxu1  ;;  %v8358_v10 = vadd.f32 %v5671_v5, %v1150_v6 }
 0x267   : > { %v1153_v9 = vpop.f32.mrb[3].mxu1  ;;  %v8360_v39 = vadd.f32 %v6292_v37, %v5671_v5 }
 0x268   : > { %v8362_v11 = vadd.f32 %v5671_v5, %v1153_v9  ;;  %v7781_v9 = vld [vmem:[%s10258_s6 + $0x10] sm:$0xff]  }
 0x269   : > { %v8372_v13 = vpack.c.bf16 %v8360_v39, %v8364_v44 }
 0x26a   : > { %v8368_v12 = vpack.c.bf16 %v8362_v11, %v8358_v10 }
 0x26c   : > { %6305 = vmatprep.subr.bf16.mxu1 %v8368_v12 }
 0x26d   : > { %6306 = vmatpush3.bf16.msra.mxu1 %v8368_v12 }
 0x26e   : > { %6307 = vmatprep.subr.bf16.mxu1 %v8372_v13 }
 0x271   : > { %6308 = vmatpush3.bf16.msra.mxu1 %v8372_v13 }
 0x274   : > { %v6295_v15 = vpop.f32.mrb[4].mxu1 }
 0x275   : > { %v1166_v18 = vpop.f32.mrb[5].mxu1  ;;  %v8384_v22 = vadd.f32 %v6295_v15, %v5671_v5 }
 0x276   : > { %v6296_v19 = vpop.f32.mrb[6].mxu1  ;;  %v8378_v21 = vadd.f32 %v5671_v5, %v1166_v18 }
 0x277   : > { %v1169_v20 = vpop.f32.mrb[7].mxu1  ;;  %v8380_v55 = vadd.f32 %v6296_v19, %v5671_v5 }
 0x278   : > { %v8382_v60 = vadd.f32 %v5671_v5, %v1169_v20 }
 0x279   : > { %v8392_v24 = vpack.c.bf16 %v8380_v55, %v8384_v22 }
 0x27a   : > { %v8388_v23 = vpack.c.bf16 %v8382_v60, %v8378_v21 }
 0x27c   : > { %6309 = vmatprep.subr.bf16.mxu1 %v8388_v23 }
 0x27d   : > { %6310 = vmatpush3.bf16.msra.mxu1 %v8388_v23 }
 0x27e   : > { %6311 = vmatprep.subr.bf16.mxu1 %v8392_v24 }
 0x281   : > { %6312 = vmatpush3.bf16.msra.mxu1 %v8392_v24 }
 0x285   : > { %v6299_v25 = vpop.f32.mrb[8].mxu1 }
 0x286   : > { %v1182_v26 = vpop.f32.mrb[9].mxu1  ;;  %v8404_v30 = vadd.f32 %v6299_v25, %v5671_v5  ;;  %v7782_v25 = vld [vmem:[%s10258_s6 + $0x30] sm:$0xff]  }
 0x287   : > { %v6300_v27 = vpop.f32.mrb[10].mxu1  ;;  %v8398_v8 = vadd.f32 %v5671_v5, %v1182_v26 }
 0x288   : > { %v1185_v28 = vpop.f32.mrb[11].mxu1  ;;  %v8400_v17 = vadd.f32 %v6300_v27, %v5671_v5 }
 0x289   : > { %v8402_v29 = vadd.f32 %v5671_v5, %v1185_v28 }
 0x28a   : > { %v8412_v32 = vpack.c.bf16 %v8400_v17, %v8404_v30 }
 0x28b   : > { %v8408_v31 = vpack.c.bf16 %v8402_v29, %v8398_v8 }
 0x28d   : > { %6313 = vmatprep.subr.bf16.mxu1 %v8408_v31 }
 0x28e   : > { %6314 = vmatpush3.bf16.msra.mxu1 %v8408_v31 }
 0x28f   : > { %6315 = vmatprep.subr.bf16.mxu1 %v8412_v32 }
 0x292   : > { %6316 = vmatpush3.bf16.msra.mxu1 %v8412_v32 }
 0x296   : > { %v6303_v34 = vpop.f32.mrb[12].mxu1 }
 0x297   : > { %v1198_v35 = vpop.f32.mrb[13].mxu1  ;;  %v8424_v45 = vadd.f32 %v6303_v34, %v5671_v5 }
 0x298   : > { %v6304_v40 = vpop.f32.mrb[14].mxu1  ;;  %v8418_v47 = vadd.f32 %v5671_v5, %v1198_v35 }
 0x299   : > { %v1201_v33 = vpop.f32.mrb[15].mxu1  ;;  %v8420_v41 = vadd.f32 %v6304_v40, %v5671_v5 }
 0x29a   : > { %v8422_v42 = vadd.f32 %v5671_v5, %v1201_v33  ;;  %v7780_v5 = vld [vmem:[%s10258_s6 + $0x8] sm:$0xff]  }
 0x29b   : > { %v8432_v48 = vpack.c.bf16 %v8420_v41, %v8424_v45 }
 0x29c   : > { %v8428_v46 = vpack.c.bf16 %v8422_v42, %v8418_v47 }
 0x29e   : > { %6317 = vmatprep.subr.bf16.mxu1 %v8428_v46 }
 0x29f   : > { %6318 = vmatpush3.bf16.msra.mxu1 %v8428_v46 }
 0x2a0   : > { %6319 = vmatprep.subr.bf16.mxu1 %v8432_v48 }
 0x2a3   : > { %6320 = vmatpush3.bf16.msra.mxu1 %v8432_v48 }
 0x2a4   : > { %6381 = vmatprep.subr.bf16.mxu1 %v8368_v12 }
 0x2a6   : > { %6322 = vmatmul.mubr.bf16.vlgmr.msra.gmra.mrb[16].mxu1 %v7761_v50 }
 0x2a7   : > { %6382 = vmatpush3.bf16.msra.mxu1 %v8368_v12  ;;  %6325 = vmatprep.mubr.bf16.mxu1 %v7762_v51 }
 0x2a8   : > { %6383 = vmatprep.subr.bf16.mxu1 %v8372_v13 }
 0x2ab   : > { %6384 = vmatpush3.bf16.msra.mxu1 %v8372_v13 }
 0x2ac   : > { %6385 = vmatprep.subr.bf16.mxu1 %v8388_v23 }
 0x2ae   : > { %6326 = vmatmul.mubr.bf16.gmra.mrb[20].mxu1 %v7763_v4 }
 0x2af   : > { %6386 = vmatpush3.bf16.msra.mxu1 %v8388_v23  ;;  %6329 = vmatprep.mubr.bf16.mxu1 %v7764_v14 }
 0x2b0   : > { %6387 = vmatprep.subr.bf16.mxu1 %v8392_v24 }
 0x2b3   : > { %6388 = vmatpush3.bf16.msra.mxu1 %v8392_v24 }
 0x2b4   : > { %6389 = vmatprep.subr.bf16.mxu1 %v8408_v31 }
 0x2b6   : > { %6330 = vmatmul.mubr.bf16.gmra.mrb[24].mxu1 %v7765_v52 }
 0x2b7   : > { %6390 = vmatpush3.bf16.msra.mxu1 %v8408_v31  ;;  %6333 = vmatprep.mubr.bf16.mxu1 %v7766_v54 }
 0x2b8   : > { %6391 = vmatprep.subr.bf16.mxu1 %v8412_v32 }
 0x2bb   : > { %6392 = vmatpush3.bf16.msra.mxu1 %v8412_v32 }
 0x2bc   : > { %6393 = vmatprep.subr.bf16.mxu1 %v8428_v46 }
 0x2be   : > { %6334 = vmatmul.mubr.bf16.gmra.mrb[28].mxu1 %v7767_v56 }
 0x2bf   : > { %6394 = vmatpush3.bf16.msra.mxu1 %v8428_v46  ;;  %6397 = vmatprep.mubr.bf16.mxu1 %v7768_v57 }
 0x2c0   : > { %6395 = vmatprep.subr.bf16.mxu1 %v8432_v48 }
 0x2c3   : > { %6396 = vmatpush3.bf16.msra.mxu1 %v8432_v48 }
 0x2c4   : > { %6435 = vmatprep.subr.bf16.mxu1 %v7785_v36 }
 0x2c6   : > { %6398 = vmatmul.mubr.bf16.vlgmr.msra.gmra.mrb[32].mxu1 %v7769_v58 }
 0x2c7   : > { %6401 = vmatprep.mubr.bf16.mxu1 %v7770_v59  ;;  %6436 = vmatpush3.bf16.msra.mxu1 %v7785_v36 }
 0x2c8   : > { %6437 = vmatprep.subr.bf16.mxu1 %v7786_v1 }
 0x2cb   : > { %6438 = vmatpush3.bf16.msra.mxu1 %v7786_v1 }
 0x2ce   : > { %6402 = vmatmul.mubr.bf16.gmra.mrb[36].mxu1 %v7771_v61 }
 0x2cf   : > { %6405 = vmatprep.mubr.bf16.mxu1 %v7772_v38  ;;  %v7783_v38 = vld [vmem:[%s10258_s6 + $0x38] sm:$0xff]  }
 0x2d6   : > { %6406 = vmatmul.mubr.bf16.gmra.mrb[40].mxu1 %v7773_v49 }
 0x2d7   : > { %6409 = vmatprep.mubr.bf16.mxu1 %v7774_v62 }
 0x2de   : > { %6410 = vmatmul.mubr.bf16.gmra.mrb[44].mxu1 %v7775_v63 }
 0x379   : > { %v6323_v2 = vpop.f32.mrb[16].mxu1 }
 0x37a   : > { %v1325_v7 = vpop.f32.mrb[17].mxu1 }
 0x37b   : > { %v6324_v16 = vpop.f32.mrb[18].mxu1 }
 0x37c   : > { %v1389_v3 = vpack.c.bf16 %v6324_v16, %v6323_v2  ;;  %v1328_v43 = vpop.f32.mrb[19].mxu1 }
 0x37d   : > { %v1388_v53 = vpack.c.bf16 %v1328_v43, %v1325_v7 }
 0x37f   : > { %6343 = vmatprep.mubr.msk.bf16.mxu0 %vm1421_vm2, %v1388_v53 }
 0x380   : > { %6344 = vmatmul.mubr.msk.bf16.vlgmr.msra.gmra.mrb[32].mxu0 %vm1421_vm2, %v1389_v3 }
 0x381   : > { %v6327_v6 = vpop.f32.mrb[20].mxu1  ;;  %6360 = vmatpush3.bf16.msra.mxu0 %v7779_v0 }
 0x382   : > { %v1341_v37 = vpop.f32.mrb[21].mxu1  ;;  %6361 = vmatprep.subr.bf16.mxu0 %v7780_v5 }
 0x383   : > { %v6328_v15 = vpop.f32.mrb[22].mxu1 }
 0x384   : > { %v1391_v18 = vpack.c.bf16 %v6328_v15, %v6327_v6  ;;  %v1344_v19 = vpop.f32.mrb[23].mxu1 }
 0x385   : > { %v1390_v20 = vpack.c.bf16 %v1344_v19, %v1341_v37  ;;  %6362 = vmatpush3.bf16.msra.mxu0 %v7780_v5 }
 0x386   : > { %6363 = vmatprep.subr.bf16.mxu0 %v7781_v9 }
 0x387   : > { %6347 = vmatprep.mubr.msk.bf16.mxu0 %vm1421_vm2, %v1390_v20 }
 0x388   : > { %6348 = vmatmul.mubr.msk.bf16.gmra.mrb[36].mxu0 %vm1421_vm2, %v1391_v18 }
 0x389   : > { %v6331_v26 = vpop.f32.mrb[24].mxu1  ;;  %6364 = vmatpush3.bf16.msra.mxu0 %v7781_v9 }
 0x38a   : > { %v1357_v27 = vpop.f32.mrb[25].mxu1  ;;  %6413 = vmatprep.subr.bf16.mxu0 %v7782_v25 }
 0x38b   : > { %v6332_v28 = vpop.f32.mrb[26].mxu1 }
 0x38c   : > { %v1393_v34 = vpack.c.bf16 %v6332_v28, %v6331_v26  ;;  %v1360_v35 = vpop.f32.mrb[27].mxu1 }
 0x38d   : > { %v1392_v40 = vpack.c.bf16 %v1360_v35, %v1357_v27 }
 0x38f   : > { %6351 = vmatprep.mubr.msk.bf16.mxu0 %vm1421_vm2, %v1392_v40 }
 0x390   : > { %6352 = vmatmul.mubr.msk.bf16.gmra.mrb[40].mxu0 %vm1421_vm2, %v1393_v34 }
 0x391   : > { %v6335_v33 = vpop.f32.mrb[28].mxu1 }
 0x392   : > { %v1373_v50 = vpop.f32.mrb[29].mxu1 }
 0x393   : > { %v6336_v51 = vpop.f32.mrb[30].mxu1 }
 0x394   : > { %v1395_v4 = vpack.c.bf16 %v6336_v51, %v6335_v33  ;;  %v1376_v14 = vpop.f32.mrb[31].mxu1 }
 0x395   : > { %v1394_v52 = vpack.c.bf16 %v1376_v14, %v1373_v50 }
 0x397   : > { %6355 = vmatprep.mubr.msk.bf16.mxu0 %vm1421_vm2, %v1394_v52 }
 0x398   : > { %6356 = vmatmul.mubr.msk.bf16.gmra.mrb[44].mxu0 %vm1421_vm2, %v1395_v4 }
 0x399   : > { %6365 = vmatprep.mubr.msk.bf16.mxu0 %vm1421_vm2, %v8368_v12  ;;  %v6399_v54 = vpop.f32.mrb[32].mxu1  ;;  %v7784_v12 = vld [vmem:[%s10258_s6 + $0x40] sm:$0xff]  }
 0x39a   : > { %v1781_v56 = vpop.f32.mrb[33].mxu1 }
 0x39b   : > { %v6400_v57 = vpop.f32.mrb[34].mxu1 }
 0x39c   : > { %v1845_v58 = vpack.c.bf16 %v6400_v57, %v6399_v54  ;;  %v1784_v59 = vpop.f32.mrb[35].mxu1 }
 0x39d   : > { %v1844_v61 = vpack.c.bf16 %v1784_v59, %v1781_v56 }
 0x3a0   : > { %6366 = vmatmul.mubr.msk.bf16.vlgmr.msra.gmra.mrb[32].mxu0 %vm1421_vm2, %v8372_v13 }
 0x3a1   : > { %6369 = vmatprep.mubr.msk.bf16.mxu0 %vm1421_vm2, %v8388_v23  ;;  %6414 = vmatpush3.bf16.msra.mxu0 %v7782_v25  ;;  %v6403_v49 = vpop.f32.mrb[36].mxu1 }
 0x3a2   : > { %6415 = vmatprep.subr.bf16.mxu0 %v7783_v38  ;;  %v1797_v62 = vpop.f32.mrb[37].mxu1 }
 0x3a3   : > { %v6404_v63 = vpop.f32.mrb[38].mxu1 }
 0x3a4   : > { %v1847_v0 = vpack.c.bf16 %v6404_v63, %v6403_v49  ;;  %v1800_v36 = vpop.f32.mrb[39].mxu1 }
 0x3a5   : > { %6416 = vmatpush3.bf16.msra.mxu0 %v7783_v38  ;;  %v1846_v1 = vpack.c.bf16 %v1800_v36, %v1797_v62 }
 0x3a6   : > { %6417 = vmatprep.subr.bf16.mxu0 %v7784_v12 }
 0x3a8   : > { %6370 = vmatmul.mubr.msk.bf16.gmra.mrb[36].mxu0 %vm1421_vm2, %v8392_v24 }
 0x3a9   : > { %6373 = vmatprep.mubr.msk.bf16.mxu0 %vm1421_vm2, %v8408_v31  ;;  %6418 = vmatpush3.bf16.msra.mxu0 %v7784_v12  ;;  %v6407_v13 = vpop.f32.mrb[40].mxu1  ;;  %v7787_v31 = vld [vmem:[%s10260_s8 + $0x10] sm:$0xff]  }
 0x3aa   : > { %v1813_v23 = vpop.f32.mrb[41].mxu1  ;;  %6439 = vmatprep.subr.bf16.mxu1 %v7787_v31 }
 0x3ab   : > { %v6408_v2 = vpop.f32.mrb[42].mxu1  ;;  %6440 = vmatpush3.bf16.msra.mxu1 %v7787_v31 }
 0x3ac   : > { %v1849_v7 = vpack.c.bf16 %v6408_v2, %v6407_v13  ;;  %v1816_v16 = vpop.f32.mrb[43].mxu1 }
 0x3ad   : > { %v1848_v3 = vpack.c.bf16 %v1816_v16, %v1813_v23 }
 0x3b0   : > { %6374 = vmatmul.mubr.msk.bf16.gmra.mrb[40].mxu0 %vm1421_vm2, %v8412_v32  ;;  %v8561_v32 = vld [vmem:[%s10259_s7] ss:$0 sm:$0xff] }
 0x3b1   : > { %6377 = vmatprep.mubr.msk.bf16.mxu0 %vm1421_vm2, %v8428_v46  ;;  %v6411_v43 = vpop.f32.mrb[44].mxu1 }
 0x3b2   : > { %v1829_v53 = vpop.f32.mrb[45].mxu1 }
 0x3b3   : > { %v6412_v5 = vpop.f32.mrb[46].mxu1 }
 0x3b4   : > { %v1851_v24 = vpack.c.bf16 %v6412_v5, %v6411_v43  ;;  %v1832_v6 = vpop.f32.mrb[47].mxu1 }
 0x3b5   : > { %v1850_v37 = vpack.c.bf16 %v1832_v6, %v1829_v53 }
 0x3b8   : > { %6378 = vmatmul.mubr.msk.bf16.gmra.mrb[44].mxu0 %vm1421_vm2, %v8432_v48 }
 0x3b9   : > { %6419 = vmatprep.mubr.msk.bf16.mxu0 %vm1421_vm2, %v1844_v61 }
 0x3c0   : > { %6420 = vmatmul.mubr.msk.bf16.vlgmr.msra.gmra.mrb[32].mxu0 %vm1421_vm2, %v1845_v58 }
 0x3c1   : > { %6423 = vmatprep.mubr.msk.bf16.mxu0 %vm1421_vm2, %v1846_v1 }
 0x3c8   : > { %6424 = vmatmul.mubr.msk.bf16.gmra.mrb[36].mxu0 %vm1421_vm2, %v1847_v0 }
 0x3c9   : > { %6427 = vmatprep.mubr.msk.bf16.mxu0 %vm1421_vm2, %v1848_v3 }
 0x3d0   : > { %6428 = vmatmul.mubr.msk.bf16.gmra.mrb[40].mxu0 %vm1421_vm2, %v1849_v7 }
 0x3d1   : > { %6431 = vmatprep.mubr.msk.bf16.mxu0 %vm1421_vm2, %v1850_v37 }
 0x3d8   : > { %6432 = vmatmul.mubr.msk.bf16.gmra.mrb[44].mxu0 %vm1421_vm2, %v1851_v24 }
 0x493   : > { %v6421_v46 = vpop.f32.mrb[32].mxu0 }
 0x494   : > { %v2023_v48 = vadd.f32 %v6421_v46, %v8561_v32  ;;  %v1935_v9 = vpop.f32.mrb[33].mxu0 }
 0x495   : > { %v2021_v15 = vadd.f32 %v8561_v32, %v1935_v9  ;;  %v6422_v18 = vpop.f32.mrb[34].mxu0 }
 0x496   : > { %v2039_v19 = vadd.f32 %v2023_v48, %v8364_v44  ;;  %v2024_v20 = vadd.f32 %v6422_v18, %v8561_v32  ;;  %v1938_v25 = vpop.f32.mrb[35].mxu0 }
 0x497   : > { %v2037_v26 = vadd.f32 %v2021_v15, %v8358_v10  ;;  %v2022_v27 = vadd.f32 %v8561_v32, %v1938_v25 }
 0x498   : > { %v2040_v28 = vadd.f32 %v2024_v20, %v8360_v39  ;;  %v2055_v35 = vmax.f32 %v2039_v19, 0.0 }
 0x499   : > { %v2038_v34 = vadd.f32 %v2022_v27, %v8362_v11  ;;  %v2053_v33 = vmax.f32 %v2037_v26, 0.0 }
 0x49a   : > { %v2056_v40 = vmax.f32 %v2040_v28, 0.0 }
 0x49b   : > { %v2054_v50 = vmax.f32 %v2038_v34, 0.0  ;;  %v6425_v51 = vpop.f32.mrb[36].mxu0 }
 0x49c   : > { %v2070_v4 = vpack.c.bf16 %v2056_v40, %v2055_v35  ;;  %v2027_v14 = vadd.f32 %v6425_v51, %v8561_v32  ;;  %v1951_v44 = vpop.f32.mrb[37].mxu0 }
 0x49d   : > { %v2069_v52 = vpack.c.bf16 %v2054_v50, %v2053_v33  ;;  %v2025_v54 = vadd.f32 %v8561_v32, %v1951_v44  ;;  %v6426_v56 = vpop.f32.mrb[38].mxu0 }
 0x49e   : > { %v2043_v10 = vadd.f32 %v2027_v14, %v8384_v22  ;;  %v2028_v57 = vadd.f32 %v6426_v56, %v8561_v32  ;;  %v1954_v39 = vpop.f32.mrb[39].mxu0 }
 0x49f   : > { %v2041_v11 = vadd.f32 %v2025_v54, %v8378_v21  ;;  %v2026_v58 = vadd.f32 %v8561_v32, %v1954_v39  ;;  %6441 = vmatprep.mubr.msk.bf16.mxu1 %vm1421_vm2, %v2069_v52 }
 0x4a0   : > { %v2044_v59 = vadd.f32 %v2028_v57, %v8380_v55  ;;  %6442 = vmatmul.mubr.msk.bf16.vlgmr.msra.gmra.mrb[48].mxu1 %vm1421_vm2, %v2070_v4  ;;  %v2059_v38 = vmax.f32 %v2043_v10, 0.0 }
 0x4a1   : > { %v2042_v61 = vadd.f32 %v2026_v58, %v8382_v60  ;;  %v2057_v12 = vmax.f32 %v2041_v11, 0.0 }
 0x4a2   : > { %v2060_v49 = vmax.f32 %v2044_v59, 0.0 }
 0x4a3   : > { %v2058_v62 = vmax.f32 %v2042_v61, 0.0  ;;  %v6429_v22 = vpop.f32.mrb[40].mxu0 }
 0x4a4   : > { %v2072_v63 = vpack.c.bf16 %v2060_v49, %v2059_v38  ;;  %v2031_v0 = vadd.f32 %v6429_v22, %v8561_v32  ;;  %v1967_v36 = vpop.f32.mrb[41].mxu0 }
 0x4a5   : > { %v2071_v21 = vpack.c.bf16 %v2058_v62, %v2057_v12  ;;  %v2029_v1 = vadd.f32 %v8561_v32, %v1967_v36  ;;  %v6430_v13 = vpop.f32.mrb[42].mxu0 }
 0x4a6   : > { %v2047_v23 = vadd.f32 %v2031_v0, %v8404_v30  ;;  %v2032_v55 = vadd.f32 %v6430_v13, %v8561_v32  ;;  %v1970_v2 = vpop.f32.mrb[43].mxu0 }
 0x4a7   : > { %v2045_v60 = vadd.f32 %v2029_v1, %v8398_v8  ;;  %v2030_v7 = vadd.f32 %v8561_v32, %v1970_v2  ;;  %6445 = vmatprep.mubr.msk.bf16.mxu1 %vm1421_vm2, %v2071_v21 }
 0x4a8   : > { %v2048_v16 = vadd.f32 %v2032_v55, %v8400_v17  ;;  %6446 = vmatmul.mubr.msk.bf16.gmra.mrb[52].mxu1 %vm1421_vm2, %v2072_v63  ;;  %v2063_v43 = vmax.f32 %v2047_v23, 0.0 }
 0x4a9   : > { %v2046_v3 = vadd.f32 %v2030_v7, %v8402_v29  ;;  %v2061_v5 = vmax.f32 %v2045_v60, 0.0 }
 0x4aa   : > { %v2064_v53 = vmax.f32 %v2048_v16, 0.0 }
 0x4ab   : > { %v2062_v24 = vmax.f32 %v2046_v3, 0.0  ;;  %v6433_v30 = vpop.f32.mrb[44].mxu0 }
 0x4ac   : > { %v2074_v6 = vpack.c.bf16 %v2064_v53, %v2063_v43  ;;  %v2035_v37 = vadd.f32 %v6433_v30, %v8561_v32  ;;  %v1983_v31 = vpop.f32.mrb[45].mxu0 }
 0x4ad   : > { %v2073_v8 = vpack.c.bf16 %v2062_v24, %v2061_v5  ;;  %v2033_v46 = vadd.f32 %v8561_v32, %v1983_v31  ;;  %v6434_v48 = vpop.f32.mrb[46].mxu0 }
 0x4ae   : > { %v2051_v9 = vadd.f32 %v2035_v37, %v8424_v45  ;;  %v2036_v17 = vadd.f32 %v6434_v48, %v8561_v32  ;;  %v1986_v15 = vpop.f32.mrb[47].mxu0 }
 0x4af   : > { %v2049_v29 = vadd.f32 %v2033_v46, %v8418_v47  ;;  %v2034_v18 = vadd.f32 %v8561_v32, %v1986_v15  ;;  %6449 = vmatprep.mubr.msk.bf16.mxu1 %vm1421_vm2, %v2073_v8  ;;  %v8606_v47 = vld [vmem:[%s10261_s9] ss:$0 sm:$0xff] }
 0x4b0   : > { %v2052_v19 = vadd.f32 %v2036_v17, %v8420_v41  ;;  %6450 = vmatmul.mubr.msk.bf16.gmra.mrb[56].mxu1 %vm1421_vm2, %v2074_v6  ;;  %v2067_v25 = vmax.f32 %v2051_v9, 0.0 }
 0x4b1   : > { %v2050_v20 = vadd.f32 %v2034_v18, %v8422_v42  ;;  %v2065_v27 = vmax.f32 %v2049_v29, 0.0 }
 0x4b2   : > { %v2068_v26 = vmax.f32 %v2052_v19, 0.0 }
 0x4b3   : > { %v2066_v28 = vmax.f32 %v2050_v20, 0.0 }
 0x4b4   : > { %v2076_v45 = vpack.c.bf16 %v2068_v26, %v2067_v25 }
 0x4b5   : > { %v2075_v34 = vpack.c.bf16 %v2066_v28, %v2065_v27 }
 0x4b7   : > { %6453 = vmatprep.mubr.msk.bf16.mxu1 %vm1421_vm2, %v2075_v34 }
 0x4b8   : > { %6454 = vmatmul.mubr.msk.bf16.gmra.mrb[60].mxu1 %vm1421_vm2, %v2076_v45 }
 0x573   : > { %v6443_v41 = vpop.f32.mrb[48].mxu1 }
 0x574   : > { %v8609_v32 = vadd.f32 %v6443_v41, %v8606_v47  ;;  %v2166_v42 = vpop.f32.mrb[49].mxu1 }
 0x575   : > { %v8612_v35 = vadd.f32 %v8606_v47, %v2166_v42  ;;  %v6444_v40 = vpop.f32.mrb[50].mxu1 }
 0x576   : > { %v2231_v33 = vsub.f32 0.0, %v8609_v32  ;;  %v8616_v50 = vadd.f32 %v6444_v40, %v8606_v47  ;;  %v2169_v51 = vpop.f32.mrb[51].mxu1 }
 0x577   : > { %v2229_v4 = vsub.f32 0.0, %v8612_v35  ;;  %v8620_v14 = vadd.f32 %v8606_v47, %v2169_v51 }
 0x578   : > { %v2249_v44 = vmul.f32 1.442695, %v2231_v33  ;;  %v2232_v52 = vsub.f32 0.0, %v8616_v50 }
 0x579   : > { %v2245_v54 = vmul.f32 1.442695, %v2229_v4  ;;  %v2230_v56 = vsub.f32 0.0, %v8620_v14 }
 0x57a   : > { %7920 = vpow2.f32 %v2249_v44  ;;  %v2251_v10 = vmul.f32 1.442695, %v2232_v52 }
 0x57b   : > { %7922 = vpow2.f32 %v2245_v54  ;;  %v2247_v57 = vmul.f32 1.442695, %v2230_v56  ;;  %v6447_v39 = vpop.f32.mrb[52].mxu1 }
 0x57c   : > { %7924 = vpow2.f32 %v2251_v10  ;;  %v8625_v11 = vadd.f32 %v6447_v39, %v8606_v47  ;;  %v2182_v58 = vpop.f32.mrb[53].mxu1 }
 0x57d   : > { %7926 = vpow2.f32 %v2247_v57  ;;  %v8628_v59 = vadd.f32 %v8606_v47, %v2182_v58  ;;  %v6448_v61 = vpop.f32.mrb[54].mxu1 }
 0x57e   : > { %v2235_v38 = vsub.f32 0.0, %v8625_v11  ;;  %v8632_v49 = vadd.f32 %v6448_v61, %v8606_v47  ;;  %v2185_v12 = vpop.f32.mrb[55].mxu1 }
 0x57f   : > { %v2233_v62 = vsub.f32 0.0, %v8628_v59  ;;  %v8636_v22 = vadd.f32 %v8606_v47, %v2185_v12 }
 0x580   : > { %v2257_v63 = vmul.f32 1.442695, %v2235_v38  ;;  %v2236_v0 = vsub.f32 0.0, %v8632_v49 }
 0x581   : > { %v2253_v36 = vmul.f32 1.442695, %v2233_v62  ;;  %v2234_v21 = vsub.f32 0.0, %v8636_v22 }
 0x582   : > { %7928 = vpow2.f32 %v2257_v63  ;;  %v2259_v1 = vmul.f32 1.442695, %v2236_v0 }
 0x583   : > { %7930 = vpow2.f32 %v2253_v36  ;;  %v2255_v13 = vmul.f32 1.442695, %v2234_v21  ;;  %v6451_v23 = vpop.f32.mrb[56].mxu1 }
 0x584   : > { %v7921_v55 = vpop.eup %7920  ;;  %7932 = vpow2.f32 %v2259_v1  ;;  %v8641_v2 = vadd.f32 %v6451_v23, %v8606_v47  ;;  %v2198_v60 = vpop.f32.mrb[57].mxu1 }
 0x585   : > { %v7923_v7 = vpop.eup %7922  ;;  %v2279_v16 = vadd.f32 1.0, %v7921_v55  ;;  %7934 = vpow2.f32 %v2255_v13  ;;  %v8644_v3 = vadd.f32 %v8606_v47, %v2198_v60  ;;  %v6452_v43 = vpop.f32.mrb[58].mxu1 }
 0x586   : > { %v7925_v53 = vpop.eup %7924  ;;  %v2277_v5 = vadd.f32 1.0, %v7923_v7  ;;  %v2239_v24 = vsub.f32 0.0, %v8641_v2  ;;  %v8648_v30 = vadd.f32 %v6452_v43, %v8606_v47  ;;  %v2201_v6 = vpop.f32.mrb[59].mxu1 }
 0x587   : > { %v7927_v37 = vpop.eup %7926  ;;  %7936 = vrcp.f32 %v2279_v16  ;;  %v2280_v31 = vadd.f32 1.0, %v7925_v53  ;;  %v2237_v8 = vsub.f32 0.0, %v8644_v3  ;;  %v8652_v46 = vadd.f32 %v8606_v47, %v2201_v6 }
 0x588   : > { %7938 = vrcp.f32 %v2277_v5  ;;  %v2278_v48 = vadd.f32 1.0, %v7927_v37  ;;  %v2265_v9 = vmul.f32 1.442695, %v2239_v24  ;;  %v2240_v17 = vsub.f32 0.0, %v8648_v30 }
 0x589   : > { %7940 = vrcp.f32 %v2280_v31  ;;  %v2261_v15 = vmul.f32 1.442695, %v2237_v8  ;;  %v2238_v29 = vsub.f32 0.0, %v8652_v46 }
 0x58a   : > { %7942 = vrcp.f32 %v2278_v48  ;;  %v2267_v18 = vmul.f32 1.442695, %v2240_v17 }
 0x58b   : > { %7944 = vpow2.f32 %v2265_v9  ;;  %v2263_v19 = vmul.f32 1.442695, %v2238_v29  ;;  %v6455_v20 = vpop.f32.mrb[60].mxu1 }
 0x58c   : > { %v7929_v25 = vpop.eup %7928  ;;  %7946 = vpow2.f32 %v2261_v15  ;;  %v8657_v26 = vadd.f32 %v6455_v20, %v8606_v47  ;;  %v2214_v27 = vpop.f32.mrb[61].mxu1 }
 0x58d   : > { %v7931_v28 = vpop.eup %7930  ;;  %v2283_v45 = vadd.f32 1.0, %v7929_v25  ;;  %7948 = vpow2.f32 %v2267_v18  ;;  %v8660_v34 = vadd.f32 %v8606_v47, %v2214_v27  ;;  %v6456_v41 = vpop.f32.mrb[62].mxu1 }
 0x58e   : > { %v7933_v42 = vpop.eup %7932  ;;  %v2281_v40 = vadd.f32 1.0, %v7931_v28  ;;  %7950 = vpow2.f32 %v2263_v19  ;;  %v2243_v33 = vsub.f32 0.0, %v8657_v26  ;;  %v8664_v51 = vadd.f32 %v6456_v41, %v8606_v47  ;;  %v2217_v4 = vpop.f32.mrb[63].mxu1 }
 0x58f   : > { %v7935_v44 = vpop.eup %7934  ;;  %7952 = vrcp.f32 %v2283_v45  ;;  %v2284_v52 = vadd.f32 1.0, %v7933_v42  ;;  %v2241_v54 = vsub.f32 0.0, %v8660_v34  ;;  %v8668_v56 = vadd.f32 %v8606_v47, %v2217_v4 }
 0x590   : > { %7954 = vrcp.f32 %v2281_v40  ;;  %v2282_v10 = vadd.f32 1.0, %v7935_v44  ;;  %v2273_v57 = vmul.f32 1.442695, %v2243_v33  ;;  %v2244_v39 = vsub.f32 0.0, %v8664_v51 }
 0x591   : > { %v7937_v58 = vpop.eup %7936  ;;  %7956 = vrcp.f32 %v2284_v52  ;;  %v2269_v61 = vmul.f32 1.442695, %v2241_v54  ;;  %v2242_v38 = vsub.f32 0.0, %v8668_v56 }
 0x592   : > { %v7939_v12 = vpop.eup %7938  ;;  %7958 = vrcp.f32 %v2282_v10  ;;  %v2275_v62 = vmul.f32 1.442695, %v2244_v39 }
 0x593   : > { %v7941_v63 = vpop.eup %7940  ;;  %7960 = vpow2.f32 %v2273_v57  ;;  %v2271_v0 = vmul.f32 1.442695, %v2242_v38  ;;  %2325 = vrot.lane.b32.xlu0 %v7939_v12, %s8026_s29 }
 0x594   : > { %v7943_v47 = vpop.eup %7942  ;;  %7962 = vpow2.f32 %v2269_v61 }
 0x595   : > { %v7945_v36 = vpop.eup %7944  ;;  %7964 = vpow2.f32 %v2275_v62  ;;  %2327 = vrot.lane.b32.xlu1 %v7943_v47, %s8026_s29 }
 0x596   : > { %v7947_v21 = vpop.eup %7946  ;;  %7966 = vpow2.f32 %v2271_v0  ;;  %v2287_v60 = vadd.f32 1.0, %v7945_v36 }
 0x597   : > { %v7949_v1 = vpop.eup %7948  ;;  %v2285_v13 = vadd.f32 1.0, %v7947_v21  ;;  %2329 = vrot.lane.b32.xlu0 %v7937_v58, %s8026_s29  ;;  %v2486_v21 = vld [vmem:[%s10264_s12] sm:$0xff] }
 0x598   : > { %v7951_v23 = vpop.eup %7950  ;;  %v2288_v53 = vadd.f32 1.0, %v7949_v1 }
 0x599   : > { %v7953_v55 = vpop.eup %7952  ;;  %7968 = vrcp.f32 %v2285_v13  ;;  %v2286_v7 = vadd.f32 1.0, %v7951_v23  ;;  %2331 = vrot.lane.b32.xlu1 %v7941_v63, %s8026_s29  ;;  %v8747_v13 = vand.u32 4294901760, %v2486_v21 }
 0x59a   : > { %v7955_v16 = vpop.eup %7954 }
 0x59b   : > { %v7957_v43 = vpop.eup %7956  ;;  %7970 = vrcp.f32 %v2286_v7  ;;  %2333 = vrot.lane.b32.xlu0 %v7955_v16, %s8026_s29 }
 0x59c   : > { %v7959_v5 = vpop.eup %7958  ;;  %7972 = vrcp.f32 %v2287_v60 }
 0x59d   : > { %v7961_v24 = vpop.eup %7960  ;;  %2335 = vrot.lane.b32.xlu1 %v7959_v5, %s8026_s29  ;;  %7974 = vrcp.f32 %v2288_v53 }
 0x59e   : > { %v7963_v6 = vpop.eup %7962  ;;  %v2291_v48 = vadd.f32 1.0, %v7961_v24 }
 0x59f   : > { %v7965_v37 = vpop.eup %7964  ;;  %v2289_v31 = vadd.f32 1.0, %v7963_v6  ;;  %2337 = vrot.lane.b32.xlu0 %v7953_v55, %s8026_s29  ;;  %v8756_v55 = vsub.f32 %v2486_v21, %v8747_v13 }
 0x5a0   : > { %v7967_v8 = vpop.eup %7966  ;;  %v2292_v15 = vadd.f32 1.0, %v7965_v37 }
 0x5a1   : > { %7976 = vrcp.f32 %v2289_v31  ;;  %v2290_v9 = vadd.f32 1.0, %v7967_v8  ;;  %2339 = vrot.lane.b32.xlu1 %v7957_v43, %s8026_s29 }
 0x5a3   : > { %v7969_v17 = vpop.eup %7968  ;;  %7978 = vrcp.f32 %v2290_v9 }
 0x5a4   : > { %2341 = vrot.lane.b32.xlu0 %v7969_v17, %s8026_s29  ;;  %7980 = vrcp.f32 %v2291_v48 }
 0x5a5   : > { %v7971_v29 = vpop.eup %7970  ;;  %7982 = vrcp.f32 %v2292_v15 }
 0x5a6   : > { %2343 = vrot.lane.b32.xlu1 %v7971_v29, %s8026_s29  ;;  %v7973_v18 = vpop.eup %7972 }
 0x5a7   : > { %v7975_v19 = vpop.eup %7974 }
 0x5a8   : > { %2345 = vrot.lane.b32.xlu0 %v7973_v18, %s8026_s29 }
 0x5aa   : > { %2347 = vrot.lane.b32.xlu1 %v7975_v19, %s8026_s29  ;;  %v2487_v19 = vld [vmem:[%s10264_s12 + $0x8] sm:$0xff] }
 0x5ab   : > { %v7977_v20 = vpop.eup %7976 }
 0x5ac   : > { %2349 = vrot.lane.b32.xlu0 %v7977_v20, %s8026_s29 }
 0x5ad   : > { %v7979_v25 = vpop.eup %7978 }
 0x5ae   : > { %2351 = vrot.lane.b32.xlu1 %v7979_v25, %s8026_s29  ;;  %v7981_v27 = vpop.eup %7980 }
 0x5af   : > { %v7983_v28 = vpop.eup %7982 }
 0x5b0   : > { %2353 = vrot.lane.b32.xlu0 %v7981_v27, %s8026_s29 }
 0x5b2   : > { %2355 = vrot.lane.b32.xlu1 %v7983_v28, %s8026_s29 }
 0x605   : > { %v2326_v45 = vpop.permute.xlu0 %2325 }
 0x606   : > { %v8689_v41 = vmul.f32 %v2326_v45, %v8612_v35 }
 0x607   : > { %v2328_v42 = vpop.permute.xlu1 %2327 }
 0x608   : > { %10380 = vst [vmem:[#allocation2_spill] sm:$0xff] %v8689_v41  ;;  %v8692_v40 = vmul.f32 %v2328_v42, %v8620_v14  ;;  %v2389_v33 = vmul.f32 %v8689_v41, %v8689_v41 }
 0x609   : > { %v2330_v4 = vpop.permute.xlu0 %2329 }
 0x60a   : > { %10381 = vst [vmem:[#allocation3_spill] sm:$0xff] %v8692_v40  ;;  %v8697_v44 = vmul.f32 %v2330_v4, %v8609_v32  ;;  %2421 = vrot.lane.b32.xlu0 %v2389_v33, %s8026_s29  ;;  %v2390_v52 = vmul.f32 %v8692_v40, %v8692_v40  ;;  %v8811_v4 = vand.u32 4294901760, %v2487_v19 }
 0x60b   : > { %v2332_v54 = vpop.permute.xlu1 %2331 }
 0x60c   : > { %10382 = vst [vmem:[#allocation4_spill] sm:$0xff] %v8697_v44  ;;  %v8703_v35 = vmul.f32 %v2332_v54, %v8616_v50  ;;  %2423 = vrot.lane.b32.xlu1 %v2390_v52, %s8026_s29  ;;  %v2391_v14 = vmul.f32 %v8697_v44, %v8697_v44 }
 0x60d   : > { %v2334_v10 = vpop.permute.xlu0 %2333 }
 0x60e   : > { %10383 = vst [vmem:[#allocation5_spill] sm:$0xff] %v8703_v35  ;;  %v8709_v57 = vmul.f32 %v2334_v10, %v8628_v59  ;;  %2425 = vrot.lane.b32.xlu0 %v2391_v14, %s8026_s29  ;;  %v2392_v32 = vmul.f32 %v8703_v35, %v8703_v35 }
 0x60f   : > { %v2336_v39 = vpop.permute.xlu1 %2335 }
 0x610   : > { %10384 = vst [vmem:[#allocation6_spill] sm:$0xff] %v8709_v57  ;;  %v8715_v58 = vmul.f32 %v2336_v39, %v8636_v22  ;;  %2427 = vrot.lane.b32.xlu1 %v2392_v32, %s8026_s29  ;;  %v2393_v50 = vmul.f32 %v8709_v57, %v8709_v57 }
 0x611   : > { %v2338_v61 = vpop.permute.xlu0 %2337 }
 0x612   : > { %10385 = vst [vmem:[#allocation7_spill] sm:$0xff] %v8715_v58  ;;  %v8721_v38 = vmul.f32 %v2338_v61, %v8625_v11  ;;  %2429 = vrot.lane.b32.xlu0 %v2393_v50, %s8026_s29  ;;  %v2394_v59 = vmul.f32 %v8715_v58, %v8715_v58 }
 0x613   : > { %v2340_v12 = vpop.permute.xlu1 %2339 }
 0x614   : > { %10386 = vst [vmem:[#allocation8_spill] sm:$0xff] %v8721_v38  ;;  %v8727_v62 = vmul.f32 %v2340_v12, %v8632_v49  ;;  %2431 = vrot.lane.b32.xlu1 %v2394_v59, %s8026_s29  ;;  %v2395_v22 = vmul.f32 %v8721_v38, %v8721_v38 }
 0x616   : > { %10387 = vst [vmem:[#allocation9_spill] sm:$0xff] %v8727_v62  ;;  %v2342_v63 = vpop.permute.xlu0 %2341  ;;  %2433 = vrot.lane.b32.xlu0 %v2395_v22, %s8026_s29  ;;  %v2396_v11 = vmul.f32 %v8727_v62, %v8727_v62  ;;  %v8826_v22 = vsub.f32 %v2487_v19, %v8811_v4 }
 0x617   : > { %v8736_v0 = vmul.f32 %v2342_v63, %v8644_v3 }
 0x618   : > { %v2344_v47 = vpop.permute.xlu1 %2343  ;;  %2435 = vrot.lane.b32.xlu1 %v2396_v11, %s8026_s29 }
 0x619   : > { %10388 = vst [vmem:[#allocation10_spill] sm:$0xff] %v8736_v0  ;;  %v8740_v49 = vmul.f32 %v2344_v47, %v8652_v46  ;;  %v2397_v36 = vmul.f32 %v8736_v0, %v8736_v0 }
 0x61a   : > { %v2346_v1 = vpop.permute.xlu0 %2345 }
 0x61b   : > { %10389 = vst [vmem:[#allocation11_spill] sm:$0xff] %v8740_v49  ;;  %v8750_v23 = vmul.f32 %v2346_v1, %v8641_v2  ;;  %2437 = vrot.lane.b32.xlu0 %v2397_v36, %s8026_s29  ;;  %v2398_v3 = vmul.f32 %v8740_v49, %v8740_v49  ;;  %v10270_v2 = vand.u32 4294901760, %v8756_v55  ;;  %v2488_v36 = vld [vmem:[%s10264_s12 + $0x10] sm:$0xff] }
 0x61c   : > { %v2348_v46 = vpop.permute.xlu1 %2347 }
 0x61d   : > { %10390 = vst [vmem:[#allocation12_spill] sm:$0xff] %v8750_v23  ;;  %v8759_v60 = vmul.f32 %v2348_v46, %v8648_v30  ;;  %2439 = vrot.lane.b32.xlu1 %v2398_v3, %s8026_s29  ;;  %v2399_v7 = vmul.f32 %v8750_v23, %v8750_v23  ;;  %v2586_v30 = vsub.f32 %v8756_v55, %v10270_v2 }
 0x61e   : > { %v2350_v16 = vpop.permute.xlu0 %2349 }
 0x61f   : > { %10391 = vst [vmem:[#allocation13_spill] sm:$0xff] %v8759_v60  ;;  %v8766_v43 = vmul.f32 %v2350_v16, %v8660_v34  ;;  %2441 = vrot.lane.b32.xlu0 %v2399_v7, %s8026_s29  ;;  %v2400_v53 = vmul.f32 %v8759_v60, %v8759_v60  ;;  %v2587_v37 = vand.u32 4294901760, %v2586_v30  ;;  %v2489_v16 = vld [vmem:[%s10264_s12 + $0x18] sm:$0xff] }
 0x620   : > { %v2352_v5 = vpop.permute.xlu1 %2351 }
 0x621   : > { %10392 = vst [vmem:[#allocation14_spill] sm:$0xff] %v8766_v43  ;;  %v8775_v24 = vmul.f32 %v2352_v5, %v8668_v56  ;;  %2443 = vrot.lane.b32.xlu1 %v2400_v53, %s8026_s29  ;;  %v2401_v6 = vmul.f32 %v8766_v43, %v8766_v43  ;;  %6489 = vmatprep.mubr.f32.mxu1 %v2587_v37 }
 0x622   : > { %v2354_v34 = vpop.permute.xlu0 %2353 }
 0x623   : > { %10393 = vst [vmem:[#allocation15_spill] sm:$0xff] %v8775_v24  ;;  %v8781_v31 = vmul.f32 %v2354_v34, %v8657_v26  ;;  %2445 = vrot.lane.b32.xlu0 %v2401_v6, %s8026_s29  ;;  %v2402_v8 = vmul.f32 %v8775_v24, %v8775_v24  ;;  %v8853_v34 = vand.u32 4294901760, %v2488_v36 }
 0x624   : > { %v2356_v48 = vpop.permute.xlu1 %2355 }
 0x625   : > { %10394 = vst [vmem:[#allocation16_spill] sm:$0xff] %v8781_v31  ;;  %v8787_v56 = vmul.f32 %v2356_v48, %v8664_v51  ;;  %2447 = vrot.lane.b32.xlu1 %v2402_v8, %s8026_s29  ;;  %v2403_v9 = vmul.f32 %v8781_v31, %v8781_v31 }
 0x627   : > { %10395 = vst [vmem:[#allocation17_spill] sm:$0xff] %v8787_v56  ;;  %2449 = vrot.lane.b32.xlu0 %v2403_v9, %s8026_s29  ;;  %v2404_v26 = vmul.f32 %v8787_v56, %v8787_v56  ;;  %v10269_v9 = vand.u32 4294901760, %v8826_v22 }
 0x629   : > { %2451 = vrot.lane.b32.xlu1 %v2404_v26, %s8026_s29 }
 0x67c   : > { %v2422_v17 = vpop.permute.xlu0 %2421 }
 0x67d   : > { %v2470_v15 = vsel %vm2469_vm3, %v8689_v41, %v2422_v17 }
 0x67e   : > { %v2503_v29 = vand.u32 4294901760, %v2470_v15  ;;  %v2424_v51 = vpop.permute.xlu1 %2423 }
 0x67f   : > { %v2471_v18 = vsel %vm2469_vm3, %v8692_v40, %v2424_v51 }
 0x680   : > { %v2506_v20 = vand.u32 4294901760, %v2471_v18  ;;  %v2426_v25 = vpop.permute.xlu0 %2425  ;;  %v8803_v27 = vsub.f32 %v2470_v15, %v2503_v29  ;;  %v8864_v15 = vand.u32 4294901760, %v2489_v16 }
 0x681   : > { %v2472_v28 = vsel %vm2469_vm3, %v8697_v44, %v2426_v25 }
 0x682   : > { %v8807_v45 = vpack.c.bf16 %v2506_v20, %v2503_v29  ;;  %v8809_v42 = vsub.f32 %v2471_v18, %v2506_v20  ;;  %v2428_v33 = vpop.permute.xlu1 %2427  ;;  %v2509_v52 = vand.u32 4294901760, %v2472_v28  ;;  %v10277_v39 = vand.u32 4294901760, %v8803_v27 }
 0x683   : > { %v2473_v54 = vsel %vm2469_vm3, %v8703_v35, %v2428_v33  ;;  %v2490_v33 = vld [vmem:[%s10264_s12 + $0x20] sm:$0xff] }
 0x684   : > { %v10278_v14 = vand.u32 4294901760, %v8809_v42  ;;  %v2512_v10 = vand.u32 4294901760, %v2473_v54  ;;  %7154 = vmatprep.subr.bf16.mxu1 %v8807_v45  ;;  %v2430_v32 = vpop.permute.xlu0 %2429  ;;  %v8828_v63 = vsub.f32 %v2472_v28, %v2509_v52  ;;  %v8881_v28 = vsub.f32 %v2488_v36, %v8853_v34 }
 0x685   : > { %v2474_v50 = vsel %vm2469_vm3, %v8709_v57, %v2430_v32  ;;  %7156 = vmatpush3.bf16.msra.mxu1 %v8807_v45  ;;  %v8901_v36 = vsub.f32 %v2489_v16, %v8864_v15 }
 0x686   : > { %v8821_v61 = vpack.c.bf16 %v2512_v10, %v2509_v52  ;;  %v8823_v59 = vsub.f32 %v2473_v54, %v2512_v10  ;;  %v2432_v12 = vpop.permute.xlu1 %2431  ;;  %v2515_v11 = vand.u32 4294901760, %v2474_v50  ;;  %v8839_v21 = vpack.c.bf16 %v10278_v14, %v10277_v39  ;;  %v2491_v52 = vld [vmem:[%s10264_s12 + $0x28] sm:$0xff] }
 0x687   : > { %v2475_v47 = vsel %vm2469_vm3, %v8715_v58, %v2432_v12  ;;  %v10273_v37 = vand.u32 4294901760, %v8828_v63  ;;  %v10419_v41 = vand.u32 4294901760, %v8828_v63 }
 0x688   : > { %10396 = vst [vmem:[#allocation18_spill] sm:$0xff] %v8839_v21  ;;  %v2518_v1 = vand.u32 4294901760, %v2475_v47  ;;  %7158 = vmatprep.subr.bf16.mxu1 %v8821_v61  ;;  %v2434_v3 = vpop.permute.xlu0 %2433  ;;  %v10274_v46 = vand.u32 4294901760, %v8823_v59  ;;  %v8856_v8 = vsub.f32 %v2474_v50, %v2515_v11  ;;  %v8893_v50 = vsub.f32 %v8826_v22, %v10269_v9 }
 0x689   : > { %v2476_v7 = vsel %vm2469_vm3, %v8721_v38, %v2434_v3  ;;  %7160 = vmatpush3.bf16.msra.mxu1 %v8821_v61  ;;  %v10414_v58 = vand.u32 4294901760, %v8823_v59  ;;  %v2761_v40 = vsub.f32 %v8828_v63, %v10419_v41 }
 0x68a   : > { %v8849_v53 = vpack.c.bf16 %v2518_v1, %v2515_v11  ;;  %v8851_v5 = vsub.f32 %v2475_v47, %v2518_v1  ;;  %v2521_v30 = vand.u32 4294901760, %v2476_v7  ;;  %v2436_v6 = vpop.permute.xlu1 %2435  ;;  %v8872_v18 = vpack.c.bf16 %v10274_v46, %v10273_v37 }
 0x68b   : > { %v2477_v48 = vsel %vm2469_vm3, %v8727_v62, %v2436_v6  ;;  %v10271_v54 = vand.u32 4294901760, %v8856_v8  ;;  %v2768_v44 = vsub.f32 %v8823_v59, %v10414_v58  ;;  %v2762_v41 = vand.u32 4294901760, %v2761_v40 }
 0x68c   : > { %10397 = vst [vmem:[#allocation19_spill] sm:$0xff] %v8849_v53  ;;  %v8861_v26 = vsub.f32 %v2476_v7, %v2521_v30  ;;  %v2524_v17 = vand.u32 4294901760, %v2477_v48  ;;  %7162 = vmatprep.subr.bf16.mxu1 %v8849_v53  ;;  %v10272_v29 = vand.u32 4294901760, %v8851_v5  ;;  %10398 = vst [vmem:[#allocation20_spill] sm:$0xff] %v8872_v18  ;;  %v8904_v7 = vand.u32 4294901760, %v2490_v33 }
 0x68d   : > { %v2438_v51 = vpop.permute.xlu0 %2437  ;;  %7164 = vmatpush3.bf16.msra.mxu1 %v8849_v53 }
 0x68e   : > { %v8874_v19 = vpack.c.bf16 %v2524_v17, %v2521_v30  ;;  %v8876_v20 = vsub.f32 %v2477_v48, %v2524_v17  ;;  %v2478_v25 = vsel %vm2469_vm3, %v8736_v0, %v2438_v51  ;;  %v10275_v12 = vand.u32 4294901760, %v8861_v26 }
 0x68f   : > { %v2527_v10 = vand.u32 4294901760, %v2478_v25  ;;  %v2440_v32 = vpop.permute.xlu1 %2439  ;;  %v8906_v30 = vand.u32 4294901760, %v2491_v52  ;;  %v8912_v6 = vpack.c.bf16 %v10272_v29, %v10271_v54  ;;  %v10280_v17 = vand.u32 4294901760, %v8881_v28 }
 0x690   : > { %10399 = vst [vmem:[#allocation21_spill] sm:$0xff] %v8874_v19  ;;  %v10276_v11 = vand.u32 4294901760, %v8876_v20  ;;  %v2479_v47 = vsel %vm2469_vm3, %v8740_v49, %v2440_v32  ;;  %7166 = vmatprep.subr.bf16.mxu1 %v8874_v19 }
 0x691   : > { %v2530_v1 = vand.u32 4294901760, %v2479_v47  ;;  %v2442_v3 = vpop.permute.xlu0 %2441  ;;  %7168 = vmatpush3.bf16.msra.mxu1 %v8874_v19  ;;  %10400 = vst [vmem:[#allocation22_spill] sm:$0xff] %v8912_v6  ;;  %v8914_v48 = vsub.f32 %v2478_v25, %v2527_v10  ;;  %v8951_v39 = vsub.f32 %v8881_v28, %v10280_v17  ;;  %v2493_v17 = vld [vmem:[%s10264_s12 + $0x38] sm:$0xff]  ;;  %v10433_v19 = vand.u32 4294901760, %v8876_v20 }
 0x692   : > { %v2480_v16 = vsel %vm2469_vm3, %v8750_v23, %v2442_v3  ;;  %v8923_v51 = vpack.c.bf16 %v10276_v11, %v10275_v12  ;;  %v2492_v3 = vld [vmem:[%s10264_s12 + $0x30] sm:$0xff]  ;;  %v10406_v11 = vand.u32 4294901760, %v8809_v42 }
 0x693   : > { %v8925_v32 = vpack.c.bf16 %v2530_v1, %v2527_v10  ;;  %v8927_v9 = vsub.f32 %v2479_v47, %v2530_v1  ;;  %v2444_v2 = vpop.permute.xlu1 %2443  ;;  %v2533_v54 = vand.u32 4294901760, %v2480_v16  ;;  %v8938_v47 = vsub.f32 %v2490_v33, %v8904_v7 }
 0x694   : > { %10401 = vst [vmem:[#allocation23_spill] sm:$0xff] %v8923_v51  ;;  %v2481_v25 = vsel %vm2469_vm3, %v8759_v60, %v2444_v2  ;;  %v8941_v1 = vsub.f32 %v2491_v52, %v8906_v30  ;;  %v8957_v14 = vand.u32 4294901760, %v2492_v3 }
 0x695   : > { %10402 = vst [vmem:[#allocation24_spill] sm:$0xff] %v8925_v32  ;;  %v2536_v46 = vand.u32 4294901760, %v2481_v25  ;;  %7170 = vmatprep.subr.bf16.mxu1 %v8925_v32  ;;  %v2446_v10 = vpop.permute.xlu0 %2445  ;;  %10403 = vst [vmem:[#allocation25_spill] sm:$0xff] %v8938_v47  ;;  %v8959_v2 = vsub.f32 %v2480_v16, %v2533_v54 }
 0x696   : > { %10404 = vst [vmem:[#allocation26_spill] sm:$0xff] %v8941_v1  ;;  %v2482_v12 = vsel %vm2469_vm3, %v8766_v43, %v2446_v10  ;;  %7172 = vmatpush3.bf16.msra.mxu1 %v8925_v32  ;;  %v2754_v43 = vsub.f32 %v8809_v42, %v10406_v11  ;;  %v10428_v6 = vand.u32 4294901760, %v8941_v1 }
 0x697   : > { %v8953_v29 = vpack.c.bf16 %v2536_v46, %v2533_v54  ;;  %v8955_v33 = vsub.f32 %v2481_v25, %v2536_v46  ;;  %v2539_v52 = vand.u32 4294901760, %v2482_v12  ;;  %v2448_v37 = vpop.permute.xlu1 %2447  ;;  %v10407_v46 = vand.u32 4294901760, %v8914_v48 }
 0x698   : > { %v2483_v10 = vsel %vm2469_vm3, %v8775_v24, %v2448_v37  ;;  %v10408_v25 = vand.u32 4294901760, %v8927_v9  ;;  %v10410_v37 = vand.u32 4294901760, %v8901_v36  ;;  %v8996_v24 = vand.u32 4294901760, %v2493_v17 }
 0x699   : > { %10405 = vst [vmem:[#allocation27_spill] sm:$0xff] %v8953_v29  ;;  %v2542_v60 = vand.u32 4294901760, %v2483_v10  ;;  %7174 = vmatprep.subr.bf16.mxu1 %v8953_v29  ;;  %v2450_v54 = vpop.permute.xlu0 %2449  ;;  %v8984_v49 = vsub.f32 %v2482_v12, %v2539_v52  ;;  %v2494_v12 = vld [vmem:[%s10264_s12 + $0x40] sm:$0xff]  ;;  %v2636_v18 = vsub.f32 %v8941_v1, %v10428_v6  ;;  %v10432_v6 = vand.u32 4294901760, %v8893_v50 }
 0x69a   : > { %v8973_v23 = vpack.c.bf16 %v10408_v25, %v10407_v46  ;;  %v8979_v16 = vsub.f32 %v8901_v36, %v10410_v37  ;;  %v2484_v46 = vsel %vm2469_vm3, %v8781_v31, %v2450_v54  ;;  %7176 = vmatpush3.bf16.msra.mxu1 %v8953_v29  ;;  %v10411_v25 = vand.u32 4294901760, %v8803_v27  ;;  %v2495_v54 = vld [vmem:[%s10264_s12 + $0x48] sm:$0xff] }
 0x69b   : > { %v8992_v62 = vpack.c.bf16 %v2542_v60, %v2539_v52  ;;  %v8994_v37 = vsub.f32 %v2483_v10, %v2542_v60  ;;  %v2545_v11 = vand.u32 4294901760, %v2484_v46  ;;  %v2452_v57 = vpop.permute.xlu1 %2451  ;;  %v2755_v31 = vand.u32 4294901760, %v2754_v43 }
 0x69c   : > { %10409 = vst [vmem:[#allocation28_spill] sm:$0xff] %v8973_v23  ;;  %v2747_v38 = vsub.f32 %v8803_v27, %v10411_v25  ;;  %v2485_v0 = vsel %vm2469_vm3, %v8787_v56, %v2452_v57  ;;  %v9005_v25 = vsub.f32 %v2492_v3, %v8957_v14  ;;  %v9019_v3 = vand.u32 4294901760, %v2494_v12 }
 0x69d   : > { %10412 = vst [vmem:[#allocation29_spill] sm:$0xff] %v8992_v62  ;;  %v9008_v52 = vsub.f32 %v2484_v46, %v2545_v11  ;;  %v2548_v10 = vand.u32 4294901760, %v2485_v0  ;;  %7178 = vmatprep.subr.bf16.mxu1 %v8992_v62  ;;  %v10415_v46 = vand.u32 4294901760, %v8959_v2  ;;  %v10416_v60 = vand.u32 4294901760, %v8955_v33 }
 0x69e   : > { %10413 = vst [vmem:[#allocation30_spill] sm:$0xff] %v9005_v25  ;;  %7180 = vmatpush3.bf16.msra.mxu1 %v8992_v62  ;;  %v2748_v43 = vand.u32 4294901760, %v2747_v38  ;;  %v9035_v57 = vsub.f32 %v2493_v17, %v8996_v24  ;;  %v2496_v38 = vld [vmem:[%s10264_s12 + $0x50] sm:$0xff]  ;;  %v9064_v17 = vsub.f32 %v2494_v12, %v9019_v3  ;;  %v2617_v40 = vand.u32 4294901760, %v8979_v16 }
 0x69f   : > { %v9025_v56 = vpack.c.bf16 %v10416_v60, %v10415_v46  ;;  %v9027_v35 = vpack.c.bf16 %v2548_v10, %v2545_v11  ;;  %v9029_v58 = vsub.f32 %v2485_v0, %v2548_v10  ;;  %v9041_v60 = vand.u32 4294901760, %v2495_v54 }
 0x6a0   : > { %10420 = vst [vmem:[#allocation33_spill] sm:$0xff] %v9035_v57  ;;  %v7185_v23 = vpack.c.bf16 %v2755_v31, %v2748_v43  ;;  %v10421_v11 = vand.u32 4294901760, %v8984_v49  ;;  %v10422_v0 = vand.u32 4294901760, %v8994_v37  ;;  %v2769_v46 = vand.u32 4294901760, %v2768_v44  ;;  %v2497_v43 = vld [vmem:[%s10264_s12 + $0x58] sm:$0xff]  ;;  %10426 = vst [vmem:[#allocation35_spill] sm:$0xff] %v9064_v17 }
 0x6a1   : > { %10417 = vst [vmem:[#allocation31_spill] sm:$0xff] %v9025_v56  ;;  %10418 = vst [vmem:[#allocation32_spill] sm:$0xff] %v9027_v35  ;;  %7182 = vmatprep.subr.bf16.mxu1 %v9027_v35  ;;  %v10424_v56 = vand.u32 4294901760, %v8851_v5  ;;  %v9066_v44 = vand.u32 4294901760, %v2496_v38  ;;  %v10430_v12 = vand.u32 4294901760, %v9029_v58  ;;  %v9088_v62 = vand.u32 4294901760, %v2497_v43 }
 0x6a2   : > { %v9047_v10 = vpack.c.bf16 %v10422_v0, %v10421_v11  ;;  %7184 = vmatpush3.bf16.msra.mxu1 %v9027_v35  ;;  %v2607_v11 = vand.u32 4294901760, %v8951_v39  ;;  %v10425_v0 = vand.u32 4294901760, %v8938_v47  ;;  %v2498_v39 = vld [vmem:[%s10264_s12 + $0x60] sm:$0xff]  ;;  %v10320_v35 = vand.u32 4294901760, %v9035_v57 }
 0x6a3   : > { %v2782_v31 = vsub.f32 %v8851_v5, %v10424_v56  ;;  %7186 = vmatprep.subr.bf16.mxu1 %v7185_v23  ;;  %v10427_v56 = vand.u32 4294901760, %v8856_v8  ;;  %v7189_v29 = vpack.c.bf16 %v2769_v46, %v2762_v41  ;;  %v2796_v1 = vsub.f32 %v8876_v20, %v10433_v19 }
 0x6a4   : > { %10423 = vst [vmem:[#allocation34_spill] sm:$0xff] %v9047_v10  ;;  %v2626_v51 = vsub.f32 %v8938_v47, %v10425_v0  ;;  %v10429_v0 = vand.u32 4294901760, %v9008_v52  ;;  %v9103_v41 = vsub.f32 %v2496_v38, %v9066_v44  ;;  %v9105_v46 = vand.u32 4294901760, %v2498_v39 }
 0x6a5   : > { %v2775_v10 = vsub.f32 %v8856_v8, %v10427_v56  ;;  %v9086_v56 = vsub.f32 %v2495_v54, %v9041_v60  ;;  %6490 = vmatmul.mubr.f32.vlgmr.msra.gmra.mrb[64].mxu1 %v10432_v6  ;;  %v2783_v32 = vand.u32 4294901760, %v2782_v31  ;;  %v2499_v54 = vld [vmem:[%s10264_s12 + $0x68] sm:$0xff]  ;;  %v2637_v31 = vand.u32 4294901760, %v2636_v18 }
 0x6a6   : > { %v9081_v21 = vpack.c.bf16 %v10430_v12, %v10429_v0  ;;  %v10434_v0 = vand.u32 4294901760, %v9005_v25  ;;  %7188 = vmatpush3.bf16.msra.mxu1 %v7185_v23  ;;  %6492 = vmatprep.mubr.f32.mxu1 %v2607_v11  ;;  %v2627_v12 = vand.u32 4294901760, %v2626_v51  ;;  %10435 = vst [vmem:[#allocation37_spill] sm:$0xff] %v9103_v41  ;;  %v10436_v6 = vand.u32 4294901760, %v8861_v26  ;;  %v2500_v23 = vld [vmem:[%s10264_s12 + $0x70] sm:$0xff] }
 0x6a7   : > { %7190 = vmatprep.subr.bf16.mxu1 %v7189_v29  ;;  %v2776_v19 = vand.u32 4294901760, %v2775_v10  ;;  %v2656_v51 = vsub.f32 %v9035_v57, %v10320_v35  ;;  %v9118_v11 = vsub.f32 %v2497_v43, %v9088_v62  ;;  %v9120_v50 = vand.u32 4294901760, %v2499_v54 }
 0x6a8   : > { %10431 = vst [vmem:[#allocation36_spill] sm:$0xff] %v9081_v21  ;;  %v2646_v16 = vsub.f32 %v9005_v25, %v10434_v0  ;;  %v2789_v0 = vsub.f32 %v8861_v26, %v10436_v6  ;;  %v2797_v10 = vand.u32 4294901760, %v2796_v1  ;;  %v10437_v6 = vand.u32 4294901760, %v8927_v9 }
 0x6a9   : > { %6493 = vmatmul.mubr.f32.gmra.mrb[66].mxu1 %v2617_v40  ;;  %v7193_v18 = vpack.c.bf16 %v2783_v32, %v2776_v19  ;;  %v10438_v53 = vand.u32 4294901760, %v9064_v17  ;;  %v9130_v43 = vsub.f32 %v2498_v39, %v9105_v46  ;;  %v9132_v57 = vand.u32 4294901760, %v2500_v23  ;;  %v2501_v32 = vld [vmem:[%s10264_s12 + $0x78] sm:$0xff] }
 0x6aa   : > { %v2647_v21 = vand.u32 4294901760, %v2646_v16  ;;  %v2810_v25 = vsub.f32 %v8927_v9, %v10437_v6  ;;  %7192 = vmatpush3.bf16.msra.mxu1 %v7189_v29  ;;  %6495 = vmatprep.mubr.f32.mxu1 %v2627_v12  ;;  %v2790_v1 = vand.u32 4294901760, %v2789_v0  ;;  %v10439_v29 = vand.u32 4294901760, %v8914_v48 }
 0x6ab   : > { %v2666_v35 = vsub.f32 %v9064_v17, %v10438_v53  ;;  %7194 = vmatprep.subr.bf16.mxu1 %v7193_v18  ;;  %v2657_v16 = vand.u32 4294901760, %v2656_v51  ;;  %v10440_v53 = vand.u32 4294901760, %v9086_v56  ;;  %v9145_v19 = vsub.f32 %v2499_v54, %v9120_v50 }
 0x6ac   : > { %v2803_v40 = vsub.f32 %v8914_v48, %v10439_v29  ;;  %v7197_v6 = vpack.c.bf16 %v2797_v10, %v2790_v1  ;;  %v2811_v38 = vand.u32 4294901760, %v2810_v25  ;;  %v10441_v17 = vand.u32 4294901760, %v8955_v33 }
 0x6ad   : > { %v2676_v12 = vsub.f32 %v9086_v56, %v10440_v53  ;;  %6496 = vmatmul.mubr.f32.gmra.mrb[68].mxu1 %v2637_v31  ;;  %v9150_v47 = vand.u32 4294901760, %v2501_v32  ;;  %v2667_v51 = vand.u32 4294901760, %v2666_v35  ;;  %v10442_v29 = vand.u32 4294901760, %v9103_v41 }
 0x6ae   : > { %v2824_v0 = vsub.f32 %v8955_v33, %v10441_v17  ;;  %7196 = vmatpush3.bf16.msra.mxu1 %v7193_v18  ;;  %6498 = vmatprep.mubr.f32.mxu1 %v2647_v21  ;;  %v9157_v54 = vsub.f32 %v2500_v23, %v9132_v57  ;;  %v2804_v25 = vand.u32 4294901760, %v2803_v40  ;;  %v10443_v31 = vand.u32 4294901760, %v8959_v2 }
 0x6af   : > { %v2686_v53 = vsub.f32 %v9103_v41, %v10442_v29  ;;  %7198 = vmatprep.subr.bf16.mxu1 %v7197_v6  ;;  %v2677_v10 = vand.u32 4294901760, %v2676_v12  ;;  %v10444_v18 = vand.u32 4294901760, %v9118_v11  ;;  %v10329_v21 = vand.u32 4294901760, %v9145_v19 }
 0x6b0   : > { %v2817_v17 = vsub.f32 %v8959_v2, %v10443_v31  ;;  %v7201_v1 = vpack.c.bf16 %v2811_v38, %v2804_v25  ;;  %v2825_v29 = vand.u32 4294901760, %v2824_v0  ;;  %v10445_v39 = vand.u32 4294901760, %v8994_v37 }
 0x6b1   : > { %v2696_v35 = vsub.f32 %v9118_v11, %v10444_v18  ;;  %6499 = vmatmul.mubr.f32.gmra.mrb[70].mxu1 %v2657_v16  ;;  %v9170_v40 = vsub.f32 %v2501_v32, %v9150_v47  ;;  %v2687_v31 = vand.u32 4294901760, %v2686_v53  ;;  %v10446_v12 = vand.u32 4294901760, %v9130_v43 }
 0x6b2   : > { %v2838_v23 = vsub.f32 %v8994_v37, %v10445_v39  ;;  %7200 = vmatpush3.bf16.msra.mxu1 %v7197_v6  ;;  %6501 = vmatprep.mubr.f32.mxu1 %v2667_v51  ;;  %v2725_v18 = vand.u32 4294901760, %v9157_v54  ;;  %v2818_v16 = vand.u32 4294901760, %v2817_v17  ;;  %v10447_v38 = vand.u32 4294901760, %v8984_v49 }
 0x6b3   : > { %v2706_v41 = vsub.f32 %v9130_v43, %v10446_v12  ;;  %7202 = vmatprep.subr.bf16.mxu1 %v7201_v1  ;;  %v2697_v25 = vand.u32 4294901760, %v2696_v35  ;;  %v2716_v32 = vsub.f32 %v9145_v19, %v10329_v21  ;;  %v10448_v51 = vand.u32 4294901760, %v9029_v58 }
 0x6b4   : > { %v2831_v0 = vsub.f32 %v8984_v49, %v10447_v38  ;;  %v7205_v39 = vpack.c.bf16 %v2825_v29, %v2818_v16  ;;  %v2839_v6 = vand.u32 4294901760, %v2838_v23  ;;  %v2735_v12 = vand.u32 4294901760, %v9170_v40 }
 0x6b5   : > { %6502 = vmatmul.mubr.f32.gmra.mrb[72].mxu1 %v2677_v10  ;;  %v2852_v53 = vsub.f32 %v9029_v58, %v10448_v51  ;;  %v2707_v17 = vand.u32 4294901760, %v2706_v41  ;;  %v2726_v35 = vsub.f32 %v9157_v54, %v2725_v18  ;;  %v10449_v21 = vand.u32 4294901760, %v9008_v52 }
 0x6b6   : > { %7204 = vmatpush3.bf16.msra.mxu1 %v7201_v1  ;;  %6504 = vmatprep.mubr.f32.mxu1 %v2687_v31  ;;  %v2832_v38 = vand.u32 4294901760, %v2831_v0  ;;  %v2717_v23 = vand.u32 4294901760, %v2716_v32  ;;  %v2736_v1 = vsub.f32 %v9170_v40, %v2735_v12  ;;  %v7225_v32 = vpack.c.bf16 %v8851_v5, %v8856_v8  ;;  %v9230_v8 = vld [vmem:[%s10265_s13] sm:$0xff] }
 0x6b7   : > { %7206 = vmatprep.subr.bf16.mxu1 %v7205_v39  ;;  %v2845_v10 = vsub.f32 %v9008_v52, %v10449_v21  ;;  %v2853_v16 = vand.u32 4294901760, %v2852_v53  ;;  %v2727_v41 = vand.u32 4294901760, %v2726_v35  ;;  %v7217_v21 = vpack.c.bf16 %v8809_v42, %v8803_v27  ;;  %v9288_v35 = vld [vmem:[%s10265_s13 + $0x38] sm:$0xff] }
 0x6b8   : > { %v7209_v29 = vpack.c.bf16 %v2839_v6, %v2832_v38  ;;  %v2737_v0 = vand.u32 4294901760, %v2736_v1  ;;  %v7229_v27 = vpack.c.bf16 %v8876_v20, %v8861_v26  ;;  %v7233_v42 = vpack.c.bf16 %v8927_v9, %v8914_v48  ;;  %v9240_v9 = vld [vmem:[%s10265_s13 + $0x10] sm:$0xff]  ;;  %v9248_v48 = vld [vmem:[%s10265_s13 + $0x18] sm:$0xff]  ;;  %v9313_v1 = vld [vmem:[%s10265_s13 + $0x48] sm:$0xff] }
 0x6b9   : > { %6505 = vmatmul.mubr.f32.gmra.mrb[74].mxu1 %v2697_v25  ;;  %v2846_v31 = vand.u32 4294901760, %v2845_v10  ;;  %v7221_v25 = vpack.c.bf16 %v8823_v59, %v8828_v63  ;;  %v7237_v59 = vpack.c.bf16 %v8955_v33, %v8959_v2  ;;  %v7241_v63 = vpack.c.bf16 %v8994_v37, %v8984_v49  ;;  %v9235_v49 = vld [vmem:[%s10265_s13 + $0x8] sm:$0xff]  ;;  %v9254_v33 = vld [vmem:[%s10265_s13 + $0x20] sm:$0xff] }
 0x6ba   : > { %7208 = vmatpush3.bf16.msra.mxu1 %v7205_v39  ;;  %6507 = vmatprep.mubr.f32.mxu1 %v2707_v17  ;;  %v7245_v5 = vpack.c.bf16 %v9029_v58, %v9008_v52  ;;  %v3805_v26 = vand.u32 4294901760, %v9230_v8  ;;  %v10338_v20 = vand.u32 4294901760, %v9235_v49  ;;  %v10337_v2 = vand.u32 4294901760, %v9240_v9  ;;  %v9259_v37 = vld [vmem:[%s10265_s13 + $0x28] sm:$0xff]  ;;  %v9283_v17 = vld [vmem:[%s10265_s13 + $0x30] sm:$0xff] }
 0x6bb   : > { %7210 = vmatprep.subr.bf16.mxu1 %v7209_v29  ;;  %v7213_v51 = vpack.c.bf16 %v2853_v16, %v2846_v31  ;;  %v10336_v52 = vand.u32 4294901760, %v9248_v48  ;;  %v10335_v6 = vand.u32 4294901760, %v9254_v33  ;;  %v10334_v53 = vand.u32 4294901760, %v9259_v37  ;;  %v9308_v16 = vld [vmem:[%s10265_s13 + $0x40] sm:$0xff] }
 0x6bc   : > { %v9267_v58 = vpack.c.bf16 %v10338_v20, %v3805_v26  ;;  %v10333_v10 = vand.u32 4294901760, %v9283_v17  ;;  %v10452_v31 = vld [vmem:[#allocation26_spill] sm:$0xff]  ;;  %v10467_v20 = vand.u32 4294901760, %v8901_v36 }
 0x6bd   : > { %6508 = vmatmul.mubr.f32.gmra.mrb[76].mxu1 %v2717_v23  ;;  %v9274_v39 = vpack.c.bf16 %v10336_v52, %v10337_v2  ;;  %v9299_v38 = vpack.c.bf16 %v10334_v53, %v10335_v6  ;;  %v10450_v23 = vld [vmem:[#allocation25_spill] sm:$0xff]  ;;  %v10463_v53 = vld [vmem:[#allocation18_spill] sm:$0xff]  ;;  %v10464_v6 = vand.u32 4294901760, %v8826_v22  ;;  %v10465_v52 = vand.u32 4294901760, %v8881_v28  ;;  %v10466_v2 = vld [vmem:[#allocation20_spill] sm:$0xff] }
 0x6be   : > { %7212 = vmatpush3.bf16.msra.mxu1 %v7209_v29  ;;  %6510 = vmatprep.mubr.f32.mxu1 %v2727_v41  ;;  %v10330_v29 = vand.u32 4294901760, %v9288_v35  ;;  %v10451_v41 = vld [vmem:[#allocation19_spill] sm:$0xff] }
 0x6bf   : > { %7214 = vmatprep.subr.bf16.mxu1 %v7213_v51  ;;  %7346 = vmatprep.subr.bf16.mxu0 %v9267_v58 }
 0x6c0   : > { %7348 = vmatpush3.bf16.msra.mxu0 %v9267_v58 }
 0x6c1   : > { %6511 = vmatmul.mubr.f32.gmra.mrb[78].mxu1 %v2737_v0  ;;  %7350 = vmatprep.subr.bf16.mxu0 %v9274_v39  ;;  %v10332_v0 = vand.u32 4294901760, %v9308_v16 }
 0x6c2   : > { %7216 = vmatpush3.bf16.msra.mxu1 %v7213_v51  ;;  %6545 = vmatprep.mubr.f32.mxu1 %v8747_v13  ;;  %v9323_v51 = vpack.c.bf16 %v10330_v29, %v10333_v10  ;;  %v10459_v29 = vld [vmem:[#allocation27_spill] sm:$0xff]  ;;  %v10462_v10 = vand.u32 4294901760, %v8756_v55 }
 0x6c3   : > { %7218 = vmatprep.subr.bf16.mxu1 %v7217_v21 }
 0x6c4   : > { %7352 = vmatpush3.bf16.msra.mxu0 %v9274_v39 }
 0x6c5   : > { %6546 = vmatmul.mubr.f32.vlgmr.msra.gmra.mrb[64].mxu1 %v8811_v4  ;;  %7354 = vmatprep.subr.bf16.mxu0 %v9299_v38 }
 0x6c6   : > { %7220 = vmatpush3.bf16.msra.mxu1 %v7217_v21  ;;  %6548 = vmatprep.mubr.f32.mxu1 %v8853_v34  ;;  %v10331_v21 = vand.u32 4294901760, %v9313_v1 }
 0x6c7   : > { %7222 = vmatprep.subr.bf16.mxu1 %v7221_v25 }
 0x6c8   : > { %7356 = vmatpush3.bf16.msra.mxu0 %v9299_v38 }
 0x6c9   : > { %6549 = vmatmul.mubr.f32.gmra.mrb[66].mxu1 %v8864_v15  ;;  %7358 = vmatprep.subr.bf16.mxu0 %v9323_v51 }
 0x6ca   : > { %7224 = vmatpush3.bf16.msra.mxu1 %v7221_v25  ;;  %6551 = vmatprep.mubr.f32.mxu1 %v8904_v7  ;;  %v10453_v25 = vld [vmem:[#allocation30_spill] sm:$0xff] }
 0x6cb   : > { %7226 = vmatprep.subr.bf16.mxu1 %v7225_v32 }
 0x6cc   : > { %7360 = vmatpush3.bf16.msra.mxu0 %v9323_v51 }
 0x6cd   : > { %6552 = vmatmul.mubr.f32.gmra.mrb[68].mxu1 %v8906_v30 }
 0x6ce   : > { %7228 = vmatpush3.bf16.msra.mxu1 %v7225_v32  ;;  %6554 = vmatprep.mubr.f32.mxu1 %v8957_v14  ;;  %v10454_v32 = vld [vmem:[#allocation21_spill] sm:$0xff] }
 0x6cf   : > { %7230 = vmatprep.subr.bf16.mxu1 %v7229_v27 }
 0x6d1   : > { %6555 = vmatmul.mubr.f32.gmra.mrb[70].mxu1 %v8996_v24 }
 0x6d2   : > { %7232 = vmatpush3.bf16.msra.mxu1 %v7229_v27  ;;  %6557 = vmatprep.mubr.f32.mxu1 %v9019_v3  ;;  %v10455_v27 = vld [vmem:[#allocation33_spill] sm:$0xff] }
 0x6d3   : > { %7234 = vmatprep.subr.bf16.mxu1 %v7233_v42 }
 0x6d5   : > { %6558 = vmatmul.mubr.f32.gmra.mrb[72].mxu1 %v9041_v60 }
 0x6d6   : > { %7236 = vmatpush3.bf16.msra.mxu1 %v7233_v42  ;;  %6560 = vmatprep.mubr.f32.mxu1 %v9066_v44  ;;  %v9337_v42 = vpack.c.bf16 %v10331_v21, %v10332_v0  ;;  %v10460_v21 = vld [vmem:[#allocation29_spill] sm:$0xff]  ;;  %v10461_v0 = vld [vmem:[#allocation32_spill] sm:$0xff] }
 0x6d7   : > { %7238 = vmatprep.subr.bf16.mxu1 %v7237_v59 }
 0x6d8   : > { %7362 = vmatprep.subr.bf16.mxu0 %v9337_v42 }
 0x6d9   : > { %6561 = vmatmul.mubr.f32.gmra.mrb[74].mxu1 %v9088_v62  ;;  %7364 = vmatpush3.bf16.msra.mxu0 %v9337_v42 }
 0x6da   : > { %7240 = vmatpush3.bf16.msra.mxu1 %v7237_v59  ;;  %6563 = vmatprep.mubr.f32.mxu1 %v9105_v46  ;;  %v10456_v59 = vld [vmem:[#allocation35_spill] sm:$0xff] }
 0x6db   : > { %7242 = vmatprep.subr.bf16.mxu1 %v7241_v63 }
 0x6dd   : > { %6564 = vmatmul.mubr.f32.gmra.mrb[76].mxu1 %v9120_v50 }
 0x6de   : > { %7244 = vmatpush3.bf16.msra.mxu1 %v7241_v63  ;;  %6566 = vmatprep.mubr.f32.mxu1 %v9132_v57  ;;  %v10457_v63 = vld [vmem:[#allocation24_spill] sm:$0xff] }
 0x6df   : > { %7246 = vmatprep.subr.bf16.mxu1 %v7245_v5 }
 0x6e1   : > { %6567 = vmatmul.mubr.f32.gmra.mrb[78].mxu1 %v9150_v47 }
 0x6e2   : > { %7248 = vmatpush3.bf16.msra.mxu1 %v7245_v5  ;;  %6601 = vmatprep.mubr.f32.mxu1 %v8756_v55  ;;  %v10458_v5 = vld [vmem:[#allocation37_spill] sm:$0xff]  ;;  %v10468_v55 = vand.u32 4294901760, %v10450_v23 }
 0x6e3   : > { %7250 = vmatprep.subr.bf16.mxu1 %v8807_v45 }
 0x6e5   : > { %6602 = vmatmul.mubr.f32.vlgmr.msra.gmra.mrb[64].mxu1 %v8826_v22  ;;  %v10470_v22 = vand.u32 4294901760, %v10452_v31 }
 0x6e6   : > { %7252 = vmatpush3.bf16.msra.mxu1 %v8807_v45  ;;  %6604 = vmatprep.mubr.f32.mxu1 %v8881_v28  ;;  %v10471_v28 = vand.u32 4294901760, %v10453_v25 }
 0x6e7   : > { %7254 = vmatprep.subr.bf16.mxu1 %v8821_v61 }
 0x6e9   : > { %6605 = vmatmul.mubr.f32.gmra.mrb[66].mxu1 %v8901_v36  ;;  %v10473_v36 = vand.u32 4294901760, %v10455_v27 }
 0x6ea   : > { %7256 = vmatpush3.bf16.msra.mxu1 %v8821_v61  ;;  %6607 = vmatprep.mubr.f32.mxu1 %v10450_v23  ;;  %v10478_v23 = vld [vmem:[#allocation31_spill] sm:$0xff] }
 0x6eb   : > { %7258 = vmatprep.subr.bf16.mxu1 %v10451_v41 }
 0x6ed   : > { %6608 = vmatmul.mubr.f32.gmra.mrb[68].mxu1 %v10452_v31  ;;  %v10479_v31 = vand.u32 4294901760, %v9118_v11 }
 0x6ee   : > { %7260 = vmatpush3.bf16.msra.mxu1 %v10451_v41  ;;  %6610 = vmatprep.mubr.f32.mxu1 %v10453_v25  ;;  %v10480_v25 = vand.u32 4294901760, %v9130_v43 }
 0x6ef   : > { %7262 = vmatprep.subr.bf16.mxu1 %v10454_v32 }
 0x6f1   : > { %6611 = vmatmul.mubr.f32.gmra.mrb[70].mxu1 %v10455_v27  ;;  %v10481_v27 = vld [vmem:[#allocation34_spill] sm:$0xff] }
 0x6f2   : > { %7264 = vmatpush3.bf16.msra.mxu1 %v10454_v32  ;;  %6613 = vmatprep.mubr.f32.mxu1 %v10456_v59 }
 0x6f3   : > { %7266 = vmatprep.subr.bf16.mxu1 %v10457_v63 }
 0x6f5   : > { %6614 = vmatmul.mubr.f32.gmra.mrb[72].mxu1 %v9086_v56 }
 0x6f6   : > { %7268 = vmatpush3.bf16.msra.mxu1 %v10457_v63  ;;  %6616 = vmatprep.mubr.f32.mxu1 %v10458_v5 }
 0x6f7   : > { %7270 = vmatprep.subr.bf16.mxu1 %v10459_v29 }
 0x6f9   : > { %6617 = vmatmul.mubr.f32.gmra.mrb[74].mxu1 %v9118_v11 }
 0x6fa   : > { %7272 = vmatpush3.bf16.msra.mxu1 %v10459_v29  ;;  %6619 = vmatprep.mubr.f32.mxu1 %v9130_v43 }
 0x6fb   : > { %7274 = vmatprep.subr.bf16.mxu1 %v10460_v21 }
 0x6fd   : > { %6620 = vmatmul.mubr.f32.gmra.mrb[76].mxu1 %v9145_v19 }
 0x6fe   : > { %7276 = vmatpush3.bf16.msra.mxu1 %v10460_v21  ;;  %6622 = vmatprep.mubr.f32.mxu1 %v9157_v54 }
 0x6ff   : > { %7278 = vmatprep.subr.bf16.mxu1 %v10461_v0 }
 0x701   : > { %6623 = vmatmul.mubr.f32.gmra.mrb[78].mxu1 %v9170_v40 }
 0x702   : > { %7280 = vmatpush3.bf16.msra.mxu1 %v10461_v0  ;;  %6657 = vmatprep.mubr.f32.mxu1 %v10462_v10  ;;  %v10469_v10 = vld [vmem:[#allocation22_spill] sm:$0xff] }
 0x703   : > { %7282 = vmatprep.subr.bf16.mxu1 %v10463_v53 }
 0x705   : > { %6658 = vmatmul.mubr.f32.vlgmr.msra.gmra.mrb[64].mxu1 %v10464_v6  ;;  %v10476_v6 = vand.u32 4294901760, %v9086_v56  ;;  %v10482_v56 = vand.u32 4294901760, %v9145_v19 }
 0x706   : > { %7284 = vmatpush3.bf16.msra.mxu1 %v10463_v53  ;;  %6660 = vmatprep.mubr.f32.mxu1 %v10465_v52  ;;  %v10472_v52 = vld [vmem:[#allocation23_spill] sm:$0xff]  ;;  %v10477_v53 = vand.u32 4294901760, %v10458_v5 }
 0x707   : > { %7286 = vmatprep.subr.bf16.mxu1 %v10466_v2 }
 0x709   : > { %6661 = vmatmul.mubr.f32.gmra.mrb[66].mxu1 %v10467_v20  ;;  %v10474_v20 = vand.u32 4294901760, %v10456_v59  ;;  %v10483_v59 = vld [vmem:[#allocation36_spill] sm:$0xff] }
 0x70a   : > { %7288 = vmatpush3.bf16.msra.mxu1 %v10466_v2  ;;  %6663 = vmatprep.mubr.f32.mxu1 %v10468_v55  ;;  %v10475_v2 = vld [vmem:[#allocation28_spill] sm:$0xff] }
 0x70b   : > { %7290 = vmatprep.subr.bf16.mxu1 %v10469_v10 }
 0x70d   : > { %6664 = vmatmul.mubr.f32.gmra.mrb[68].mxu1 %v10470_v22 }
 0x70e   : > { %7292 = vmatpush3.bf16.msra.mxu1 %v10469_v10  ;;  %6666 = vmatprep.mubr.f32.mxu1 %v10471_v28 }
 0x70f   : > { %7294 = vmatprep.subr.bf16.mxu1 %v10472_v52 }
 0x711   : > { %6667 = vmatmul.mubr.f32.gmra.mrb[70].mxu1 %v10473_v36 }
 0x712   : > { %7296 = vmatpush3.bf16.msra.mxu1 %v10472_v52  ;;  %6669 = vmatprep.mubr.f32.mxu1 %v10474_v20 }
 0x713   : > { %7298 = vmatprep.subr.bf16.mxu1 %v10475_v2 }
 0x715   : > { %6670 = vmatmul.mubr.f32.gmra.mrb[72].mxu1 %v10476_v6 }
 0x716   : > { %7300 = vmatpush3.bf16.msra.mxu1 %v10475_v2  ;;  %6672 = vmatprep.mubr.f32.mxu1 %v10477_v53 }
 0x717   : > { %7302 = vmatprep.subr.bf16.mxu1 %v10478_v23 }
 0x719   : > { %6673 = vmatmul.mubr.f32.gmra.mrb[74].mxu1 %v10479_v31 }
 0x71a   : > { %7304 = vmatpush3.bf16.msra.mxu1 %v10478_v23  ;;  %6675 = vmatprep.mubr.f32.mxu1 %v10480_v25 }
 0x71b   : > { %7306 = vmatprep.subr.bf16.mxu1 %v10481_v27 }
 0x71d   : > { %6676 = vmatmul.mubr.f32.gmra.mrb[76].mxu1 %v10482_v56 }
 0x71e   : > { %7308 = vmatpush3.bf16.msra.mxu1 %v10481_v27  ;;  %6678 = vmatprep.mubr.f32.mxu1 %v2725_v18 }
 0x71f   : > { %7310 = vmatprep.subr.bf16.mxu1 %v10483_v59 }
 0x721   : > { %6679 = vmatmul.mubr.f32.gmra.mrb[78].mxu1 %v2735_v12 }
 0x722   : > { %7312 = vmatpush3.bf16.msra.mxu1 %v10483_v59  ;;  %6713 = vmatprep.mubr.f32.mxu1 %v8747_v13 }
 0x723   : > { %7314 = vmatprep.subr.bf16.mxu1 %v8807_v45 }
 0x725   : > { %6714 = vmatmul.mubr.f32.vlgmr.msra.gmra.mrb[64].mxu1 %v8811_v4 }
 0x726   : > { %7316 = vmatpush3.bf16.msra.mxu1 %v8807_v45  ;;  %6716 = vmatprep.mubr.f32.mxu1 %v8853_v34 }
 0x727   : > { %7318 = vmatprep.subr.bf16.mxu1 %v8821_v61 }
 0x729   : > { %6717 = vmatmul.mubr.f32.gmra.mrb[66].mxu1 %v8864_v15 }
 0x72a   : > { %7320 = vmatpush3.bf16.msra.mxu1 %v8821_v61  ;;  %6719 = vmatprep.mubr.f32.mxu1 %v8904_v7  ;;  %v3801_v61 = vld [vmem:[%s10265_s13 + $0x68] sm:$0xff] }
 0x72b   : > { %7322 = vmatprep.subr.bf16.mxu1 %v10451_v41 }
 0x72d   : > { %6720 = vmatmul.mubr.f32.gmra.mrb[68].mxu1 %v8906_v30 }
 0x72e   : > { %7324 = vmatpush3.bf16.msra.mxu1 %v10451_v41  ;;  %6722 = vmatprep.mubr.f32.mxu1 %v8957_v14 }
 0x72f   : > { %7326 = vmatprep.subr.bf16.mxu1 %v10454_v32 }
 0x731   : > { %6723 = vmatmul.mubr.f32.gmra.mrb[70].mxu1 %v8996_v24 }
 0x732   : > { %7328 = vmatpush3.bf16.msra.mxu1 %v10454_v32  ;;  %6725 = vmatprep.mubr.f32.mxu1 %v9019_v3 }
 0x733   : > { %7330 = vmatprep.subr.bf16.mxu1 %v10457_v63 }
 0x735   : > { %6726 = vmatmul.mubr.f32.gmra.mrb[72].mxu1 %v9041_v60 }
 0x736   : > { %7332 = vmatpush3.bf16.msra.mxu1 %v10457_v63  ;;  %6728 = vmatprep.mubr.f32.mxu1 %v9066_v44 }
 0x737   : > { %7334 = vmatprep.subr.bf16.mxu1 %v10459_v29 }
 0x739   : > { %6729 = vmatmul.mubr.f32.gmra.mrb[74].mxu1 %v9088_v62 }
 0x73a   : > { %7336 = vmatpush3.bf16.msra.mxu1 %v10459_v29  ;;  %6731 = vmatprep.mubr.f32.mxu1 %v9105_v46 }
 0x73b   : > { %7338 = vmatprep.subr.bf16.mxu1 %v10460_v21 }
 0x73d   : > { %6732 = vmatmul.mubr.f32.gmra.mrb[76].mxu1 %v9120_v50 }
 0x73e   : > { %7340 = vmatpush3.bf16.msra.mxu1 %v10460_v21  ;;  %6734 = vmatprep.mubr.f32.mxu1 %v9132_v57 }
 0x73f   : > { %7342 = vmatprep.subr.bf16.mxu1 %v10461_v0 }
 0x741   : > { %6735 = vmatmul.mubr.f32.gmra.mrb[78].mxu1 %v9150_v47 }
 0x742   : > { %7344 = vmatpush3.bf16.msra.mxu1 %v10461_v0  ;;  %6769 = vmatprep.mubr.f32.mxu1 %v8747_v13  ;;  %v3798_v13 = vld [vmem:[%s10265_s13 + $0x50] sm:$0xff] }
 0x743   : > { %v3835_v45 = vand.u32 4294901760, %v3798_v13 }
 0x745   : > { %6770 = vmatmul.mubr.f32.vlgmr.msra.gmra.mrb[64].mxu1 %v8811_v4 }
 0x746   : > { %6772 = vmatprep.mubr.f32.mxu1 %v8853_v34 }
 0x749   : > { %6773 = vmatmul.mubr.f32.gmra.mrb[66].mxu1 %v8864_v15  ;;  %v3844_v15 = vand.u32 4294901760, %v3801_v61 }
 0x74a   : > { %6775 = vmatprep.mubr.f32.mxu1 %v8904_v7 }
 0x74b   : > { %v9520_v32 = vsub.f32 %v3801_v61, %v3844_v15  ;;  %v10495_v61 = vand.u32 4294901760, %v9240_v9 }
 0x74d   : > { %6776 = vmatmul.mubr.f32.gmra.mrb[68].mxu1 %v8906_v30  ;;  %v9476_v30 = vsub.f32 %v9230_v8, %v3805_v26  ;;  %v9506_v8 = vsub.f32 %v3798_v13, %v3835_v45  ;;  %10492 = vst [vmem:[#allocation24_spill] sm:$0xff] %v9520_v32  ;;  %v10341_v10 = vand.u32 4294901760, %v9520_v32 }
 0x74e   : > { %6778 = vmatprep.mubr.f32.mxu1 %v8957_v14 }
 0x74f   : > { %10485 = vst [vmem:[#allocation19_spill] sm:$0xff] %v9476_v30  ;;  %10489 = vst [vmem:[#allocation21_spill] sm:$0xff] %v9506_v8  ;;  %v10344_v26 = vand.u32 4294901760, %v9506_v8  ;;  %v4140_v52 = vsub.f32 %v9520_v32, %v10341_v10 }
 0x751   : > { %6779 = vmatmul.mubr.f32.gmra.mrb[70].mxu1 %v8996_v24  ;;  %v3799_v24 = vld [vmem:[%s10265_s13 + $0x58] sm:$0xff]  ;;  %v4119_v41 = vsub.f32 %v9506_v8, %v10344_v26  ;;  %v4141_v6 = vand.u32 4294901760, %v4140_v52 }
 0x752   : > { %6781 = vmatprep.mubr.f32.mxu1 %v9019_v3  ;;  %v3838_v4 = vand.u32 4294901760, %v3799_v24  ;;  %v3802_v3 = vld [vmem:[%s10265_s13 + $0x70] sm:$0xff] }
 0x753   : > { %v4120_v63 = vand.u32 4294901760, %v4119_v41 }
 0x754   : > { %v9461_v14 = vpack.c.bf16 %v3838_v4, %v3835_v45 }
 0x755   : > { %6782 = vmatmul.mubr.f32.gmra.mrb[72].mxu1 %v9041_v60  ;;  %v3803_v60 = vld [vmem:[%s10265_s13 + $0x78] sm:$0xff] }
 0x756   : > { %6784 = vmatprep.mubr.f32.mxu1 %v9066_v44  ;;  %7366 = vmatprep.subr.bf16.mxu0 %v9461_v14  ;;  %v3847_v44 = vand.u32 4294901760, %v3802_v3 }
 0x757   : > { %7368 = vmatpush3.bf16.msra.mxu0 %v9461_v14 }
 0x758   : > { %v9532_v36 = vsub.f32 %v3802_v3, %v3847_v44 }
 0x759   : > { %6785 = vmatmul.mubr.f32.gmra.mrb[74].mxu1 %v9088_v62  ;;  %v3800_v62 = vld [vmem:[%s10265_s13 + $0x60] sm:$0xff] }
 0x75a   : > { %6787 = vmatprep.mubr.f32.mxu1 %v9105_v46  ;;  %v3841_v34 = vand.u32 4294901760, %v3800_v62  ;;  %v10354_v46 = vand.u32 4294901760, %v9476_v30  ;;  %10493 = vst [vmem:[#allocation37_spill] sm:$0xff] %v9532_v36  ;;  %v10340_v53 = vand.u32 4294901760, %v9532_v36 }
 0x75c   : > { %v9471_v7 = vpack.c.bf16 %v3844_v15, %v3841_v34  ;;  %v4049_v19 = vsub.f32 %v9476_v30, %v10354_v46  ;;  %v9518_v21 = vsub.f32 %v3800_v62, %v3841_v34  ;;  %v4147_v25 = vsub.f32 %v9532_v36, %v10340_v53 }
 0x75d   : > { %6788 = vmatmul.mubr.f32.gmra.mrb[76].mxu1 %v9120_v50  ;;  %v3850_v50 = vand.u32 4294901760, %v3803_v60  ;;  %v9567_v34 = vsub.f32 %v9240_v9, %v10495_v61  ;;  %v10496_v15 = vand.u32 4294901760, %v9248_v48  ;;  %v10502_v53 = vand.u32 4294901760, %v9313_v1 }
 0x75e   : > { %6790 = vmatprep.mubr.f32.mxu1 %v9132_v57  ;;  %10484 = vst [vmem:[#allocation25_spill] sm:$0xff] %v9471_v7  ;;  %7370 = vmatprep.subr.bf16.mxu0 %v9471_v7  ;;  %v4050_v40 = vand.u32 4294901760, %v4049_v19  ;;  %10491 = vst [vmem:[#allocation35_spill] sm:$0xff] %v9518_v21  ;;  %v10342_v55 = vand.u32 4294901760, %v9518_v21  ;;  %v4148_v56 = vand.u32 4294901760, %v4147_v25  ;;  %v10498_v19 = vand.u32 4294901760, %v9259_v37 }
 0x75f   : > { %7372 = vmatpush3.bf16.msra.mxu0 %v9471_v7  ;;  %v9493_v43 = vpack.c.bf16 %v3850_v50, %v3847_v44  ;;  %v9534_v20 = vsub.f32 %v3803_v60, %v3850_v50  ;;  %v10350_v3 = vand.u32 4294901760, %v9567_v34  ;;  %v10497_v44 = vand.u32 4294901760, %v9254_v33 }
 0x760   : > { %v4133_v28 = vsub.f32 %v9518_v21, %v10342_v55  ;;  %v9642_v10 = vsub.f32 %v9313_v1, %v10502_v53 }
 0x761   : > { %6791 = vmatmul.mubr.f32.gmra.mrb[78].mxu1 %v9150_v47  ;;  %v10486_v47 = vand.u32 4294901760, %v9235_v49  ;;  %10488 = vst [vmem:[#allocation30_spill] sm:$0xff] %v9493_v43  ;;  %7374 = vmatprep.subr.bf16.mxu0 %v9493_v43  ;;  %10494 = vst [vmem:[#allocation27_spill] sm:$0xff] %v9534_v20  ;;  %v10339_v23 = vand.u32 4294901760, %v9534_v20  ;;  %v9562_v62 = vpack.c.bf16 %v9534_v20, %v9532_v36 }
 0x762   : > { %v4134_v2 = vand.u32 4294901760, %v4133_v28  ;;  %v9579_v50 = vsub.f32 %v9254_v33, %v10497_v44  ;;  %v4063_v9 = vsub.f32 %v9567_v34, %v10350_v3 }
 0x763   : > { %v9481_v57 = vsub.f32 %v9235_v49, %v10486_v47  ;;  %7376 = vmatpush3.bf16.msra.mxu0 %v9493_v43  ;;  %v9508_v49 = vsub.f32 %v3799_v24, %v3838_v4  ;;  %v4154_v27 = vsub.f32 %v9534_v20, %v10339_v23  ;;  %v9558_v4 = vpack.c.bf16 %v9520_v32, %v9518_v21 }
 0x764   : > { %v9538_v31 = vpack.c.bf16 %v4141_v6, %v4134_v2  ;;  %v9572_v47 = vsub.f32 %v9248_v48, %v10496_v15  ;;  %v4064_v6 = vand.u32 4294901760, %v4063_v9 }
 0x765   : > { %10487 = vst [vmem:[#allocation26_spill] sm:$0xff] %v9481_v57  ;;  %v10353_v11 = vand.u32 4294901760, %v9481_v57  ;;  %10490 = vst [vmem:[#allocation33_spill] sm:$0xff] %v9508_v49  ;;  %v10343_v29 = vand.u32 4294901760, %v9508_v49  ;;  %v4155_v59 = vand.u32 4294901760, %v4154_v27  ;;  %v9550_v24 = vpack.c.bf16 %v9481_v57, %v9476_v30 }
 0x766   : > { %v9554_v45 = vpack.c.bf16 %v9508_v49, %v9506_v8  ;;  %v10348_v60 = vand.u32 4294901760, %v9572_v47 }
 0x767   : > { %v4056_v54 = vsub.f32 %v9481_v57, %v10353_v11  ;;  %v4126_v0 = vsub.f32 %v9508_v49, %v10343_v29  ;;  %v9546_v13 = vpack.c.bf16 %v4155_v59, %v4148_v56 }
 0x768   : > { %v4070_v48 = vsub.f32 %v9572_v47, %v10348_v60 }
 0x769   : > { %v4057_v18 = vand.u32 4294901760, %v4056_v54  ;;  %v4127_v5 = vand.u32 4294901760, %v4126_v0  ;;  %v9584_v54 = vsub.f32 %v9259_v37, %v10498_v19 }
 0x76a   : > { %v4071_v25 = vand.u32 4294901760, %v4070_v48 }
 0x76b   : > { %v9503_v12 = vpack.c.bf16 %v4057_v18, %v4050_v40  ;;  %v9524_v22 = vpack.c.bf16 %v4127_v5, %v4120_v63  ;;  %v10346_v18 = vand.u32 4294901760, %v9579_v50  ;;  %v10345_v41 = vand.u32 4294901760, %v9584_v54 }
 0x76c   : > { %v10499_v63 = vand.u32 4294901760, %v9283_v17  ;;  %v10500_v5 = vand.u32 4294901760, %v9288_v35  ;;  %v7381_v23 = vpack.c.bf16 %v4071_v25, %v4064_v6 }
 0x76d   : > { %7378 = vmatprep.subr.bf16.mxu0 %v9503_v12 }
 0x76e   : > { %v9599_v37 = vsub.f32 %v9283_v17, %v10499_v63  ;;  %v9604_v28 = vsub.f32 %v9288_v35, %v10500_v5  ;;  %v4077_v17 = vsub.f32 %v9579_v50, %v10346_v18  ;;  %v4084_v35 = vsub.f32 %v9584_v54, %v10345_v41 }
 0x770   : > { %v10349_v44 = vand.u32 4294901760, %v9599_v37  ;;  %v10351_v19 = vand.u32 4294901760, %v9604_v28  ;;  %v4085_v26 = vand.u32 4294901760, %v4084_v35 }
 0x772   : > { %v4091_v1 = vsub.f32 %v9599_v37, %v10349_v44  ;;  %v4098_v53 = vsub.f32 %v9604_v28, %v10351_v19 }
 0x774   : > { %v4092_v46 = vand.u32 4294901760, %v4091_v1 }
 0x818   : > { %v6771_v40 = vpop.f32.mrb[64].mxu1 }
 0x819   : > { %v9594_v33 = vand.u32 4294901760, %v6771_v40  ;;  %v3694_v0 = vpop.f32.mrb[65].mxu1 }
 0x81a   : > { %v9606_v52 = vand.u32 4294901760, %v3694_v0 }
 0x81b   : > { %v9609_v2 = vsub.f32 %v6771_v40, %v9594_v33  ;;  %v10501_v40 = vand.u32 4294901760, %v9308_v16 }
 0x81c   : > { %v9612_v27 = vsub.f32 %v3694_v0, %v9606_v52  ;;  %v6774_v56 = vpop.f32.mrb[66].mxu1 }
 0x81d   : > { %v10347_v59 = vand.u32 4294901760, %v9609_v2  ;;  %v9621_v61 = vand.u32 4294901760, %v6774_v56  ;;  %v3706_v15 = vpop.f32.mrb[67].mxu1  ;;  %v9631_v0 = vsub.f32 %v9308_v16, %v10501_v40  ;;  %v4078_v40 = vand.u32 4294901760, %v4077_v17 }
 0x81e   : > { %v10352_v9 = vand.u32 4294901760, %v9612_v27  ;;  %v9626_v48 = vand.u32 4294901760, %v3706_v15 }
 0x81f   : > { %v3898_v63 = vsub.f32 %v9609_v2, %v10347_v59  ;;  %v9637_v5 = vsub.f32 %v6774_v56, %v9621_v61 }
 0x820   : > { %v9645_v55 = vsub.f32 %v3706_v15, %v9626_v48  ;;  %v6777_v29 = vpop.f32.mrb[68].mxu1  ;;  %v3888_v16 = vsub.f32 %v9612_v27, %v10352_v9  ;;  %v7385_v9 = vpack.c.bf16 %v4085_v26, %v4078_v40 }
 0x821   : > { %v10355_v41 = vand.u32 4294901760, %v9637_v5  ;;  %v9651_v56 = vand.u32 4294901760, %v6777_v29  ;;  %v3718_v6 = vpop.f32.mrb[69].mxu1  ;;  %v3899_v35 = vand.u32 4294901760, %v3898_v63 }
 0x822   : > { %v10356_v25 = vand.u32 4294901760, %v9645_v55  ;;  %v9660_v15 = vand.u32 4294901760, %v3718_v6  ;;  %v3889_v18 = vand.u32 4294901760, %v3888_v16 }
 0x823   : > { %v9664_v59 = vsub.f32 %v6777_v29, %v9651_v56  ;;  %v3918_v60 = vsub.f32 %v9637_v5, %v10355_v41  ;;  %v4099_v41 = vand.u32 4294901760, %v4098_v53  ;;  %v10504_v53 = vand.u32 4294901760, %v9642_v10 }
 0x824   : > { %v9671_v3 = vsub.f32 %v3718_v6, %v9660_v15  ;;  %v6780_v19 = vpop.f32.mrb[70].mxu1  ;;  %6825 = vmatprep.mubr.f32.mxu0 %v3889_v18  ;;  %v3908_v16 = vsub.f32 %v9645_v55, %v10356_v25  ;;  %v10503_v6 = vand.u32 4294901760, %v9631_v0 }
 0x825   : > { %v10358_v63 = vand.u32 4294901760, %v9664_v59  ;;  %v9677_v29 = vand.u32 4294901760, %v6780_v19  ;;  %v3730_v11 = vpop.f32.mrb[71].mxu1  ;;  %6826 = vmatmul.mubr.f32.vlgmr.msra.gmra.mrb[48].mxu0 %v3899_v35  ;;  %v3919_v40 = vand.u32 4294901760, %v3918_v60  ;;  %v4112_v35 = vsub.f32 %v9642_v10, %v10504_v53 }
 0x826   : > { %v10362_v44 = vand.u32 4294901760, %v9671_v3  ;;  %v9680_v17 = vand.u32 4294901760, %v3730_v11  ;;  %7380 = vmatpush3.bf16.msra.mxu0 %v9503_v12  ;;  %v3909_v18 = vand.u32 4294901760, %v3908_v16  ;;  %v4105_v25 = vsub.f32 %v9631_v0, %v10503_v6 }
 0x827   : > { %v9687_v26 = vsub.f32 %v6780_v19, %v9677_v29  ;;  %7382 = vmatprep.subr.bf16.mxu0 %v7381_v23  ;;  %v3938_v1 = vsub.f32 %v9664_v59, %v10358_v63  ;;  %v7389_v63 = vpack.c.bf16 %v4099_v41, %v4092_v46  ;;  %v4113_v49 = vand.u32 4294901760, %v4112_v35 }
 0x828   : > { %v9696_v12 = vsub.f32 %v3730_v11, %v9680_v17  ;;  %v6783_v16 = vpop.f32.mrb[72].mxu1  ;;  %6828 = vmatprep.mubr.f32.mxu0 %v3909_v18  ;;  %v3928_v19 = vsub.f32 %v9671_v3, %v10362_v44  ;;  %v4106_v53 = vand.u32 4294901760, %v4105_v25 }
 0x829   : > { %v10364_v60 = vand.u32 4294901760, %v9687_v26  ;;  %v9702_v6 = vand.u32 4294901760, %v6783_v16  ;;  %v3742_v20 = vpop.f32.mrb[73].mxu1  ;;  %6829 = vmatmul.mubr.f32.gmra.mrb[50].mxu0 %v3919_v40  ;;  %v3939_v21 = vand.u32 4294901760, %v3938_v1 }
 0x82a   : > { %v10365_v36 = vand.u32 4294901760, %v9696_v12  ;;  %v9705_v32 = vand.u32 4294901760, %v3742_v20  ;;  %7384 = vmatpush3.bf16.msra.mxu0 %v7381_v23  ;;  %v3929_v11 = vand.u32 4294901760, %v3928_v19 }
 0x82b   : > { %v9708_v18 = vsub.f32 %v6783_v16, %v9702_v6  ;;  %7386 = vmatprep.subr.bf16.mxu0 %v7385_v9  ;;  %v3958_v44 = vsub.f32 %v9687_v26, %v10364_v60 }
 0x82c   : > { %v9714_v40 = vsub.f32 %v3742_v20, %v9705_v32  ;;  %v6786_v46 = vpop.f32.mrb[74].mxu1  ;;  %6831 = vmatprep.mubr.f32.mxu0 %v3929_v11  ;;  %v3948_v23 = vsub.f32 %v9696_v12, %v10365_v36  ;;  %v7393_v36 = vpack.c.bf16 %v4113_v49, %v4106_v53 }
 0x82d   : > { %v10369_v41 = vand.u32 4294901760, %v9708_v18  ;;  %v9720_v25 = vand.u32 4294901760, %v6786_v46  ;;  %v3754_v1 = vpop.f32.mrb[75].mxu1  ;;  %6832 = vmatmul.mubr.f32.gmra.mrb[52].mxu0 %v3939_v21  ;;  %v3959_v11 = vand.u32 4294901760, %v3958_v44 }
 0x82e   : > { %v10370_v16 = vand.u32 4294901760, %v9714_v40  ;;  %v9723_v19 = vand.u32 4294901760, %v3754_v1  ;;  %7388 = vmatpush3.bf16.msra.mxu0 %v7385_v9  ;;  %v3949_v35 = vand.u32 4294901760, %v3948_v23 }
 0x82f   : > { %v9726_v20 = vsub.f32 %v6786_v46, %v9720_v25  ;;  %7390 = vmatprep.subr.bf16.mxu0 %v7389_v63  ;;  %v3978_v60 = vsub.f32 %v9708_v18, %v10369_v41 }
 0x830   : > { %v9732_v8 = vsub.f32 %v3754_v1, %v9723_v19  ;;  %v6789_v21 = vpop.f32.mrb[76].mxu1  ;;  %6834 = vmatprep.mubr.f32.mxu0 %v3949_v35  ;;  %v3968_v9 = vsub.f32 %v9714_v40, %v10370_v16 }
 0x831   : > { %v10373_v23 = vand.u32 4294901760, %v9726_v20  ;;  %v9738_v46 = vand.u32 4294901760, %v6789_v21  ;;  %v3766_v44 = vpop.f32.mrb[77].mxu1  ;;  %6835 = vmatmul.mubr.f32.gmra.mrb[54].mxu0 %v3959_v11  ;;  %v3979_v1 = vand.u32 4294901760, %v3978_v60 }
 0x832   : > { %v10374_v57 = vand.u32 4294901760, %v9732_v8  ;;  %v9741_v30 = vand.u32 4294901760, %v3766_v44  ;;  %7392 = vmatpush3.bf16.msra.mxu0 %v7389_v63  ;;  %v3969_v49 = vand.u32 4294901760, %v3968_v9 }
 0x833   : > { %v9744_v53 = vsub.f32 %v6789_v21, %v9738_v46  ;;  %7394 = vmatprep.subr.bf16.mxu0 %v7393_v36  ;;  %v3998_v35 = vsub.f32 %v9726_v20, %v10373_v23 }
 0x834   : > { %v9750_v41 = vsub.f32 %v3766_v44, %v9741_v30  ;;  %v6792_v16 = vpop.f32.mrb[78].mxu1  ;;  %6837 = vmatprep.mubr.f32.mxu0 %v3969_v49  ;;  %v3988_v11 = vsub.f32 %v9732_v8, %v10374_v57 }
 0x835   : > { %v10377_v63 = vand.u32 4294901760, %v9744_v53  ;;  %v9756_v9 = vand.u32 4294901760, %v6792_v16  ;;  %v3778_v21 = vpop.f32.mrb[79].mxu1  ;;  %6838 = vmatmul.mubr.f32.gmra.mrb[56].mxu0 %v3979_v1  ;;  %v3999_v49 = vand.u32 4294901760, %v3998_v35 }
 0x836   : > { %v4007_v60 = vand.u32 4294901760, %v9750_v41  ;;  %v9759_v43 = vand.u32 4294901760, %v3778_v21  ;;  %7396 = vmatpush3.bf16.msra.mxu0 %v7393_v36  ;;  %v3989_v23 = vand.u32 4294901760, %v3988_v11 }
 0x837   : > { %v9762_v44 = vsub.f32 %v6792_v16, %v9756_v9  ;;  %7398 = vmatprep.subr.bf16.mxu0 %v9524_v22  ;;  %v4018_v57 = vsub.f32 %v9744_v53, %v10377_v63 }
 0x838   : > { %v9769_v7 = vsub.f32 %v3778_v21, %v9759_v43  ;;  %6840 = vmatprep.mubr.f32.mxu0 %v3989_v23  ;;  %v4008_v1 = vsub.f32 %v9750_v41, %v4007_v60 }
 0x839   : > { %v4037_v36 = vand.u32 4294901760, %v9762_v44  ;;  %6841 = vmatmul.mubr.f32.gmra.mrb[58].mxu0 %v3999_v49  ;;  %v4019_v11 = vand.u32 4294901760, %v4018_v57  ;;  %v7413_v57 = vpack.c.bf16 %v9572_v47, %v9567_v34 }
 0x83a   : > { %v4027_v16 = vand.u32 4294901760, %v9769_v7  ;;  %7400 = vmatpush3.bf16.msra.mxu0 %v9524_v22  ;;  %v4009_v35 = vand.u32 4294901760, %v4008_v1  ;;  %v7417_v22 = vpack.c.bf16 %v9584_v54, %v9579_v50 }
 0x83b   : > { %7402 = vmatprep.subr.bf16.mxu0 %v9538_v31  ;;  %v4038_v21 = vsub.f32 %v9762_v44, %v4037_v36 }
 0x83c   : > { %6843 = vmatprep.mubr.f32.mxu0 %v4009_v35  ;;  %v4028_v23 = vsub.f32 %v9769_v7, %v4027_v16 }
 0x83d   : > { %6844 = vmatmul.mubr.f32.gmra.mrb[60].mxu0 %v4019_v11  ;;  %v4039_v63 = vand.u32 4294901760, %v4038_v21  ;;  %v10511_v11 = vand.u32 4294901760, %v9612_v27  ;;  %v10512_v21 = vand.u32 4294901760, %v9567_v34  ;;  %v10519_v34 = vand.u32 4294901760, %v9671_v3 }
 0x83e   : > { %7404 = vmatpush3.bf16.msra.mxu0 %v9538_v31  ;;  %v4029_v49 = vand.u32 4294901760, %v4028_v23  ;;  %v7421_v31 = vpack.c.bf16 %v9604_v28, %v9599_v37  ;;  %v10513_v23 = vand.u32 4294901760, %v9572_v47  ;;  %v10520_v47 = vand.u32 4294901760, %v9599_v37 }
 0x83f   : > { %7406 = vmatprep.subr.bf16.mxu0 %v9546_v13  ;;  %v10527_v37 = vand.u32 4294901760, %v9714_v40 }
 0x840   : > { %6846 = vmatprep.mubr.f32.mxu0 %v4029_v49  ;;  %v7477_v49 = vpack.c.bf16 %v10513_v23, %v10512_v21  ;;  %v10536_v21 = vld [vmem:[#allocation24_spill] sm:$0xff] }
 0x841   : > { %6847 = vmatmul.mubr.f32.gmra.mrb[62].mxu0 %v4039_v63  ;;  %v10509_v63 = vld [vmem:[#allocation26_spill] sm:$0xff] }
 0x842   : > { %7408 = vmatpush3.bf16.msra.mxu0 %v9546_v13  ;;  %6881 = vmatprep.mubr.f32.mxu0 %v9606_v52  ;;  %v7425_v13 = vpack.c.bf16 %v9642_v10, %v9631_v0  ;;  %v10510_v1 = vand.u32 4294901760, %v10509_v63  ;;  %v10526_v63 = vand.u32 4294901760, %v9687_v26 }
 0x843   : > { %7410 = vmatprep.subr.bf16.mxu0 %v9550_v24 }
 0x845   : > { %6882 = vmatmul.mubr.f32.vlgmr.msra.gmra.mrb[48].mxu0 %v9594_v33 }
 0x846   : > { %6884 = vmatprep.mubr.f32.mxu0 %v9626_v48  ;;  %7412 = vmatpush3.bf16.msra.mxu0 %v9550_v24  ;;  %v10505_v24 = vld [vmem:[#allocation25_spill] sm:$0xff] }
 0x847   : > { %7414 = vmatprep.subr.bf16.mxu0 %v7413_v57 }
 0x849   : > { %6885 = vmatmul.mubr.f32.gmra.mrb[50].mxu0 %v9621_v61 }
 0x84a   : > { %6887 = vmatprep.mubr.f32.mxu0 %v9660_v15  ;;  %7416 = vmatpush3.bf16.msra.mxu0 %v7413_v57  ;;  %v10514_v57 = vand.u32 4294901760, %v9609_v2 }
 0x84b   : > { %7418 = vmatprep.subr.bf16.mxu0 %v7417_v22 }
 0x84d   : > { %6888 = vmatmul.mubr.f32.gmra.mrb[52].mxu0 %v9651_v56 }
 0x84e   : > { %6890 = vmatprep.mubr.f32.mxu0 %v9680_v17  ;;  %7420 = vmatpush3.bf16.msra.mxu0 %v7417_v22  ;;  %v10515_v22 = vand.u32 4294901760, %v9645_v55 }
 0x84f   : > { %7422 = vmatprep.subr.bf16.mxu0 %v7421_v31 }
 0x851   : > { %6891 = vmatmul.mubr.f32.gmra.mrb[54].mxu0 %v9677_v29 }
 0x852   : > { %6893 = vmatprep.mubr.f32.mxu0 %v9705_v32  ;;  %7424 = vmatpush3.bf16.msra.mxu0 %v7421_v31  ;;  %v10516_v31 = vand.u32 4294901760, %v9579_v50  ;;  %v10523_v50 = vand.u32 4294901760, %v9696_v12 }
 0x853   : > { %7426 = vmatprep.subr.bf16.mxu0 %v7425_v13 }
 0x855   : > { %6894 = vmatmul.mubr.f32.gmra.mrb[56].mxu0 %v9702_v6 }
 0x856   : > { %6896 = vmatprep.mubr.f32.mxu0 %v9723_v19  ;;  %7428 = vmatpush3.bf16.msra.mxu0 %v7425_v13  ;;  %v10517_v13 = vand.u32 4294901760, %v9584_v54  ;;  %v10524_v54 = vand.u32 4294901760, %v9631_v0  ;;  %v10533_v0 = vand.u32 4294901760, %v9732_v8 }
 0x857   : > { %7430 = vmatprep.subr.bf16.mxu0 %v9554_v45 }
 0x859   : > { %6897 = vmatmul.mubr.f32.gmra.mrb[58].mxu0 %v9720_v25 }
 0x85a   : > { %6899 = vmatprep.mubr.f32.mxu0 %v9741_v30  ;;  %7432 = vmatpush3.bf16.msra.mxu0 %v9554_v45  ;;  %v10506_v45 = vld [vmem:[#allocation30_spill] sm:$0xff] }
 0x85b   : > { %7434 = vmatprep.subr.bf16.mxu0 %v9558_v4 }
 0x85d   : > { %6900 = vmatmul.mubr.f32.gmra.mrb[60].mxu0 %v9738_v46 }
 0x85e   : > { %6902 = vmatprep.mubr.f32.mxu0 %v9759_v43  ;;  %7436 = vmatpush3.bf16.msra.mxu0 %v9558_v4  ;;  %v10507_v4 = vld [vmem:[#allocation19_spill] sm:$0xff] }
 0x85f   : > { %7438 = vmatprep.subr.bf16.mxu0 %v9562_v62 }
 0x861   : > { %6903 = vmatmul.mubr.f32.gmra.mrb[62].mxu0 %v9756_v9 }
 0x862   : > { %7440 = vmatpush3.bf16.msra.mxu0 %v9562_v62  ;;  %6937 = vmatprep.mubr.f32.mxu0 %v9612_v27  ;;  %v10508_v62 = vand.u32 4294901760, %v10507_v4  ;;  %v7481_v27 = vpack.c.bf16 %v10517_v13, %v10516_v31  ;;  %v10518_v4 = vand.u32 4294901760, %v9637_v5  ;;  %v10543_v13 = vand.u32 4294901760, %v9744_v53 }
 0x863   : > { %7442 = vmatprep.subr.bf16.mxu0 %v9267_v58 }
 0x864   : > { %v7473_v35 = vpack.c.bf16 %v10510_v1, %v10508_v62  ;;  %v10522_v62 = vand.u32 4294901760, %v9664_v59  ;;  %v10530_v1 = vld [vmem:[#allocation33_spill] sm:$0xff] }
 0x865   : > { %6938 = vmatmul.mubr.f32.vlgmr.msra.gmra.mrb[48].mxu0 %v9609_v2 }
 0x866   : > { %6940 = vmatprep.mubr.f32.mxu0 %v9645_v55  ;;  %7444 = vmatpush3.bf16.msra.mxu0 %v9267_v58  ;;  %v10521_v55 = vand.u32 4294901760, %v9604_v28  ;;  %v10528_v28 = vld [vmem:[#allocation21_spill] sm:$0xff] }
 0x867   : > { %7446 = vmatprep.subr.bf16.mxu0 %v9274_v39 }
 0x868   : > { %v7485_v2 = vpack.c.bf16 %v10521_v55, %v10520_v47 }
 0x869   : > { %6941 = vmatmul.mubr.f32.gmra.mrb[50].mxu0 %v9637_v5 }
 0x86a   : > { %6943 = vmatprep.mubr.f32.mxu0 %v9671_v3  ;;  %7448 = vmatpush3.bf16.msra.mxu0 %v9274_v39  ;;  %v10525_v3 = vand.u32 4294901760, %v9642_v10  ;;  %v10534_v10 = vld [vmem:[#allocation35_spill] sm:$0xff] }
 0x86b   : > { %7450 = vmatprep.subr.bf16.mxu0 %v9299_v38 }
 0x86c   : > { %v7489_v5 = vpack.c.bf16 %v10525_v3, %v10524_v54 }
 0x86d   : > { %6944 = vmatmul.mubr.f32.gmra.mrb[52].mxu0 %v9664_v59  ;;  %v10529_v59 = vand.u32 4294901760, %v10528_v28 }
 0x86e   : > { %6946 = vmatprep.mubr.f32.mxu0 %v9696_v12  ;;  %7452 = vmatpush3.bf16.msra.mxu0 %v9299_v38  ;;  %v10531_v12 = vand.u32 4294901760, %v10530_v1 }
 0x86f   : > { %7454 = vmatprep.subr.bf16.mxu0 %v9323_v51 }
 0x871   : > { %6947 = vmatmul.mubr.f32.gmra.mrb[54].mxu0 %v9687_v26  ;;  %v10535_v26 = vand.u32 4294901760, %v10534_v10 }
 0x872   : > { %6949 = vmatprep.mubr.f32.mxu0 %v9714_v40  ;;  %7456 = vmatpush3.bf16.msra.mxu0 %v9323_v51  ;;  %v10537_v40 = vand.u32 4294901760, %v10536_v21 }
 0x873   : > { %7458 = vmatprep.subr.bf16.mxu0 %v9337_v42 }
 0x874   : > { %v7497_v23 = vpack.c.bf16 %v10537_v40, %v10535_v26 }
 0x875   : > { %6950 = vmatmul.mubr.f32.gmra.mrb[56].mxu0 %v9708_v18 }
 0x876   : > { %6952 = vmatprep.mubr.f32.mxu0 %v9732_v8  ;;  %7460 = vmatpush3.bf16.msra.mxu0 %v9337_v42 }
 0x877   : > { %7462 = vmatprep.subr.bf16.mxu0 %v9461_v14 }
 0x879   : > { %6953 = vmatmul.mubr.f32.gmra.mrb[58].mxu0 %v9726_v20 }
 0x87a   : > { %6955 = vmatprep.mubr.f32.mxu0 %v9750_v41  ;;  %7464 = vmatpush3.bf16.msra.mxu0 %v9461_v14 }
 0x87b   : > { %7466 = vmatprep.subr.bf16.mxu0 %v10505_v24 }
 0x87d   : > { %6956 = vmatmul.mubr.f32.gmra.mrb[60].mxu0 %v9744_v53 }
 0x87e   : > { %6958 = vmatprep.mubr.f32.mxu0 %v9769_v7  ;;  %7468 = vmatpush3.bf16.msra.mxu0 %v10505_v24 }
 0x87f   : > { %7470 = vmatprep.subr.bf16.mxu0 %v10506_v45 }
 0x881   : > { %6959 = vmatmul.mubr.f32.gmra.mrb[62].mxu0 %v9762_v44 }
 0x882   : > { %7472 = vmatpush3.bf16.msra.mxu0 %v10506_v45  ;;  %6993 = vmatprep.mubr.f32.mxu0 %v10511_v11  ;;  %v10532_v11 = vand.u32 4294901760, %v9708_v18  ;;  %v10539_v18 = vld [vmem:[#allocation37_spill] sm:$0xff] }
 0x883   : > { %7474 = vmatprep.subr.bf16.mxu0 %v7473_v35 }
 0x885   : > { %6994 = vmatmul.mubr.f32.vlgmr.msra.gmra.mrb[48].mxu0 %v10514_v57  ;;  %v10540_v57 = vand.u32 4294901760, %v10539_v18 }
 0x886   : > { %6996 = vmatprep.mubr.f32.mxu0 %v10515_v22  ;;  %7476 = vmatpush3.bf16.msra.mxu0 %v7473_v35  ;;  %v7493_v35 = vpack.c.bf16 %v10531_v12, %v10529_v59  ;;  %v10541_v22 = vld [vmem:[#allocation27_spill] sm:$0xff]  ;;  %v7788_v12 = vld [vmem:[%s10266_s14] sm:$0xff]  }
 0x887   : > { %7478 = vmatprep.subr.bf16.mxu0 %v7477_v49  ;;  %v10542_v8 = vand.u32 4294901760, %v10541_v22  ;;  %7537 = vmatprep.subr.bf16.mxu1 %v7788_v12 }
 0x888   : > { %7541 = vmatpush3.bf16.msra.mxu1 %v7788_v12 }
 0x889   : > { %6997 = vmatmul.mubr.f32.gmra.mrb[50].mxu0 %v10518_v4  ;;  %v7501_v31 = vpack.c.bf16 %v10542_v8, %v10540_v57 }
 0x88a   : > { %6999 = vmatprep.mubr.f32.mxu0 %v10519_v34  ;;  %7480 = vmatpush3.bf16.msra.mxu0 %v7477_v49  ;;  %v10538_v49 = vand.u32 4294901760, %v9726_v20 }
 0x88b   : > { %7482 = vmatprep.subr.bf16.mxu0 %v7481_v27 }
 0x88d   : > { %7000 = vmatmul.mubr.f32.gmra.mrb[52].mxu0 %v10522_v62 }
 0x88e   : > { %7002 = vmatprep.mubr.f32.mxu0 %v10523_v50  ;;  %7484 = vmatpush3.bf16.msra.mxu0 %v7481_v27 }
 0x88f   : > { %7486 = vmatprep.subr.bf16.mxu0 %v7485_v2 }
 0x891   : > { %7003 = vmatmul.mubr.f32.gmra.mrb[54].mxu0 %v10526_v63 }
 0x892   : > { %7005 = vmatprep.mubr.f32.mxu0 %v10527_v37  ;;  %7488 = vmatpush3.bf16.msra.mxu0 %v7485_v2 }
 0x893   : > { %7490 = vmatprep.subr.bf16.mxu0 %v7489_v5 }
 0x895   : > { %7006 = vmatmul.mubr.f32.gmra.mrb[56].mxu0 %v10532_v11 }
 0x896   : > { %7008 = vmatprep.mubr.f32.mxu0 %v10533_v0  ;;  %7492 = vmatpush3.bf16.msra.mxu0 %v7489_v5 }
 0x897   : > { %7494 = vmatprep.subr.bf16.mxu0 %v7493_v35 }
 0x899   : > { %7009 = vmatmul.mubr.f32.gmra.mrb[58].mxu0 %v10538_v49 }
 0x89a   : > { %7011 = vmatprep.mubr.f32.mxu0 %v4007_v60  ;;  %7496 = vmatpush3.bf16.msra.mxu0 %v7493_v35  ;;  %v7789_v35 = vld [vmem:[%s10266_s14 + $0x8] sm:$0xff]  }
 0x89b   : > { %7498 = vmatprep.subr.bf16.mxu0 %v7497_v23  ;;  %7538 = vmatprep.subr.bf16.mxu1 %v7789_v35 }
 0x89c   : > { %7542 = vmatpush3.bf16.msra.mxu1 %v7789_v35 }
 0x89d   : > { %7012 = vmatmul.mubr.f32.gmra.mrb[60].mxu0 %v10543_v13 }
 0x89e   : > { %7014 = vmatprep.mubr.f32.mxu0 %v4027_v16  ;;  %7500 = vmatpush3.bf16.msra.mxu0 %v7497_v23 }
 0x89f   : > { %7502 = vmatprep.subr.bf16.mxu0 %v7501_v31 }
 0x8a1   : > { %7015 = vmatmul.mubr.f32.gmra.mrb[62].mxu0 %v4037_v36 }
 0x8a2   : > { %7504 = vmatpush3.bf16.msra.mxu0 %v7501_v31  ;;  %7049 = vmatprep.mubr.f32.mxu0 %v9606_v52 }
 0x8a3   : > { %7506 = vmatprep.subr.bf16.mxu0 %v9267_v58 }
 0x8a5   : > { %7050 = vmatmul.mubr.f32.vlgmr.msra.gmra.mrb[48].mxu0 %v9594_v33 }
 0x8a6   : > { %7052 = vmatprep.mubr.f32.mxu0 %v9626_v48  ;;  %7508 = vmatpush3.bf16.msra.mxu0 %v9267_v58 }
 0x8a7   : > { %7510 = vmatprep.subr.bf16.mxu0 %v9274_v39 }
 0x8a9   : > { %7053 = vmatmul.mubr.f32.gmra.mrb[50].mxu0 %v9621_v61 }
 0x8aa   : > { %7055 = vmatprep.mubr.f32.mxu0 %v9660_v15  ;;  %7512 = vmatpush3.bf16.msra.mxu0 %v9274_v39 }
 0x8ab   : > { %7514 = vmatprep.subr.bf16.mxu0 %v9299_v38 }
 0x8ad   : > { %7056 = vmatmul.mubr.f32.gmra.mrb[52].mxu0 %v9651_v56 }
 0x8ae   : > { %7058 = vmatprep.mubr.f32.mxu0 %v9680_v17  ;;  %7516 = vmatpush3.bf16.msra.mxu0 %v9299_v38 }
 0x8af   : > { %7518 = vmatprep.subr.bf16.mxu0 %v9323_v51 }
 0x8b1   : > { %7059 = vmatmul.mubr.f32.gmra.mrb[54].mxu0 %v9677_v29 }
 0x8b2   : > { %7061 = vmatprep.mubr.f32.mxu0 %v9705_v32  ;;  %7520 = vmatpush3.bf16.msra.mxu0 %v9323_v51 }
 0x8b3   : > { %7522 = vmatprep.subr.bf16.mxu0 %v9337_v42 }
 0x8b5   : > { %7062 = vmatmul.mubr.f32.gmra.mrb[56].mxu0 %v9702_v6 }
 0x8b6   : > { %7064 = vmatprep.mubr.f32.mxu0 %v9723_v19  ;;  %7524 = vmatpush3.bf16.msra.mxu0 %v9337_v42 }
 0x8b7   : > { %7526 = vmatprep.subr.bf16.mxu0 %v9461_v14 }
 0x8b9   : > { %7065 = vmatmul.mubr.f32.gmra.mrb[58].mxu0 %v9720_v25 }
 0x8ba   : > { %7067 = vmatprep.mubr.f32.mxu0 %v9741_v30  ;;  %7528 = vmatpush3.bf16.msra.mxu0 %v9461_v14 }
 0x8bb   : > { %7530 = vmatprep.subr.bf16.mxu0 %v10505_v24 }
 0x8bd   : > { %7068 = vmatmul.mubr.f32.gmra.mrb[60].mxu0 %v9738_v46 }
 0x8be   : > { %7070 = vmatprep.mubr.f32.mxu0 %v9759_v43  ;;  %7532 = vmatpush3.bf16.msra.mxu0 %v10505_v24 }
 0x8bf   : > { %7534 = vmatprep.subr.bf16.mxu0 %v10506_v45 }
 0x8c1   : > { %7071 = vmatmul.mubr.f32.gmra.mrb[62].mxu0 %v9756_v9 }
 0x8c2   : > { %7536 = vmatpush3.bf16.msra.mxu0 %v10506_v45  ;;  %7105 = vmatprep.mubr.f32.mxu0 %v9606_v52 }
 0x8c3   : > { %7129 = vmatprep.subr.bf16.mxu0 %v7788_v12 }
 0x8c5   : > { %7106 = vmatmul.mubr.f32.vlgmr.msra.gmra.mrb[48].mxu0 %v9594_v33 }
 0x8c6   : > { %7108 = vmatprep.mubr.f32.mxu0 %v9626_v48  ;;  %7130 = vmatpush3.bf16.msra.mxu0 %v7788_v12 }
 0x8c7   : > { %7131 = vmatprep.subr.bf16.mxu0 %v7789_v35 }
 0x8c9   : > { %7109 = vmatmul.mubr.f32.gmra.mrb[50].mxu0 %v9621_v61 }
 0x8ca   : > { %7111 = vmatprep.mubr.f32.mxu0 %v9660_v15  ;;  %7132 = vmatpush3.bf16.msra.mxu0 %v7789_v35 }
 0x8cd   : > { %7112 = vmatmul.mubr.f32.gmra.mrb[52].mxu0 %v9651_v56 }
 0x8ce   : > { %7114 = vmatprep.mubr.f32.mxu0 %v9680_v17 }
 0x8d1   : > { %7115 = vmatmul.mubr.f32.gmra.mrb[54].mxu0 %v9677_v29 }
 0x8d2   : > { %7117 = vmatprep.mubr.f32.mxu0 %v9705_v32 }
 0x8d5   : > { %7118 = vmatmul.mubr.f32.gmra.mrb[56].mxu0 %v9702_v6 }
 0x8d6   : > { %7120 = vmatprep.mubr.f32.mxu0 %v9723_v19 }
 0x8d9   : > { %7121 = vmatmul.mubr.f32.gmra.mrb[58].mxu0 %v9720_v25 }
 0x8da   : > { %7123 = vmatprep.mubr.f32.mxu0 %v9741_v30 }
 0x8dd   : > { %7124 = vmatmul.mubr.f32.gmra.mrb[60].mxu0 %v9738_v46 }
 0x8de   : > { %7126 = vmatprep.mubr.f32.mxu0 %v9759_v43 }
 0x8e1   : > { %7127 = vmatmul.mubr.f32.gmra.mrb[62].mxu0 %v9756_v9 }
 0x998   : > { %v7107_v58 = vpop.f32.mrb[48].mxu0 }
 0x999   : > { %v9963_v39 = vmul.f32 0.00390625, %v7107_v58  ;;  %v4996_v38 = vpop.f32.mrb[49].mxu0 }
 0x99a   : > { %v9965_v51 = vmul.f32 0.00390625, %v4996_v38 }
 0x99b   : > { %v5107_v42 = vmul.f32 %v9963_v39, %v9963_v39 }
 0x99c   : > { %v7110_v14 = vpop.f32.mrb[50].mxu0  ;;  %v5106_v7 = vmul.f32 %v9965_v51, %v9965_v51 }
 0x99d   : > { %v9971_v30 = vmul.f32 0.00390625, %v7110_v14  ;;  %5140 = vrot.lane.b32.xlu1 %v5107_v42, %s8026_s29  ;;  %v5008_v43 = vpop.f32.mrb[51].mxu0 }
 0x99e   : > { %v9974_v32 = vmul.f32 0.00390625, %v5008_v43  ;;  %5138 = vrot.lane.b32.xlu0 %v5106_v7, %s8026_s29 }
 0x99f   : > { %v5109_v33 = vmul.f32 %v9971_v30, %v9971_v30 }
 0x9a0   : > { %v7113_v52 = vpop.f32.mrb[52].mxu0  ;;  %v5108_v61 = vmul.f32 %v9974_v32, %v9974_v32 }
 0x9a1   : > { %v9981_v48 = vmul.f32 0.00390625, %v7113_v52  ;;  %5144 = vrot.lane.b32.xlu1 %v5109_v33, %s8026_s29  ;;  %v5020_v56 = vpop.f32.mrb[53].mxu0  ;;  %v7790_v52 = vld [vmem:[%s10266_s14 + $0x10] sm:$0xff]  }
 0x9a2   : > { %v9984_v15 = vmul.f32 0.00390625, %v5020_v56  ;;  %5142 = vrot.lane.b32.xlu0 %v5108_v61, %s8026_s29  ;;  %7133 = vmatprep.subr.bf16.mxu0 %v7790_v52 }
 0x9a3   : > { %v5111_v17 = vmul.f32 %v9981_v48, %v9981_v48  ;;  %7539 = vmatprep.subr.bf16.mxu1 %v7790_v52  ;;  %7134 = vmatpush3.bf16.msra.mxu0 %v7790_v52 }
 0x9a4   : > { %v7116_v29 = vpop.f32.mrb[54].mxu0  ;;  %v5110_v6 = vmul.f32 %v9984_v15, %v9984_v15  ;;  %7543 = vmatpush3.bf16.msra.mxu1 %v7790_v52 }
 0x9a5   : > { %v9991_v41 = vmul.f32 0.00390625, %v7116_v29  ;;  %5148 = vrot.lane.b32.xlu1 %v5111_v17, %s8026_s29  ;;  %v5032_v25 = vpop.f32.mrb[55].mxu0 }
 0x9a6   : > { %v9994_v19 = vmul.f32 0.00390625, %v5032_v25  ;;  %5146 = vrot.lane.b32.xlu0 %v5110_v6, %s8026_s29 }
 0x9a7   : > { %v5113_v20 = vmul.f32 %v9991_v41, %v9991_v41 }
 0x9a8   : > { %v7119_v46 = vpop.f32.mrb[56].mxu0  ;;  %v5112_v53 = vmul.f32 %v9994_v19, %v9994_v19 }
 0x9a9   : > { %v10001_v9 = vmul.f32 0.00390625, %v7119_v46  ;;  %5152 = vrot.lane.b32.xlu1 %v5113_v20, %s8026_s29  ;;  %v5044_v60 = vpop.f32.mrb[57].mxu0 }
 0x9aa   : > { %v10004_v44 = vmul.f32 0.00390625, %v5044_v60  ;;  %5150 = vrot.lane.b32.xlu0 %v5112_v53, %s8026_s29  ;;  %v7791_v53 = vld [vmem:[%s10266_s14 + $0x18] sm:$0xff]  }
 0x9ab   : > { %v5115_v36 = vmul.f32 %v10001_v9, %v10001_v9  ;;  %7135 = vmatprep.subr.bf16.mxu0 %v7791_v53  ;;  %7540 = vmatprep.subr.bf16.mxu1 %v7791_v53 }
 0x9ac   : > { %v7122_v16 = vpop.f32.mrb[58].mxu0  ;;  %v5114_v24 = vmul.f32 %v10004_v44, %v10004_v44  ;;  %7136 = vmatpush3.bf16.msra.mxu0 %v7791_v53  ;;  %7544 = vmatpush3.bf16.msra.mxu1 %v7791_v53 }
 0x9ad   : > { %v10011_v45 = vmul.f32 0.00390625, %v7122_v16  ;;  %5156 = vrot.lane.b32.xlu1 %v5115_v36, %s8026_s29  ;;  %v5056_v27 = vpop.f32.mrb[59].mxu0 }
 0x9ae   : > { %v10014_v4 = vmul.f32 0.00390625, %v5056_v27  ;;  %5154 = vrot.lane.b32.xlu0 %v5114_v24, %s8026_s29 }
 0x9af   : > { %v5117_v34 = vmul.f32 %v10011_v45, %v10011_v45 }
 0x9b0   : > { %v7125_v47 = vpop.f32.mrb[60].mxu0  ;;  %v5116_v55 = vmul.f32 %v10014_v4, %v10014_v4 }
 0x9b1   : > { %v10021_v2 = vmul.f32 0.00390625, %v7125_v47  ;;  %5160 = vrot.lane.b32.xlu1 %v5117_v34, %s8026_s29  ;;  %v5068_v62 = vpop.f32.mrb[61].mxu0 }
 0x9b2   : > { %v10024_v50 = vmul.f32 0.00390625, %v5068_v62  ;;  %5158 = vrot.lane.b32.xlu0 %v5116_v55, %s8026_s29 }
 0x9b3   : > { %v5119_v54 = vmul.f32 %v10021_v2, %v10021_v2 }
 0x9b4   : > { %v7128_v3 = vpop.f32.mrb[62].mxu0  ;;  %v5118_v5 = vmul.f32 %v10024_v50, %v10024_v50 }
 0x9b5   : > { %v10031_v63 = vmul.f32 0.00390625, %v7128_v3  ;;  %5164 = vrot.lane.b32.xlu1 %v5119_v54, %s8026_s29  ;;  %v5080_v37 = vpop.f32.mrb[63].mxu0 }
 0x9b6   : > { %v10034_v28 = vmul.f32 0.00390625, %v5080_v37  ;;  %5162 = vrot.lane.b32.xlu0 %v5118_v5, %s8026_s29 }
 0x9b7   : > { %v5121_v59 = vmul.f32 %v10031_v63, %v10031_v63 }
 0x9b8   : > { %v5120_v1 = vmul.f32 %v10034_v28, %v10034_v28 }
 0x9b9   : > { %5168 = vrot.lane.b32.xlu1 %v5121_v59, %s8026_s29 }
 0x9ba   : > { %5166 = vrot.lane.b32.xlu0 %v5120_v1, %s8026_s29 }
 0xa0f   : > { %v5141_v11 = vpop.permute.xlu1 %5140 }
 0xa10   : > { %v5187_v0 = vsub.f32 %v9963_v39, %v5141_v11  ;;  %v5139_v10 = vpop.permute.xlu0 %5138 }
 0xa11   : > { %v5186_v26 = vsub.f32 %v9965_v51, %v5139_v10 }
 0xa12   : > { %v5203_v21 = vmax.f32 %v5187_v0, 0.0 }
 0xa13   : > { %v5202_v40 = vmax.f32 %v5186_v26, 0.0  ;;  %v5145_v23 = vpop.permute.xlu1 %5144 }
 0xa14   : > { %v5235_v49 = vadd.f32 1e-05, %v5203_v21  ;;  %v5189_v18 = vsub.f32 %v9971_v30, %v5145_v23  ;;  %v5143_v57 = vpop.permute.xlu0 %5142 }
 0xa15   : > { %v5234_v22 = vadd.f32 1e-05, %v5202_v40  ;;  %v5188_v8 = vsub.f32 %v9974_v32, %v5143_v57 }
 0xa16   : > { %7984 = vrsqrt.f32 %v5235_v49  ;;  %v5205_v31 = vmax.f32 %v5189_v18, 0.0 }
 0xa17   : > { %7986 = vrsqrt.f32 %v5234_v22  ;;  %v5204_v13 = vmax.f32 %v5188_v8, 0.0  ;;  %v5149_v58 = vpop.permute.xlu1 %5148 }
 0xa18   : > { %v5237_v38 = vadd.f32 1e-05, %v5205_v31  ;;  %v5191_v42 = vsub.f32 %v9981_v48, %v5149_v58  ;;  %v5147_v14 = vpop.permute.xlu0 %5146 }
 0xa19   : > { %v5236_v7 = vadd.f32 1e-05, %v5204_v13  ;;  %v5190_v43 = vsub.f32 %v9984_v15, %v5147_v14 }
 0xa1a   : > { %7988 = vrsqrt.f32 %v5237_v38  ;;  %v5207_v33 = vmax.f32 %v5191_v42, 0.0 }
 0xa1b   : > { %7990 = vrsqrt.f32 %v5236_v7  ;;  %v5206_v61 = vmax.f32 %v5190_v43, 0.0  ;;  %v5153_v56 = vpop.permute.xlu1 %5152 }
 0xa1c   : > { %v5239_v17 = vadd.f32 1e-05, %v5207_v33  ;;  %v5193_v29 = vsub.f32 %v9991_v41, %v5153_v56  ;;  %v5151_v6 = vpop.permute.xlu0 %5150 }
 0xa1d   : > { %v5238_v25 = vadd.f32 1e-05, %v5206_v61  ;;  %v5192_v20 = vsub.f32 %v9994_v19, %v5151_v6 }
 0xa1e   : > { %7992 = vrsqrt.f32 %v5239_v17  ;;  %v5209_v46 = vmax.f32 %v5193_v29, 0.0 }
 0xa1f   : > { %7994 = vrsqrt.f32 %v5238_v25  ;;  %v5208_v60 = vmax.f32 %v5192_v20, 0.0  ;;  %v5157_v36 = vpop.permute.xlu1 %5156 }
 0xa20   : > { %v7985_v16 = vpop.eup %7984  ;;  %v5241_v24 = vadd.f32 1e-05, %v5209_v46  ;;  %v5195_v27 = vsub.f32 %v10001_v9, %v5157_v36  ;;  %v5155_v34 = vpop.permute.xlu0 %5154 }
 0xa21   : > { %v7987_v47 = vpop.eup %7986  ;;  %v5240_v55 = vadd.f32 1e-05, %v5208_v60  ;;  %v5194_v62 = vsub.f32 %v10004_v44, %v5155_v34  ;;  %5284 = vrot.lane.b32.xlu1 %v7985_v16, %s8026_s29  ;;  %v5347_v34 = vld [vmem:[%s10262_s10 + $0x8] sm:$0xff] }
 0xa22   : > { %7996 = vrsqrt.f32 %v5241_v24  ;;  %v5211_v54 = vmax.f32 %v5195_v27, 0.0  ;;  %5282 = vrot.lane.b32.xlu0 %v7987_v47, %s8026_s29  ;;  %v10544_v24 = vld [vmem:[#allocation3_spill] sm:$0xff] }
 0xa23   : > { %7998 = vrsqrt.f32 %v5240_v55  ;;  %v5210_v3 = vmax.f32 %v5194_v62, 0.0  ;;  %v5161_v5 = vpop.permute.xlu1 %5160  ;;  %v5219_v27 = vsub.f32 %v10544_v24, %v9963_v39  ;;  %v10545_v55 = vld [vmem:[#allocation2_spill] sm:$0xff] }
 0xa24   : > { %v7989_v37 = vpop.eup %7988  ;;  %v5243_v59 = vadd.f32 1e-05, %v5211_v54  ;;  %v5197_v1 = vsub.f32 %v10011_v45, %v5161_v5  ;;  %v5159_v12 = vpop.permute.xlu0 %5158  ;;  %v5218_v62 = vsub.f32 %v10545_v55, %v9965_v51 }
 0xa25   : > { %v7991_v35 = vpop.eup %7990  ;;  %v5242_v11 = vadd.f32 1e-05, %v5210_v3  ;;  %v5196_v0 = vsub.f32 %v10014_v4, %v5159_v12  ;;  %5288 = vrot.lane.b32.xlu1 %v7989_v37, %s8026_s29  ;;  %v5346_v3 = vld [vmem:[%s10262_s10] sm:$0xff]  ;;  %v5379_v37 = vld [vmem:[%s10263_s11 + $0x8] sm:$0xff]  ;;  %v10546_v12 = vld [vmem:[#allocation5_spill] sm:$0xff] }
 0xa26   : > { %8000 = vrsqrt.f32 %v5243_v59  ;;  %v5213_v10 = vmax.f32 %v5197_v1, 0.0  ;;  %5286 = vrot.lane.b32.xlu0 %v7991_v35, %s8026_s29  ;;  %v5378_v1 = vld [vmem:[%s10263_s11] sm:$0xff]  ;;  %v5221_v35 = vsub.f32 %v10546_v12, %v9971_v30  ;;  %v5381_v30 = vld [vmem:[%s10263_s11 + $0x18] sm:$0xff] }
 0xa27   : > { %8002 = vrsqrt.f32 %v5242_v11  ;;  %v5212_v26 = vmax.f32 %v5196_v0, 0.0  ;;  %v5165_v21 = vpop.permute.xlu1 %5164  ;;  %v5349_v11 = vld [vmem:[%s10262_s10 + $0x18] sm:$0xff]  ;;  %v10553_v12 = vld [vmem:[#allocation10_spill] sm:$0xff] }
 0xa28   : > { %v7993_v40 = vpop.eup %7992  ;;  %v5245_v23 = vadd.f32 1e-05, %v5213_v10  ;;  %v5199_v49 = vsub.f32 %v10021_v2, %v5165_v21  ;;  %v5163_v18 = vpop.permute.xlu0 %5162  ;;  %v10547_v10 = vld [vmem:[#allocation4_spill] sm:$0xff] }
 0xa29   : > { %v7995_v57 = vpop.eup %7994  ;;  %v5244_v22 = vadd.f32 1e-05, %v5212_v26  ;;  %v5198_v8 = vsub.f32 %v10024_v50, %v5163_v18  ;;  %5292 = vrot.lane.b32.xlu1 %v7993_v40, %s8026_s29  ;;  %v5220_v26 = vsub.f32 %v10547_v10, %v9974_v32  ;;  %v10548_v32 = vld [vmem:[#allocation7_spill] sm:$0xff] }
 0xa2a   : > { %8004 = vrsqrt.f32 %v5245_v23  ;;  %v5215_v31 = vmax.f32 %v5199_v49, 0.0  ;;  %5290 = vrot.lane.b32.xlu0 %v7995_v57, %s8026_s29  ;;  %v5348_v23 = vld [vmem:[%s10262_s10 + $0x10] sm:$0xff] }
 0xa2b   : > { %8006 = vrsqrt.f32 %v5244_v22  ;;  %v5214_v13 = vmax.f32 %v5198_v8, 0.0  ;;  %v5169_v58 = vpop.permute.xlu1 %5168  ;;  %v5380_v8 = vld [vmem:[%s10263_s11 + $0x10] sm:$0xff] }
 0xa2c   : > { %v7997_v38 = vpop.eup %7996  ;;  %v5247_v42 = vadd.f32 1e-05, %v5215_v31  ;;  %v5201_v14 = vsub.f32 %v10031_v63, %v5169_v58  ;;  %v5167_v7 = vpop.permute.xlu0 %5166  ;;  %v5223_v31 = vsub.f32 %v10548_v32, %v9981_v48  ;;  %v5383_v48 = vld [vmem:[%s10263_s11 + $0x28] sm:$0xff] }
 0xa2d   : > { %v7999_v43 = vpop.eup %7998  ;;  %v5246_v33 = vadd.f32 1e-05, %v5214_v13  ;;  %v5200_v52 = vsub.f32 %v10034_v28, %v5167_v7  ;;  %5296 = vrot.lane.b32.xlu1 %v7997_v38, %s8026_s29  ;;  %v5351_v38 = vld [vmem:[%s10262_s10 + $0x28] sm:$0xff] }
 0xa2e   : > { %8008 = vrsqrt.f32 %v5247_v42  ;;  %v5217_v61 = vmax.f32 %v5201_v14, 0.0  ;;  %5294 = vrot.lane.b32.xlu0 %v7999_v43, %s8026_s29  ;;  %v10549_v14 = vld [vmem:[#allocation6_spill] sm:$0xff] }
 0xa2f   : > { %8010 = vrsqrt.f32 %v5246_v33  ;;  %v5216_v56 = vmax.f32 %v5200_v52, 0.0  ;;  %v5222_v7 = vsub.f32 %v10549_v14, %v9984_v15  ;;  %v5350_v52 = vld [vmem:[%s10262_s10 + $0x20] sm:$0xff] }
 0xa30   : > { %v8001_v17 = vpop.eup %8000  ;;  %v5249_v29 = vadd.f32 1e-05, %v5217_v61  ;;  %v5382_v15 = vld [vmem:[%s10263_s11 + $0x20] sm:$0xff] }
 0xa31   : > { %v8003_v6 = vpop.eup %8002  ;;  %v5248_v25 = vadd.f32 1e-05, %v5216_v56  ;;  %5300 = vrot.lane.b32.xlu1 %v8001_v17, %s8026_s29 }
 0xa32   : > { %8012 = vrsqrt.f32 %v5249_v29  ;;  %5298 = vrot.lane.b32.xlu0 %v8003_v6, %s8026_s29  ;;  %v10550_v6 = vld [vmem:[#allocation9_spill] sm:$0xff] }
 0xa33   : > { %8014 = vrsqrt.f32 %v5248_v25  ;;  %v5225_v25 = vsub.f32 %v10550_v6, %v9991_v41  ;;  %v5385_v41 = vld [vmem:[%s10263_s11 + $0x38] sm:$0xff] }
 0xa34   : > { %v8005_v20 = vpop.eup %8004 }
 0xa35   : > { %v8007_v46 = vpop.eup %8006  ;;  %5304 = vrot.lane.b32.xlu1 %v8005_v20, %s8026_s29 }
 0xa36   : > { %5302 = vrot.lane.b32.xlu0 %v8007_v46, %s8026_s29 }
 0xa38   : > { %v8009_v53 = vpop.eup %8008 }
 0xa39   : > { %v8011_v60 = vpop.eup %8010  ;;  %5308 = vrot.lane.b32.xlu1 %v8009_v53, %s8026_s29  ;;  %v5353_v53 = vld [vmem:[%s10262_s10 + $0x38] sm:$0xff] }
 0xa3a   : > { %5306 = vrot.lane.b32.xlu0 %v8011_v60, %s8026_s29 }
 0xa3c   : > { %v8013_v36 = vpop.eup %8012 }
 0xa3d   : > { %v8015_v16 = vpop.eup %8014  ;;  %5312 = vrot.lane.b32.xlu1 %v8013_v36, %s8026_s29  ;;  %v10551_v36 = vld [vmem:[#allocation8_spill] sm:$0xff] }
 0xa3e   : > { %5310 = vrot.lane.b32.xlu0 %v8015_v16, %s8026_s29  ;;  %v5224_v16 = vsub.f32 %v10551_v36, %v9994_v19  ;;  %v5384_v19 = vld [vmem:[%s10263_s11 + $0x30] sm:$0xff]  ;;  %v10558_v36 = vld [vmem:[#allocation17_spill] sm:$0xff] }
 0xa93   : > { %v5285_v47 = vpop.permute.xlu1 %5284 }
 0xa94   : > { %v5331_v54 = vmul.f32 %v5285_v47, %v5219_v27  ;;  %v5283_v5 = vpop.permute.xlu0 %5282 }
 0xa95   : > { %v5330_v59 = vmul.f32 %v5283_v5, %v5218_v62 }
 0xa96   : > { %v5363_v39 = vmul.f32 %v5347_v34, %v5331_v54  ;;  %v5352_v34 = vld [vmem:[%s10262_s10 + $0x30] sm:$0xff] }
 0xa97   : > { %v5362_v51 = vmul.f32 %v5346_v3, %v5330_v59  ;;  %v5289_v0 = vpop.permute.xlu1 %5288  ;;  %v10552_v3 = vld [vmem:[#allocation11_spill] sm:$0xff] }
 0xa98   : > { %v5395_v21 = vadd.f32 %v5379_v37, %v5363_v39  ;;  %v5333_v40 = vmul.f32 %v5289_v0, %v5221_v35  ;;  %v5287_v49 = vpop.permute.xlu0 %5286  ;;  %v5227_v5 = vsub.f32 %v10552_v3, %v10001_v9  ;;  %v5355_v39 = vld [vmem:[%s10262_s10 + $0x48] sm:$0xff]  ;;  %v5226_v35 = vsub.f32 %v10553_v12, %v10004_v44  ;;  %v5354_v0 = vld [vmem:[%s10262_s10 + $0x40] sm:$0xff] }
 0xa99   : > { %v5394_v18 = vadd.f32 %v5378_v1, %v5362_v51  ;;  %v5332_v57 = vmul.f32 %v5287_v49, %v5220_v26  ;;  %v5387_v9 = vld [vmem:[%s10263_s11 + $0x48] sm:$0xff]  ;;  %v5386_v44 = vld [vmem:[%s10263_s11 + $0x40] sm:$0xff] }
 0xa9a   : > { %v5365_v22 = vmul.f32 %v5349_v11, %v5333_v40 }
 0xa9b   : > { %v5410_v13 = vpack.c.bf16 %v5395_v21, %v5394_v18  ;;  %v5364_v58 = vmul.f32 %v5348_v23, %v5332_v57  ;;  %v5293_v42 = vpop.permute.xlu1 %5292  ;;  %v10554_v23 = vld [vmem:[#allocation13_spill] sm:$0xff] }
 0xa9c   : > { %v5397_v43 = vadd.f32 %v5381_v30, %v5365_v22  ;;  %v5335_v33 = vmul.f32 %v5293_v42, %v5223_v31  ;;  %v5291_v61 = vpop.permute.xlu0 %5290  ;;  %v5229_v49 = vsub.f32 %v10554_v23, %v10011_v45  ;;  %v5357_v57 = vld [vmem:[%s10262_s10 + $0x58] sm:$0xff] }
 0xa9d   : > { %v5396_v56 = vadd.f32 %v5380_v8, %v5364_v58  ;;  %v5334_v17 = vmul.f32 %v5291_v61, %v5222_v7  ;;  %7137 = vmatprep.mubr.msk.bf16.mxu0 %vm2469_vm3, %v5410_v13  ;;  %v10555_v8 = vld [vmem:[#allocation12_spill] sm:$0xff]  ;;  %v5389_v45 = vld [vmem:[%s10263_s11 + $0x58] sm:$0xff] }
 0xa9e   : > { %v5367_v29 = vmul.f32 %v5351_v38, %v5335_v33  ;;  %v5228_v32 = vsub.f32 %v10555_v8, %v10014_v4  ;;  %v5356_v58 = vld [vmem:[%s10262_s10 + $0x50] sm:$0xff] }
 0xa9f   : > { %v5411_v20 = vpack.c.bf16 %v5397_v43, %v5396_v56  ;;  %v5366_v46 = vmul.f32 %v5350_v52, %v5334_v17  ;;  %v5297_v60 = vpop.permute.xlu1 %5296  ;;  %v5388_v4 = vld [vmem:[%s10263_s11 + $0x50] sm:$0xff]  ;;  %v10556_v43 = vld [vmem:[#allocation15_spill] sm:$0xff]  ;;  %v10557_v17 = vld [vmem:[#allocation14_spill] sm:$0xff] }
 0xaa0   : > { %v5399_v24 = vadd.f32 %v5383_v48, %v5367_v29  ;;  %v5337_v27 = vmul.f32 %v5297_v60, %v5225_v25  ;;  %v5295_v47 = vpop.permute.xlu0 %5294  ;;  %v5231_v33 = vsub.f32 %v10556_v43, %v10021_v2  ;;  %v5359_v56 = vld [vmem:[%s10262_s10 + $0x68] sm:$0xff]  ;;  %v5230_v29 = vsub.f32 %v10557_v17, %v10024_v50  ;;  %v5358_v25 = vld [vmem:[%s10262_s10 + $0x60] sm:$0xff] }
 0xaa1   : > { %v5398_v55 = vadd.f32 %v5382_v15, %v5366_v46  ;;  %v5336_v62 = vmul.f32 %v5295_v47, %v5224_v16  ;;  %7138 = vmatmul.mubr.msk.bf16.vlgmr.msra.gmra.mrb[64].mxu0 %vm2469_vm3, %v5411_v20  ;;  %v5391_v2 = vld [vmem:[%s10263_s11 + $0x68] sm:$0xff]  ;;  %v5390_v50 = vld [vmem:[%s10263_s11 + $0x60] sm:$0xff]  ;;  %v5233_v16 = vsub.f32 %v10558_v36, %v10031_v63  ;;  %v5393_v63 = vld [vmem:[%s10263_s11 + $0x78] sm:$0xff] }
 0xaa2   : > { %v5369_v54 = vmul.f32 %v5353_v53, %v5337_v27 }
 0xaa3   : > { %v5412_v37 = vpack.c.bf16 %v5399_v24, %v5398_v55  ;;  %v5368_v59 = vmul.f32 %v5352_v34, %v5336_v62  ;;  %v5301_v1 = vpop.permute.xlu1 %5300  ;;  %v5361_v34 = vld [vmem:[%s10262_s10 + $0x78] sm:$0xff]  ;;  %v10559_v55 = vld [vmem:[#allocation16_spill] sm:$0xff] }
 0xaa4   : > { %v5401_v51 = vadd.f32 %v5385_v41, %v5369_v54  ;;  %v5339_v11 = vmul.f32 %v5301_v1, %v5227_v5  ;;  %v5299_v10 = vpop.permute.xlu0 %5298  ;;  %v5232_v41 = vsub.f32 %v10559_v55, %v10034_v28  ;;  %v5392_v28 = vld [vmem:[%s10263_s11 + $0x70] sm:$0xff] }
 0xaa5   : > { %v5400_v26 = vadd.f32 %v5384_v19, %v5368_v59  ;;  %v5338_v21 = vmul.f32 %v5299_v10, %v5226_v35  ;;  %7141 = vmatprep.mubr.msk.bf16.mxu1 %vm2469_vm3, %v5412_v37  ;;  %v5360_v19 = vld [vmem:[%s10262_s10 + $0x70] sm:$0xff] }
 0xaa6   : > { %v5371_v40 = vmul.f32 %v5355_v39, %v5339_v11  ;;  %v5776_v11 = vld [vmem:[%s10267_s15] ss:$0 sm:$0xff] }
 0xaa7   : > { %v5413_v18 = vpack.c.bf16 %v5401_v51, %v5400_v26  ;;  %v5370_v30 = vmul.f32 %v5354_v0, %v5338_v21  ;;  %v5305_v22 = vpop.permute.xlu1 %5304 }
 0xaa8   : > { %v5403_v31 = vadd.f32 %v5387_v9, %v5371_v40  ;;  %v5341_v13 = vmul.f32 %v5305_v22, %v5229_v49  ;;  %v5303_v38 = vpop.permute.xlu0 %5302 }
 0xaa9   : > { %v5402_v42 = vadd.f32 %v5386_v44, %v5370_v30  ;;  %v5340_v14 = vmul.f32 %v5303_v38, %v5228_v32  ;;  %7142 = vmatmul.mubr.msk.bf16.vlgmr.msra.gmra.mrb[80].mxu1 %vm2469_vm3, %v5413_v18 }
 0xaaa   : > { %v5373_v7 = vmul.f32 %v5357_v57, %v5341_v13 }
 0xaab   : > { %v5414_v52 = vpack.c.bf16 %v5403_v31, %v5402_v42  ;;  %v5372_v61 = vmul.f32 %v5356_v58, %v5340_v14  ;;  %v5309_v48 = vpop.permute.xlu1 %5308 }
 0xaac   : > { %v5405_v15 = vadd.f32 %v5389_v45, %v5373_v7  ;;  %v5343_v6 = vmul.f32 %v5309_v48, %v5231_v33  ;;  %v5307_v20 = vpop.permute.xlu0 %5306 }
 0xaad   : > { %v5404_v46 = vadd.f32 %v5388_v4, %v5372_v61  ;;  %v5342_v53 = vmul.f32 %v5307_v20, %v5230_v29  ;;  %7145 = vmatprep.mubr.msk.bf16.mxu1 %vm2469_vm3, %v5414_v52 }
 0xaae   : > { %v5375_v60 = vmul.f32 %v5359_v56, %v5343_v6 }
 0xaaf   : > { %v5415_v24 = vpack.c.bf16 %v5405_v15, %v5404_v46  ;;  %v5374_v27 = vmul.f32 %v5358_v25, %v5342_v53  ;;  %v5313_v47 = vpop.permute.xlu1 %5312 }
 0xab0   : > { %v5407_v62 = vadd.f32 %v5391_v2, %v5375_v60  ;;  %v5345_v54 = vmul.f32 %v5313_v47, %v5233_v16  ;;  %v5311_v3 = vpop.permute.xlu0 %5310 }
 0xab1   : > { %v5406_v5 = vadd.f32 %v5390_v50, %v5374_v27  ;;  %v5344_v37 = vmul.f32 %v5311_v3, %v5232_v41  ;;  %7146 = vmatmul.mubr.msk.bf16.gmra.mrb[84].mxu1 %vm2469_vm3, %v5415_v24 }
 0xab2   : > { %v5377_v59 = vmul.f32 %v5361_v34, %v5345_v54 }
 0xab3   : > { %v5416_v39 = vpack.c.bf16 %v5407_v62, %v5406_v5  ;;  %v5376_v1 = vmul.f32 %v5360_v19, %v5344_v37 }
 0xab4   : > { %v5409_v12 = vadd.f32 %v5393_v63, %v5377_v59 }
 0xab5   : > { %v5408_v35 = vadd.f32 %v5392_v28, %v5376_v1  ;;  %7149 = vmatprep.mubr.msk.bf16.mxu1 %vm2469_vm3, %v5416_v39 }
 0xab7   : > { %v5417_v51 = vpack.c.bf16 %v5409_v12, %v5408_v35 }
 0xab9   : > { %7150 = vmatmul.mubr.msk.bf16.gmra.mrb[88].mxu1 %vm2469_vm3, %v5417_v51 }
 0xb74   : > { %v7139_v0 = vpop.f32.mrb[64].mxu0 }
 0xb75   : > { %v5524_v10 = vadd.f32 %v7139_v0, %v5776_v11  ;;  %v5515_v26 = vpop.f32.mrb[65].mxu0 }
 0xb76   : > { %v5516_v9 = vadd.f32 %v5776_v11, %v5515_v26  ;;  %v7140_v21 = vpop.f32.mrb[66].mxu0 }
 0xb77   : > { %5580 = vst [vmem:[%s10231_s18 + $0x10] sm:$0xff] %v5524_v10  ;;  %v5527_v40 = vadd.f32 %v7140_v21, %v5776_v11  ;;  %v5518_v44 = vpop.f32.mrb[67].mxu0 }
 0xb78   : > { %5578 = vst [vmem:[%s10231_s18] sm:$0xff] %v5516_v9  ;;  %v5519_v23 = vadd.f32 %v5776_v11, %v5518_v44 }
 0xb79   : > { %5581 = vst [vmem:[%s10231_s18 + $0x18] sm:$0xff] %v5527_v40 }
 0xb7a   : > { %5579 = vst [vmem:[%s10231_s18 + $0x8] sm:$0xff] %v5519_v23 }
 0xb7c   : > { %v7143_v49 = vpop.f32.mrb[80].mxu1 }
 0xb7d   : > { %v5540_v18 = vadd.f32 %v7143_v49, %v5776_v11  ;;  %v5531_v30 = vpop.f32.mrb[81].mxu1 }
 0xb7e   : > { %v5532_v57 = vadd.f32 %v5776_v11, %v5531_v30  ;;  %v7144_v22 = vpop.f32.mrb[82].mxu1 }
 0xb7f   : > { %5584 = vst [vmem:[%s10231_s18 + $0x30] sm:$0xff] %v5540_v18  ;;  %v5543_v8 = vadd.f32 %v7144_v22, %v5776_v11  ;;  %v5534_v32 = vpop.f32.mrb[83].mxu1 }
 0xb80   : > { %5582 = vst [vmem:[%s10231_s18 + $0x20] sm:$0xff] %v5532_v57  ;;  %v5535_v31 = vadd.f32 %v5776_v11, %v5534_v32 }
 0xb81   : > { %5585 = vst [vmem:[%s10231_s18 + $0x38] sm:$0xff] %v5543_v8 }
 0xb82   : > { %5583 = vst [vmem:[%s10231_s18 + $0x28] sm:$0xff] %v5535_v31 }
 0xb84   : > { %v7147_v13 = vpop.f32.mrb[84].mxu1 }
 0xb85   : > { %v5556_v58 = vadd.f32 %v7147_v13, %v5776_v11  ;;  %v5547_v38 = vpop.f32.mrb[85].mxu1 }
 0xb86   : > { %v5548_v42 = vadd.f32 %v5776_v11, %v5547_v38  ;;  %v7148_v45 = vpop.f32.mrb[86].mxu1 }
 0xb87   : > { %5588 = vst [vmem:[%s10231_s18 + $0x50] sm:$0xff] %v5556_v58  ;;  %v5559_v14 = vadd.f32 %v7148_v45, %v5776_v11  ;;  %v5550_v7 = vpop.f32.mrb[87].mxu1 }
 0xb88   : > { %5586 = vst [vmem:[%s10231_s18 + $0x40] sm:$0xff] %v5548_v42  ;;  %v5551_v4 = vadd.f32 %v5776_v11, %v5550_v7 }
 0xb89   : > { %5589 = vst [vmem:[%s10231_s18 + $0x58] sm:$0xff] %v5559_v14 }
 0xb8a   : > { %5587 = vst [vmem:[%s10231_s18 + $0x48] sm:$0xff] %v5551_v4 }
 0xb8c   : > { %v7151_v43 = vpop.f32.mrb[88].mxu1 }
 0xb8d   : > { %v5572_v33 = vadd.f32 %v7151_v43, %v5776_v11  ;;  %v5563_v52 = vpop.f32.mrb[89].mxu1 }
 0xb8e   : > { %v5564_v61 = vadd.f32 %v5776_v11, %v5563_v52  ;;  %v7152_v56 = vpop.f32.mrb[90].mxu1 }
 0xb8f   : > { %5592 = vst [vmem:[%s10231_s18 + $0x70] sm:$0xff] %v5572_v33  ;;  %v5575_v48 = vadd.f32 %v7152_v56, %v5776_v11  ;;  %v5566_v17 = vpop.f32.mrb[91].mxu1 }
 0xb90   : > { %5590 = vst [vmem:[%s10231_s18 + $0x60] sm:$0xff] %v5564_v61  ;;  %v5567_v29 = vadd.f32 %v5776_v11, %v5566_v17 }
 0xb91   : > { %5593 = vst [vmem:[%s10231_s18 + $0x78] sm:$0xff] %v5575_v48 }
 0xb92   : > { %5591 = vst [vmem:[%s10231_s18 + $0x68] sm:$0xff] %v5567_v29 }
 0xb93 PF: > { %s26_s21 = sadd.s32 1, %s8022_s21  }
 0xb94   : > { %p23_p4 = scmp.ge.s32.totalorder %s26_s21, 4  }
 0xb96   :  { %25 = sbr.rel (!%p23_p4) target bundleno = 2 (0x2), region = 117 }

</bundles_post_ra>
